<compile_context>
chip_gen: v7x
topology: tpu7x:2x2x1
jax: 0.10.0
libtpu: 0.0.40
codegen_flags: <defaults>
</compile_context>

<pallas_src>
import functools
import math

import jax
import jax.numpy as jnp
from jax.experimental import pallas as pl
from jax.experimental.pallas import tpu as pltpu


_SQRT_HALF = 0.7071067811865476
_PATCH_CHUNK_BYTES = 4 * 2 ** 20     # bound on the live f32 im2col patch chunk
_TARGET_M = 512                      # target matmul M (feeds v6e/v7x 2x256 MXU)


# ----------------------------------------------------------------------------
# Activations (f32 VPU/EUP epilogue inside the kernel)
# ----------------------------------------------------------------------------
def _apply_act(x, act):
    if act == "relu":
        return jnp.maximum(x, 0.0)
    if act == "gelu":
        # PyTorch nn.GELU() default = exact (erf-based) GELU
        return 0.5 * x * (1.0 + jax.lax.erf(x * _SQRT_HALF))
    if act == "sine":
        return jnp.sin(30.0 * x)
    if act == "tanh":
        return jnp.tanh(x)
    if act == "sigmoid":
        return jax.nn.sigmoid(x)
    if act == "leaky_relu":
        return jnp.where(x >= 0, x, 0.01 * x)
    if act == "none":
        return x
    raise ValueError(f"Activation type {act} not recognized.")


def _round_up(v, m):
    return ((v + m - 1) // m) * m


def _padded_tile_bytes(shape, itemsize):
    """VMEM footprint of an array accounting for (8, 128) tile padding."""
    s = list(shape)
    s[-1] = _round_up(s[-1], 128)
    if len(s) >= 2:
        s[-2] = _round_up(s[-2], 8)
    n = 1
    for d in s:
        n *= d
    return n * itemsize


def _vmem_capacity_bytes():
    try:
        cap = getattr(pltpu.get_tpu_info(), "vmem_capacity_bytes", None)
        if cap:
            return int(cap)
    except Exception:
        pass
    return 64 * 2 ** 20              # conservative (v7x-sized) fallback


# ----------------------------------------------------------------------------
# Fused whole-network kernel: one grid step == one batch tile
# ----------------------------------------------------------------------------
def _fused_cnn_kernel(*refs, layer_cfgs, n_layers, batch_tile, matmul_dtype):
    """refs layout:
        refs[0]                  : x block          (B_tile, H0, W0, C0) f32
        refs[1+2i], refs[2+2i]   : conv-i weight    (k*k*Cin, Cout) [matmul dtype]
                                    / bias          (1, Cout) f32
        refs[1+2L], refs[2+2L]   : FC weight (C_last, out_pad) / bias (1, out_pad)
        refs[3+2L]               : output block     (1, B_tile, out_pad) f32
        refs[4+2L : 4+3L]        : per-layer zero-padded activation scratch (VMEM)
    """
    x_ref = refs[0]
    conv_refs = refs[1:1 + 2 * n_layers]
    fcw_ref = refs[1 + 2 * n_layers]
    fcb_ref = refs[2 + 2 * n_layers]
    o_ref = refs[3 + 2 * n_layers]
    act_scr = refs[4 + 2 * n_layers:]

    B = batch_tile
    pooled_sum = None

    for i in range(n_layers):
        (k, s, p, h_in, w_in, h_out, w_out, c_in, c_out, act, rows_chunk) = layer_cfgs[i]
        h_pad, w_pad = h_in + 2 * p, w_in + 2 * p
        buf = act_scr[i]                                  # (B, h_pad, w_pad, c_in) f32

        # Zero ONLY the halo strips; the interior is fully overwritten (by the
        # x copy for layer 0 or by the previous layer's epilogue).  Re-done
        # every step: with a "parallel" batch axis each core owns its scratch.
        if p > 0:
            buf[:, pl.ds(0, p), :, :] = jnp.zeros((B, p, w_pad, c_in), jnp.float32)
            buf[:, pl.ds(p + h_in, p), :, :] = jnp.zeros((B, p, w_pad, c_in), jnp.float32)
            buf[:, :, pl.ds(0, p), :] = jnp.zeros((B, h_pad, p, c_in), jnp.float32)
            buf[:, :, pl.ds(p + w_in, p), :] = jnp.zeros((B, h_pad, p, c_in), jnp.float32)

        if i == 0:
            buf[:, pl.ds(p, h_in), pl.ds(p, w_in), :] = x_ref[...]

        w_ref = conv_refs[2 * i]                          # (k*k*c_in, c_out)
        b_row = conv_refs[2 * i + 1][...]                 # (1, c_out) f32
        use_im2col = c_in < 128
        if use_im2col:
            w_full = w_ref[...]                           # hoisted out of chunk loop

        if i + 1 < n_layers:
            nxt_p = layer_cfgs[i + 1][2]
            nxt_buf = act_scr[i + 1]

        # Spatial (M) chunking: bounds the live im2col patch (VMEM / vreg
        # pressure) while keeping large MXU-friendly M per matmul.
        r0 = 0
        while r0 < h_out:
            rc = min(rows_chunk, h_out - r0)
            m = B * rc * w_out

            def tap_slab(kh, kw):
                row_sl = (pl.ds(r0 * s + kh, rc, stride=s) if s > 1
                          else pl.ds(r0 + kh, rc))
                col_sl = (pl.ds(kw, w_out, stride=s) if s > 1
                          else pl.ds(kw, w_out))
                return buf[:, row_sl, col_sl, :].reshape(m, c_in)

            if use_im2col:
                # ONE MXU matmul with contraction depth k*k*c_in; the patch is a
                # value (no scratch round-trip / masked partial stores).
                patch = jnp.concatenate(
                    [tap_slab(kh, kw) for kh in range(k) for kw in range(k)],
                    axis=-1).astype(matmul_dtype)
                y = jnp.dot(patch, w_full, preferred_element_type=jnp.float32)
            else:
                # Wide-channel path: k*k per-tap matmuls (full-depth contraction,
                # no im2col copy; v7x MRB accumulates nearly for free).
                y = None
                for kh in range(k):
                    for kw in range(k):
                        slab = tap_slab(kh, kw).astype(matmul_dtype)
                        w_tap = w_ref[pl.ds((kh * k + kw) * c_in, c_in), :]
                        part = jnp.dot(slab, w_tap, preferred_element_type=jnp.float32)
                        y = part if y is None else y + part

            y = _apply_act(y + b_row, act)                # f32 epilogue (v5e-safe)

            if i + 1 < n_layers:
                # Write straight into the next layer's padded-buffer interior.
                nxt_buf[:, pl.ds(nxt_p + r0, rc), pl.ds(nxt_p, w_out), :] = (
                    y.reshape(B, rc, w_out, c_out))
            else:
                part_sum = jnp.sum(y.reshape(B, rc * w_out, c_out), axis=1)
                pooled_sum = part_sum if pooled_sum is None else pooled_sum + part_sum

            r0 += rc

    # AdaptiveAvgPool2d(1) + Flatten + Linear, fused; lane-dense output store.
    hw_last = layer_cfgs[-1][5] * layer_cfgs[-1][6]
    pooled = (pooled_sum * (1.0 / float(hw_last))).astype(matmul_dtype)  # (B, C_last)
    fc = jnp.dot(pooled, fcw_ref[...], preferred_element_type=jnp.float32) + fcb_ref[...]
    o_ref[0] = fc.astype(o_ref.dtype)                     # (B_tile, out_pad)


# ----------------------------------------------------------------------------
# Wrapper: one pallas_call for the whole forward pass
# ----------------------------------------------------------------------------
def fused_cnn_forward(x_nchw, conv_w2d, conv_b2d, fc_w, fc_b, *,
                      kernel_sizes, strides, paddings, activations, out_size,
                      matmul_dtype=jnp.bfloat16, batch_tile=None):
    n_layers = len(conv_w2d)
    assert n_layers >= 1
    x = jnp.transpose(x_nchw, (0, 2, 3, 1)).astype(jnp.float32)      # NCHW -> NHWC
    N, H, W, C = x.shape

    # ---- static per-layer geometry ------------------------------------------
    cfgs = []
    h_in, w_in, c_in = H, W, C
    for i in range(n_layers):
        k, s, p = int(kernel_sizes[i]), int(strides[i]), int(paddings[i])
        c_out = int(conv_w2d[i].shape[1])
        assert conv_w2d[i].shape[0] == k * k * c_in
        h_out = (h_in + 2 * p - k) // s + 1
        w_out = (w_in + 2 * p - k) // s + 1
        cfgs.append([k, s, p, h_in, w_in, h_out, w_out, c_in, c_out, activations[i]])
        h_in, w_in, c_in = h_out, w_out, c_out
    c_last = c_in
    hw_last = cfgs[-1][5] * cfgs[-1][6]
    out_pad = _round_up(max(int(out_size), 1), 128)
    w_itemsize = jnp.dtype(matmul_dtype).itemsize

    # ---- batch tile, spatial chunking, VMEM budget ---------------------------
    def rows_per_chunk(bt, cfg):
        k, s, p, hi, wi, ho, wo, ci, co, _ = cfg
        per_row = bt * wo * k * k * ci * 4
        return max(1, min(ho, _PATCH_CHUNK_BYTES // max(per_row, 1)))

    def vmem_estimate(bt):
        est = 0
        for cfg in cfgs:                                   # single-buffered scratch
            k, s, p, hi, wi, ho, wo, ci, co, _ = cfg
            est += _padded_tile_bytes((bt, hi + 2 * p, wi + 2 * p, ci), 4)
        est += 2 * _padded_tile_bytes((bt, H, W, C), 4)    # double-buffered blocks
        est += 2 * _padded_tile_bytes((1, bt, out_pad), 4)
        wbytes = 0
        for cfg in cfgs:
            k, s, p, hi, wi, ho, wo, ci, co, _ = cfg
            wbytes += _padded_tile_bytes((k * k * ci, co), w_itemsize)
            wbytes += _padded_tile_bytes((1, co), 4)
        wbytes += _padded_tile_bytes((c_last, out_pad), w_itemsize)
        wbytes += _padded_tile_bytes((1, out_pad), 4)
        est += 2 * wbytes
        live = 0                                           # live patch + conv out
        for cfg in cfgs:
            k, s, p, hi, wi, ho, wo, ci, co, _ = cfg
            rc = rows_per_chunk(bt, cfg)
            live = max(live, bt * rc * wo * (k * k * ci + 2 * co) * 4)
        return est + 2 * live + (2 << 20)

    vmem_budget = int(0.75 * _vmem_capacity_bytes())       # ~96 MiB v5e/v6e, ~48 MiB v7x
    if batch_tile is None:
        bt = max(1, min(N, -(-_TARGET_M // hw_last)))      # fatten the matmul M dim
        if N >= 2:
            bt = min(bt, (N + 1) // 2)                     # keep >= 2 grid steps (v7x TCs)
        while bt > 1 and vmem_estimate(bt) > vmem_budget:
            bt -= 1
    else:
        bt = int(batch_tile)
    for cfg in cfgs:
        cfg.append(rows_per_chunk(bt, cfg))
    layer_cfgs = tuple(tuple(c) for c in cfgs)

    n_pad = -(-N // bt) * bt
    if n_pad != N:
        x = jnp.pad(x, ((0, n_pad - N), (0, 0), (0, 0), (0, 0)))
    grid_n = n_pad // bt

    # ---- pack weights: lane-padded FC, matmul-dtype MXU operands -------------
    fc_w_pad = (jnp.zeros((c_last, out_pad), jnp.float32)
                .at[:, :out_size].set(fc_w.astype(jnp.float32)).astype(matmul_dtype))
    fc_b_pad = jnp.zeros((1, out_pad), jnp.float32).at[0, :out_size].set(
        fc_b.astype(jnp.float32))

    flat_inputs = [x]
    in_specs = [pl.BlockSpec((bt, H, W, C), lambda b: (b, 0, 0, 0))]
    for i in range(n_layers):
        flat_inputs += [conv_w2d[i].astype(matmul_dtype),
                        conv_b2d[i].astype(jnp.float32)]
        in_specs += [pl.BlockSpec(tuple(conv_w2d[i].shape), lambda b: (0, 0)),
                     pl.BlockSpec(tuple(conv_b2d[i].shape), lambda b: (0, 0))]
    flat_inputs += [fc_w_pad, fc_b_pad]
    in_specs += [pl.BlockSpec(tuple(fc_w_pad.shape), lambda b: (0, 0)),
                 pl.BlockSpec(tuple(fc_b_pad.shape), lambda b: (0, 0))]

    scratch_shapes = [
        pltpu.VMEM((bt, hi + 2 * p, wi + 2 * p, ci), jnp.float32)
        for (k, s, p, hi, wi, ho, wo, ci, co, _, _) in layer_cfgs
    ]

    # ---- cost estimate: lets XLA overlap the transpose / slice with the kernel
    flops = 2 * n_pad * c_last * out_pad
    transc = 0
    for (k, s, p, hi, wi, ho, wo, ci, co, act, _) in layer_cfgs:
        flops += 2 * n_pad * ho * wo * (k * k * ci) * co
        if act in ("gelu", "sine", "tanh", "sigmoid"):
            transc += n_pad * ho * wo * co
    bytes_acc = int(x.size) * 4 + int(n_pad * out_pad) * 4
    for a in flat_inputs[1:]:
        bytes_acc += int(a.size) * jnp.dtype(a.dtype).itemsize

    kernel = functools.partial(
        _fused_cnn_kernel, layer_cfgs=layer_cfgs, n_layers=n_layers,
        batch_tile=bt, matmul_dtype=matmul_dtype)

    out = pl.pallas_call(
        kernel,
        out_shape=jax.ShapeDtypeStruct((grid_n, bt, out_pad), jnp.float32),
        grid=(grid_n,),
        in_specs=in_specs,
        out_specs=pl.BlockSpec((1, bt, out_pad), lambda b: (b, 0, 0)),
        scratch_shapes=scratch_shapes,
        compiler_params=pltpu.CompilerParams(
            dimension_semantics=("parallel",),             # shards across v7x TCs
            vmem_limit_bytes=vmem_budget),
        cost_estimate=pl.CostEstimate(
            flops=int(flops), transcendentals=int(transc),
            bytes_accessed=int(bytes_acc)),
    )(*flat_inputs)

    return out.reshape(n_pad, out_pad)[:N, :out_size]      # drop batch / lane padding


# ----------------------------------------------------------------------------
# Generic_CNN_Network (forward only)
# ----------------------------------------------------------------------------
class GenericCNNNetworkPallas:
    def __init__(self, n_layers, channels, kernel_sizes, strides, activations,
                 paddings, out_size=10, key=None, matmul_dtype=jnp.bfloat16,
                 batch_tile=None):
        assert len(channels) == n_layers + 1
        self.n_layers = n_layers
        self.kernel_sizes = list(kernel_sizes)
        self.strides = list(strides)
        self.paddings = list(paddings)
        self.activations = list(activations)
        self.out_size = out_size
        # bf16 MXU operands by default (f32 accumulation + f32 epilogue);
        # pass matmul_dtype=jnp.float32 for a bit-close slow path.
        self.matmul_dtype = matmul_dtype
        self.batch_tile = batch_tile

        if key is None:
            key = jax.random.PRNGKey(0)

        self.conv_w, self.conv_b = [], []          # natural layout (reference)
        self._conv_w2d, self._conv_b2d = [], []    # packed im2col layout (kernel)
        for i in range(n_layers):
            cin, cout, k = channels[i], channels[i + 1], kernel_sizes[i]
            key, kw_key, kb_key = jax.random.split(key, 3)
            bound = 1.0 / math.sqrt(cin * k * k)
            w = jax.random.uniform(kw_key, (k, k, cin, cout),
                                   minval=-bound, maxval=bound, dtype=jnp.float32)
            b = jax.random.uniform(kb_key, (cout,),
                                   minval=-bound, maxval=bound, dtype=jnp.float32)
            self.conv_w.append(w)
            self.conv_b.append(b)
            self._conv_w2d.append(w.reshape(k * k * cin, cout))
            self._conv_b2d.append(b.reshape(1, cout))

        key, kw_key, kb_key = jax.random.split(key, 3)
        c_last = channels[-1]
        bound = 1.0 / math.sqrt(c_last)
        self.fc_w = jax.random.uniform(kw_key, (c_last, out_size),
                                       minval=-bound, maxval=bound, dtype=jnp.float32)
        self.fc_b = jax.random.uniform(kb_key, (out_size,),
                                       minval=-bound, maxval=bound, dtype=jnp.float32)

        self._forward = jax.jit(self._forward_impl)

    def _forward_impl(self, x_nchw):
        return fused_cnn_forward(
            x_nchw, self._conv_w2d, self._conv_b2d, self.fc_w, self.fc_b,
            kernel_sizes=self.kernel_sizes, strides=self.strides,
            paddings=self.paddings, activations=self.activations,
            out_size=self.out_size, matmul_dtype=self.matmul_dtype,
            batch_tile=self.batch_tile)

    def __call__(self, x_nchw):
        return self._forward(x_nchw)


# ----------------------------------------------------------------------------
# Pure-JAX reference (sanity check)
# ----------------------------------------------------------------------------
def _reference_forward(model, x_nchw):
    x = jnp.transpose(x_nchw, (0, 2, 3, 1))
    for i in range(model.n_layers):
        y = jax.lax.conv_general_dilated(
            x, model.conv_w[i],
            window_strides=(model.strides[i], model.strides[i]),
            padding=[(model.paddings[i], model.paddings[i])] * 2,
            dimension_numbers=("NHWC", "HWIO", "NHWC"))
        x = _apply_act(y + model.conv_b[i], model.activations[i])
    pooled = jnp.mean(x, axis=(1, 2))
    return jnp.dot(pooled, model.fc_w) + model.fc_b


if __name__ == "__main__":
    key = jax.random.PRNGKey(0)

    # ---- Test 1: default bf16 MXU path, stride-1 config (spec shapes) -------
    key, k1, k2 = jax.random.split(key, 3)
    model = GenericCNNNetworkPallas(
        n_layers=2, channels=[4, 8, 16], kernel_sizes=[3, 3], strides=[1, 1],
        activations=["relu", "gelu"], paddings=[1, 1], out_size=10, key=k1)
    x = jax.random.normal(k2, (2, 4, 16, 16), dtype=jnp.float32)      # NCHW
    out = jax.block_until_ready(model(x))
    assert out.shape == (2, 10)
    ref = _reference_forward(model, x)
    # bf16 MXU operands with f32 accumulation: loose-but-safe tolerance.
    assert jnp.allclose(out, ref, atol=2e-2, rtol=2e-2), (
        "bf16 path max abs diff = " + str(float(jnp.max(jnp.abs(out - ref)))))

    # ---- Test 2: exact f32 path, stride-2 + batch padding + batch tile 2 ----
    key, k3, k4 = jax.random.split(key, 3)
    model2 = GenericCNNNetworkPallas(
        n_layers=2, channels=[3, 8, 16], kernel_sizes=[3, 3], strides=[2, 1],
        activations=["tanh", "leaky_relu"], paddings=[1, 1], out_size=7, key=k3,
        matmul_dtype=jnp.float32)
    x2 = jax.random.normal(k4, (3, 3, 16, 16), dtype=jnp.float32)     # NCHW
    out2 = jax.block_until_ready(model2(x2))
    assert out2.shape == (3, 7)
    ref2 = _reference_forward(model2, x2)
    assert jnp.allclose(out2, ref2, atol=2e-4, rtol=2e-4), (
        "f32 path max abs diff = " + str(float(jnp.max(jnp.abs(out2 - ref2)))))

    print("KERNEL_OK")
</pallas_src>

<mosaic_0001>
module attributes {stable_mosaic.version = 11 : i64} {
  func.func @_fused_cnn_kernel(%arg0: i32, %arg1: memref<1x16x16x4xf32, #tpu.memory_space<vmem>>, %arg2: memref<36x8xbf16, #tpu.memory_space<vmem>>, %arg3: memref<1x8xf32, #tpu.memory_space<vmem>>, %arg4: memref<72x16xbf16, #tpu.memory_space<vmem>>, %arg5: memref<1x16xf32, #tpu.memory_space<vmem>>, %arg6: memref<16x128xbf16, #tpu.memory_space<vmem>>, %arg7: memref<1x128xf32, #tpu.memory_space<vmem>>, %arg8: memref<1x1x128xf32, #tpu.memory_space<vmem>>, %arg9: memref<1x18x18x4xf32, #tpu.memory_space<vmem>>, %arg10: memref<1x18x18x8xf32, #tpu.memory_space<vmem>>) attributes {dimension_semantics = [#tpu.dimension_semantics<parallel>], iteration_bounds = array<i64: 2>, scalar_prefetch = 0 : i64, scratch_operands = 2 : i64, tpu.core_type = #tpu.core_type<tc>, window_params = [{transform_indices = @transform_0, window_bounds = array<i64: 1, 16, 16, 4>}, {pipeline_mode = #tpu.pipeline_mode<synchronous>, transform_indices = @transform_1, window_bounds = array<i64: 36, 8>}, {pipeline_mode = #tpu.pipeline_mode<synchronous>, transform_indices = @transform_2, window_bounds = array<i64: 1, 8>}, {pipeline_mode = #tpu.pipeline_mode<synchronous>, transform_indices = @transform_3, window_bounds = array<i64: 72, 16>}, {pipeline_mode = #tpu.pipeline_mode<synchronous>, transform_indices = @transform_4, window_bounds = array<i64: 1, 16>}, {pipeline_mode = #tpu.pipeline_mode<synchronous>, transform_indices = @transform_5, window_bounds = array<i64: 16, 128>}, {pipeline_mode = #tpu.pipeline_mode<synchronous>, transform_indices = @transform_6, window_bounds = array<i64: 1, 128>}, {transform_indices = @transform_7, window_bounds = array<i64: 1, 1, 128>}]} {
    %cst = arith.constant 0.000000e+00 : f32
    %0 = vector.broadcast %cst : f32 to vector<1x1x18x4xf32>
    %c0 = arith.constant 0 : index
    %c0_0 = arith.constant 0 : index
    %c0_1 = arith.constant 0 : index
    %c0_2 = arith.constant 0 : index
    %1 = vector.load %arg9[%c0, %c0_0, %c0_1, %c0_2] : memref<1x18x18x4xf32, #tpu.memory_space<vmem>>, vector<1x1x18x4xf32>
    tpu.vector_store %arg9[%c0, %c0_0, %c0_1, %c0_2], %0 {strides = array<i32>} : memref<1x18x18x4xf32, #tpu.memory_space<vmem>>, vector<1x1x18x4xf32>,
    %cst_3 = arith.constant 0.000000e+00 : f32
    %2 = vector.broadcast %cst_3 : f32 to vector<1x1x18x4xf32>
    %c0_4 = arith.constant 0 : index
    %c17 = arith.constant 17 : index
    %c0_5 = arith.constant 0 : index
    %c0_6 = arith.constant 0 : index
    %3 = vector.load %arg9[%c0_4, %c17, %c0_5, %c0_6] : memref<1x18x18x4xf32, #tpu.memory_space<vmem>>, vector<1x1x18x4xf32>
    tpu.vector_store %arg9[%c0_4, %c17, %c0_5, %c0_6], %2 {strides = array<i32>} : memref<1x18x18x4xf32, #tpu.memory_space<vmem>>, vector<1x1x18x4xf32>,
    %cst_7 = arith.constant 0.000000e+00 : f32
    %4 = vector.broadcast %cst_7 : f32 to vector<1x18x1x4xf32>
    %c0_8 = arith.constant 0 : index
    %c0_9 = arith.constant 0 : index
    %c0_10 = arith.constant 0 : index
    %c0_11 = arith.constant 0 : index
    %5 = vector.load %arg9[%c0_8, %c0_9, %c0_10, %c0_11] : memref<1x18x18x4xf32, #tpu.memory_space<vmem>>, vector<1x18x1x4xf32>
    tpu.vector_store %arg9[%c0_8, %c0_9, %c0_10, %c0_11], %4 {strides = array<i32>} : memref<1x18x18x4xf32, #tpu.memory_space<vmem>>, vector<1x18x1x4xf32>,
    %cst_12 = arith.constant 0.000000e+00 : f32
    %6 = vector.broadcast %cst_12 : f32 to vector<1x18x1x4xf32>
    %c0_13 = arith.constant 0 : index
    %c0_14 = arith.constant 0 : index
    %c17_15 = arith.constant 17 : index
    %c0_16 = arith.constant 0 : index
    %7 = vector.load %arg9[%c0_13, %c0_14, %c17_15, %c0_16] : memref<1x18x18x4xf32, #tpu.memory_space<vmem>>, vector<1x18x1x4xf32>
    tpu.vector_store %arg9[%c0_13, %c0_14, %c17_15, %c0_16], %6 {strides = array<i32>} : memref<1x18x18x4xf32, #tpu.memory_space<vmem>>, vector<1x18x1x4xf32>,
    %c0_17 = arith.constant 0 : index
    %c0_18 = arith.constant 0 : index
    %c0_19 = arith.constant 0 : index
    %c0_20 = arith.constant 0 : index
    %8 = vector.load %arg1[%c0_17, %c0_18, %c0_19, %c0_20] : memref<1x16x16x4xf32, #tpu.memory_space<vmem>>, vector<1x16x16x4xf32>
    %c0_21 = arith.constant 0 : index
    %c1 = arith.constant 1 : index
    %c1_22 = arith.constant 1 : index
    %c0_23 = arith.constant 0 : index
    %9 = vector.load %arg9[%c0_21, %c1, %c1_22, %c0_23] : memref<1x18x18x4xf32, #tpu.memory_space<vmem>>, vector<1x16x16x4xf32>
    tpu.vector_store %arg9[%c0_21, %c1, %c1_22, %c0_23], %8 {strides = array<i32>} : memref<1x18x18x4xf32, #tpu.memory_space<vmem>>, vector<1x16x16x4xf32>,
    %c0_24 = arith.constant 0 : index
    %c0_25 = arith.constant 0 : index
    %10 = vector.load %arg3[%c0_24, %c0_25] : memref<1x8xf32, #tpu.memory_space<vmem>>, vector<1x8xf32>
    %c0_26 = arith.constant 0 : index
    %c0_27 = arith.constant 0 : index
    %11 = vector.load %arg2[%c0_26, %c0_27] : memref<36x8xbf16, #tpu.memory_space<vmem>>, vector<36x8xbf16>
    %c0_28 = arith.constant 0 : index
    %c0_29 = arith.constant 0 : index
    %c0_30 = arith.constant 0 : index
    %c0_31 = arith.constant 0 : index
    %12 = vector.load %arg9[%c0_28, %c0_29, %c0_30, %c0_31] : memref<1x18x18x4xf32, #tpu.memory_space<vmem>>, vector<1x16x16x4xf32>
    %13 = vector.shape_cast %12 : vector<1x16x16x4xf32> to vector<256x4xf32>
    %c0_32 = arith.constant 0 : index
    %c0_33 = arith.constant 0 : index
    %c1_34 = arith.constant 1 : index
    %c0_35 = arith.constant 0 : index
    %14 = vector.load %arg9[%c0_32, %c0_33, %c1_34, %c0_35] : memref<1x18x18x4xf32, #tpu.memory_space<vmem>>, vector<1x16x16x4xf32>
    %15 = vector.shape_cast %14 : vector<1x16x16x4xf32> to vector<256x4xf32>
    %c0_36 = arith.constant 0 : index
    %c0_37 = arith.constant 0 : index
    %c2 = arith.constant 2 : index
    %c0_38 = arith.constant 0 : index
    %16 = vector.load %arg9[%c0_36, %c0_37, %c2, %c0_38] : memref<1x18x18x4xf32, #tpu.memory_space<vmem>>, vector<1x16x16x4xf32>
    %17 = vector.shape_cast %16 : vector<1x16x16x4xf32> to vector<256x4xf32>
    %c0_39 = arith.constant 0 : index
    %c1_40 = arith.constant 1 : index
    %c0_41 = arith.constant 0 : index
    %c0_42 = arith.constant 0 : index
    %18 = vector.load %arg9[%c0_39, %c1_40, %c0_41, %c0_42] : memref<1x18x18x4xf32, #tpu.memory_space<vmem>>, vector<1x16x16x4xf32>
    %19 = vector.shape_cast %18 : vector<1x16x16x4xf32> to vector<256x4xf32>
    %c0_43 = arith.constant 0 : index
    %c1_44 = arith.constant 1 : index
    %c1_45 = arith.constant 1 : index
    %c0_46 = arith.constant 0 : index
    %20 = vector.load %arg9[%c0_43, %c1_44, %c1_45, %c0_46] : memref<1x18x18x4xf32, #tpu.memory_space<vmem>>, vector<1x16x16x4xf32>
    %21 = vector.shape_cast %20 : vector<1x16x16x4xf32> to vector<256x4xf32>
    %c0_47 = arith.constant 0 : index
    %c1_48 = arith.constant 1 : index
    %c2_49 = arith.constant 2 : index
    %c0_50 = arith.constant 0 : index
    %22 = vector.load %arg9[%c0_47, %c1_48, %c2_49, %c0_50] : memref<1x18x18x4xf32, #tpu.memory_space<vmem>>, vector<1x16x16x4xf32>
    %23 = vector.shape_cast %22 : vector<1x16x16x4xf32> to vector<256x4xf32>
    %c0_51 = arith.constant 0 : index
    %c2_52 = arith.constant 2 : index
    %c0_53 = arith.constant 0 : index
    %c0_54 = arith.constant 0 : index
    %24 = vector.load %arg9[%c0_51, %c2_52, %c0_53, %c0_54] : memref<1x18x18x4xf32, #tpu.memory_space<vmem>>, vector<1x16x16x4xf32>
    %25 = vector.shape_cast %24 : vector<1x16x16x4xf32> to vector<256x4xf32>
    %c0_55 = arith.constant 0 : index
    %c2_56 = arith.constant 2 : index
    %c1_57 = arith.constant 1 : index
    %c0_58 = arith.constant 0 : index
    %26 = vector.load %arg9[%c0_55, %c2_56, %c1_57, %c0_58] : memref<1x18x18x4xf32, #tpu.memory_space<vmem>>, vector<1x16x16x4xf32>
    %27 = vector.shape_cast %26 : vector<1x16x16x4xf32> to vector<256x4xf32>
    %c0_59 = arith.constant 0 : index
    %c2_60 = arith.constant 2 : index
    %c2_61 = arith.constant 2 : index
    %c0_62 = arith.constant 0 : index
    %28 = vector.load %arg9[%c0_59, %c2_60, %c2_61, %c0_62] : memref<1x18x18x4xf32, #tpu.memory_space<vmem>>, vector<1x16x16x4xf32>
    %29 = vector.shape_cast %28 : vector<1x16x16x4xf32> to vector<256x4xf32>
    %30 = tpu.concatenate %13, %15, %17, %19, %21, %23, %25, %27, %29 in 1 : vector<256x4xf32>, vector<256x4xf32>, vector<256x4xf32>, vector<256x4xf32>, vector<256x4xf32>, vector<256x4xf32>, vector<256x4xf32>, vector<256x4xf32>, vector<256x4xf32> -> vector<256x36xf32>
    %31 = arith.truncf %30 : vector<256x36xf32> to vector<256x36xbf16>
    %cst_63 = arith.constant dense<0.000000e+00> : vector<256x8xf32>
    %32 = tpu.matmul %31, %11, %cst_63 {dimension_numbers = #tpu.dot_dimension_numbers<[1], [0], [0], [1], [0, 0, 1, 1], [], []>} : vector<256x36xbf16>, vector<36x8xbf16>, vector<256x8xf32> -> vector<256x8xf32>
    %33 = vector.broadcast %10 : vector<1x8xf32> to vector<256x8xf32>
    %34 = arith.addf %32, %33 : vector<256x8xf32>
    %cst_64 = arith.constant 0.000000e+00 : f32
    %35 = vector.broadcast %cst_64 : f32 to vector<256x8xf32>
    %36 = arith.maximumf %34, %35 : vector<256x8xf32>
    %37 = vector.shape_cast %36 : vector<256x8xf32> to vector<1x16x16x8xf32>
    %c0_65 = arith.constant 0 : index
    %c1_66 = arith.constant 1 : index
    %c1_67 = arith.constant 1 : index
    %c0_68 = arith.constant 0 : index
    %38 = vector.load %arg10[%c0_65, %c1_66, %c1_67, %c0_68] : memref<1x18x18x8xf32, #tpu.memory_space<vmem>>, vector<1x16x16x8xf32>
    tpu.vector_store %arg10[%c0_65, %c1_66, %c1_67, %c0_68], %37 {strides = array<i32>} : memref<1x18x18x8xf32, #tpu.memory_space<vmem>>, vector<1x16x16x8xf32>,
    %cst_69 = arith.constant 0.000000e+00 : f32
    %39 = vector.broadcast %cst_69 : f32 to vector<1x1x18x8xf32>
    %c0_70 = arith.constant 0 : index
    %c0_71 = arith.constant 0 : index
    %c0_72 = arith.constant 0 : index
    %c0_73 = arith.constant 0 : index
    %40 = vector.load %arg10[%c0_70, %c0_71, %c0_72, %c0_73] : memref<1x18x18x8xf32, #tpu.memory_space<vmem>>, vector<1x1x18x8xf32>
    tpu.vector_store %arg10[%c0_70, %c0_71, %c0_72, %c0_73], %39 {strides = array<i32>} : memref<1x18x18x8xf32, #tpu.memory_space<vmem>>, vector<1x1x18x8xf32>,
    %cst_74 = arith.constant 0.000000e+00 : f32
    %41 = vector.broadcast %cst_74 : f32 to vector<1x1x18x8xf32>
    %c0_75 = arith.constant 0 : index
    %c17_76 = arith.constant 17 : index
    %c0_77 = arith.constant 0 : index
    %c0_78 = arith.constant 0 : index
    %42 = vector.load %arg10[%c0_75, %c17_76, %c0_77, %c0_78] : memref<1x18x18x8xf32, #tpu.memory_space<vmem>>, vector<1x1x18x8xf32>
    tpu.vector_store %arg10[%c0_75, %c17_76, %c0_77, %c0_78], %41 {strides = array<i32>} : memref<1x18x18x8xf32, #tpu.memory_space<vmem>>, vector<1x1x18x8xf32>,
    %cst_79 = arith.constant 0.000000e+00 : f32
    %43 = vector.broadcast %cst_79 : f32 to vector<1x18x1x8xf32>
    %c0_80 = arith.constant 0 : index
    %c0_81 = arith.constant 0 : index
    %c0_82 = arith.constant 0 : index
    %c0_83 = arith.constant 0 : index
    %44 = vector.load %arg10[%c0_80, %c0_81, %c0_82, %c0_83] : memref<1x18x18x8xf32, #tpu.memory_space<vmem>>, vector<1x18x1x8xf32>
    tpu.vector_store %arg10[%c0_80, %c0_81, %c0_82, %c0_83], %43 {strides = array<i32>} : memref<1x18x18x8xf32, #tpu.memory_space<vmem>>, vector<1x18x1x8xf32>,
    %cst_84 = arith.constant 0.000000e+00 : f32
    %45 = vector.broadcast %cst_84 : f32 to vector<1x18x1x8xf32>
    %c0_85 = arith.constant 0 : index
    %c0_86 = arith.constant 0 : index
    %c17_87 = arith.constant 17 : index
    %c0_88 = arith.constant 0 : index
    %46 = vector.load %arg10[%c0_85, %c0_86, %c17_87, %c0_88] : memref<1x18x18x8xf32, #tpu.memory_space<vmem>>, vector<1x18x1x8xf32>
    tpu.vector_store %arg10[%c0_85, %c0_86, %c17_87, %c0_88], %45 {strides = array<i32>} : memref<1x18x18x8xf32, #tpu.memory_space<vmem>>, vector<1x18x1x8xf32>,
    %c0_89 = arith.constant 0 : index
    %c0_90 = arith.constant 0 : index
    %47 = vector.load %arg5[%c0_89, %c0_90] : memref<1x16xf32, #tpu.memory_space<vmem>>, vector<1x16xf32>
    %c0_91 = arith.constant 0 : index
    %c0_92 = arith.constant 0 : index
    %48 = vector.load %arg4[%c0_91, %c0_92] : memref<72x16xbf16, #tpu.memory_space<vmem>>, vector<72x16xbf16>
    %c0_93 = arith.constant 0 : index
    %c0_94 = arith.constant 0 : index
    %c0_95 = arith.constant 0 : index
    %c0_96 = arith.constant 0 : index
    %49 = vector.load %arg10[%c0_93, %c0_94, %c0_95, %c0_96] : memref<1x18x18x8xf32, #tpu.memory_space<vmem>>, vector<1x16x16x8xf32>
    %50 = vector.shape_cast %49 : vector<1x16x16x8xf32> to vector<256x8xf32>
    %c0_97 = arith.constant 0 : index
    %c0_98 = arith.constant 0 : index
    %c1_99 = arith.constant 1 : index
    %c0_100 = arith.constant 0 : index
    %51 = vector.load %arg10[%c0_97, %c0_98, %c1_99, %c0_100] : memref<1x18x18x8xf32, #tpu.memory_space<vmem>>, vector<1x16x16x8xf32>
    %52 = vector.shape_cast %51 : vector<1x16x16x8xf32> to vector<256x8xf32>
    %c0_101 = arith.constant 0 : index
    %c0_102 = arith.constant 0 : index
    %c2_103 = arith.constant 2 : index
    %c0_104 = arith.constant 0 : index
    %53 = vector.load %arg10[%c0_101, %c0_102, %c2_103, %c0_104] : memref<1x18x18x8xf32, #tpu.memory_space<vmem>>, vector<1x16x16x8xf32>
    %54 = vector.shape_cast %53 : vector<1x16x16x8xf32> to vector<256x8xf32>
    %c0_105 = arith.constant 0 : index
    %c1_106 = arith.constant 1 : index
    %c0_107 = arith.constant 0 : index
    %c0_108 = arith.constant 0 : index
    %55 = vector.load %arg10[%c0_105, %c1_106, %c0_107, %c0_108] : memref<1x18x18x8xf32, #tpu.memory_space<vmem>>, vector<1x16x16x8xf32>
    %56 = vector.shape_cast %55 : vector<1x16x16x8xf32> to vector<256x8xf32>
    %c0_109 = arith.constant 0 : index
    %c1_110 = arith.constant 1 : index
    %c1_111 = arith.constant 1 : index
    %c0_112 = arith.constant 0 : index
    %57 = vector.load %arg10[%c0_109, %c1_110, %c1_111, %c0_112] : memref<1x18x18x8xf32, #tpu.memory_space<vmem>>, vector<1x16x16x8xf32>
    %58 = vector.shape_cast %57 : vector<1x16x16x8xf32> to vector<256x8xf32>
    %c0_113 = arith.constant 0 : index
    %c1_114 = arith.constant 1 : index
    %c2_115 = arith.constant 2 : index
    %c0_116 = arith.constant 0 : index
    %59 = vector.load %arg10[%c0_113, %c1_114, %c2_115, %c0_116] : memref<1x18x18x8xf32, #tpu.memory_space<vmem>>, vector<1x16x16x8xf32>
    %60 = vector.shape_cast %59 : vector<1x16x16x8xf32> to vector<256x8xf32>
    %c0_117 = arith.constant 0 : index
    %c2_118 = arith.constant 2 : index
    %c0_119 = arith.constant 0 : index
    %c0_120 = arith.constant 0 : index
    %61 = vector.load %arg10[%c0_117, %c2_118, %c0_119, %c0_120] : memref<1x18x18x8xf32, #tpu.memory_space<vmem>>, vector<1x16x16x8xf32>
    %62 = vector.shape_cast %61 : vector<1x16x16x8xf32> to vector<256x8xf32>
    %c0_121 = arith.constant 0 : index
    %c2_122 = arith.constant 2 : index
    %c1_123 = arith.constant 1 : index
    %c0_124 = arith.constant 0 : index
    %63 = vector.load %arg10[%c0_121, %c2_122, %c1_123, %c0_124] : memref<1x18x18x8xf32, #tpu.memory_space<vmem>>, vector<1x16x16x8xf32>
    %64 = vector.shape_cast %63 : vector<1x16x16x8xf32> to vector<256x8xf32>
    %c0_125 = arith.constant 0 : index
    %c2_126 = arith.constant 2 : index
    %c2_127 = arith.constant 2 : index
    %c0_128 = arith.constant 0 : index
    %65 = vector.load %arg10[%c0_125, %c2_126, %c2_127, %c0_128] : memref<1x18x18x8xf32, #tpu.memory_space<vmem>>, vector<1x16x16x8xf32>
    %66 = vector.shape_cast %65 : vector<1x16x16x8xf32> to vector<256x8xf32>
    %67 = tpu.concatenate %50, %52, %54, %56, %58, %60, %62, %64, %66 in 1 : vector<256x8xf32>, vector<256x8xf32>, vector<256x8xf32>, vector<256x8xf32>, vector<256x8xf32>, vector<256x8xf32>, vector<256x8xf32>, vector<256x8xf32>, vector<256x8xf32> -> vector<256x72xf32>
    %68 = arith.truncf %67 : vector<256x72xf32> to vector<256x72xbf16>
    %cst_129 = arith.constant dense<0.000000e+00> : vector<256x16xf32>
    %69 = tpu.matmul %68, %48, %cst_129 {dimension_numbers = #tpu.dot_dimension_numbers<[1], [0], [0], [1], [0, 0, 1, 1], [], []>} : vector<256x72xbf16>, vector<72x16xbf16>, vector<256x16xf32> -> vector<256x16xf32>
    %70 = vector.broadcast %47 : vector<1x16xf32> to vector<256x16xf32>
    %71 = arith.addf %69, %70 : vector<256x16xf32>
    %cst_130 = arith.constant 5.000000e-01 : f32
    %72 = vector.broadcast %cst_130 : f32 to vector<256x16xf32>
    %73 = arith.mulf %72, %71 : vector<256x16xf32>
    %cst_131 = arith.constant 0.707106769 : f32
    %74 = vector.broadcast %cst_131 : f32 to vector<256x16xf32>
    %75 = arith.mulf %71, %74 : vector<256x16xf32>
    %76 = math.erf %75 : vector<256x16xf32>
    %cst_132 = arith.constant 1.000000e+00 : f32
    %77 = vector.broadcast %cst_132 : f32 to vector<256x16xf32>
    %78 = arith.addf %77, %76 : vector<256x16xf32>
    %79 = arith.mulf %73, %78 : vector<256x16xf32>
    %80 = vector.shape_cast %79 : vector<256x16xf32> to vector<1x256x16xf32>
    %cst_133 = arith.constant dense<0.000000e+00> : vector<1x16xf32>
    %81 = vector.multi_reduction <add>, %80, %cst_133 [1] : vector<1x256x16xf32> to vector<1x16xf32>
    %cst_134 = arith.constant 3.906250e-03 : f32
    %82 = vector.broadcast %cst_134 : f32 to vector<1x16xf32>
    %83 = arith.mulf %81, %82 : vector<1x16xf32>
    %84 = arith.truncf %83 : vector<1x16xf32> to vector<1x16xbf16>
    %c0_135 = arith.constant 0 : index
    %c0_136 = arith.constant 0 : index
    %85 = vector.load %arg6[%c0_135, %c0_136] : memref<16x128xbf16, #tpu.memory_space<vmem>>, vector<16x128xbf16>
    %cst_137 = arith.constant dense<0.000000e+00> : vector<1x128xf32>
    %86 = tpu.matmul %84, %85, %cst_137 {dimension_numbers = #tpu.dot_dimension_numbers<[1], [0], [0], [1], [0, 0, 1, 1], [], []>} : vector<1x16xbf16>, vector<16x128xbf16>, vector<1x128xf32> -> vector<1x128xf32>
    %c0_138 = arith.constant 0 : index
    %c0_139 = arith.constant 0 : index
    %87 = vector.load %arg7[%c0_138, %c0_139] : memref<1x128xf32, #tpu.memory_space<vmem>>, vector<1x128xf32>
    %88 = arith.addf %86, %87 : vector<1x128xf32>
    %c0_140 = arith.constant 0 : index
    %c0_141 = arith.constant 0 : index
    %c0_142 = arith.constant 0 : index
    %89 = vector.load %arg8[%c0_140, %c0_141, %c0_142] : memref<1x1x128xf32, #tpu.memory_space<vmem>>, vector<1x1x128xf32>
    %90 = vector.shape_cast %89 : vector<1x1x128xf32> to vector<1x128xf32>
    %91 = vector.shape_cast %88 : vector<1x128xf32> to vector<1x1x128xf32>
    tpu.vector_store %arg8[%c0_140, %c0_141, %c0_142], %91 {strides = array<i32>} : memref<1x1x128xf32, #tpu.memory_space<vmem>>, vector<1x1x128xf32>,
    return
  }
  func.func @transform_0(%arg0: i32) -> (i32, i32, i32, i32) {
    %c0_i32 = arith.constant 0 : i32
    %c0_i32_0 = arith.constant 0 : i32
    %c0_i32_1 = arith.constant 0 : i32
    %c0_i32_2 = arith.constant 0 : i32
    return %arg0, %c0_i32, %c0_i32_0, %c0_i32_1 : i32, i32, i32, i32
  }
  func.func @transform_1(%arg0: i32) -> (i32, i32) {
    %c0_i32 = arith.constant 0 : i32
    %c0_i32_0 = arith.constant 0 : i32
    %c0_i32_1 = arith.constant 0 : i32
    return %c0_i32, %c0_i32_0 : i32, i32
  }
  func.func @transform_2(%arg0: i32) -> (i32, i32) {
    %c0_i32 = arith.constant 0 : i32
    %c0_i32_0 = arith.constant 0 : i32
    %c0_i32_1 = arith.constant 0 : i32
    return %c0_i32, %c0_i32_0 : i32, i32
  }
  func.func @transform_3(%arg0: i32) -> (i32, i32) {
    %c0_i32 = arith.constant 0 : i32
    %c0_i32_0 = arith.constant 0 : i32
    %c0_i32_1 = arith.constant 0 : i32
    return %c0_i32, %c0_i32_0 : i32, i32
  }
  func.func @transform_4(%arg0: i32) -> (i32, i32) {
    %c0_i32 = arith.constant 0 : i32
    %c0_i32_0 = arith.constant 0 : i32
    %c0_i32_1 = arith.constant 0 : i32
    return %c0_i32, %c0_i32_0 : i32, i32
  }
  func.func @transform_5(%arg0: i32) -> (i32, i32) {
    %c0_i32 = arith.constant 0 : i32
    %c0_i32_0 = arith.constant 0 : i32
    %c0_i32_1 = arith.constant 0 : i32
    return %c0_i32, %c0_i32_0 : i32, i32
  }
  func.func @transform_6(%arg0: i32) -> (i32, i32) {
    %c0_i32 = arith.constant 0 : i32
    %c0_i32_0 = arith.constant 0 : i32
    %c0_i32_1 = arith.constant 0 : i32
    return %c0_i32, %c0_i32_0 : i32, i32
  }
  func.func @transform_7(%arg0: i32) -> (i32, i32, i32) {
    %c0_i32 = arith.constant 0 : i32
    %c0_i32_0 = arith.constant 0 : i32
    %c0_i32_1 = arith.constant 0 : i32
    return %arg0, %c0_i32, %c0_i32_0 : i32, i32, i32
  }
}

</mosaic_0001>

<bundles_post_ra>
// kernel: _forward_impl.1
= control target key start
LH: loop header
LB: loop body
LE: loop exit
PB: predicated region body
PF: predicated region fallthrough
CT: control target
= control target key end

     0   :  { %12 = vsyncpa [#allocation5], 0  ;;  %s8267_s0 = inlined_call_operand.vmem [shape: f32[2,16,16,4], index: 0, kind: input, shape index: {}]   ;;  %s8268_s1 = inlined_call_operand.vmem [shape: bf16[36,8], index: 1, kind: input, shape index: {}]   ;;  %s8269_s2 = inlined_call_operand.vmem [shape: f32[1,8], index: 2, kind: input, shape index: {}]   ;;  %s8270_s3 = inlined_call_operand.vmem [shape: bf16[72,16], index: 3, kind: input, shape index: {}]   ;;  %s8271_s4 = inlined_call_operand.vmem [shape: f32[1,16], index: 4, kind: input, shape index: {}]   ;;  %s8272_s5 = inlined_call_operand.vmem [shape: bf16[16,128], index: 5, kind: input, shape index: {}]   ;;  %s8273_s6 = inlined_call_operand.vmem [shape: f32[1,128], index: 6, kind: input, shape index: {}]   ;;  %s8274_s7 = inlined_call_operand.hbm [shape: f32[2,1,128], index: 7, kind: output, shape index: {}]  }
   0x1   :  { %14 = vsyncpa [#allocation5 + $0x1], 0  ;;  %s6250_s24 = smov 0   ;;  %s6252_s25 = smov 0  }
   0x2   :  { %s6254_s26 = smov 0   ;;  %s6256_s27 = smov 0  }
   0x3 LB: > { %s6271_s28 = sadd.s32 4294967295, %s6193_s27   ;;  %s4529_s29 = sadd.s32 4294967294, %s6193_s27   ;;  %s6193_s27 = sphi %s6256_s27, %s8331_s27   ;;  %s6189_s26 = sphi %s6254_s26, %s8330_s26   ;;  %s6185_s25 = sphi %s6252_s25, %s8329_s25   ;;  %s6181_s24 = sphi %s6250_s24, %s8328_s24  }
   0x4   : > { %s6275_s30 = sadd.s32 1, %s6193_s27   ;;  %s179_s8 = sadd.s32 1, %s6189_s26 }
   0x5   : > { %s176_s9 = ssub.s32 %s6193_s27, %s6275_s30  ;;  %p189_p0 = scmp.ne.s32.totalorder %s6189_s26, %s6185_s25 }
   0x6   : > { %p177_p1 = scmp.eq.s32.totalorder %s176_s9, 0  ;;  %p190_p2 = scmp.eq.s32.totalorder %s6271_s28, 1 }
   0x7   : > { %p195_p3 = scmp.ne.s32.totalorder %s6185_s25, %s6181_s24  ;;  %p196_p4 = scmp.eq.s32.totalorder %s4529_s29, 1 }
   0x8   : > { %s6286_s10 = scalar_select %p177_p1, %s6189_s26, %s179_s8  }
   0x9   : > { %p6288_p5 = por %p190_p2, %p189_p0  ;;  %p6292_p6 = por %p196_p4, %p195_p3 }
   0xa   : > { %p4532_p7 = scmp.ge.s32.totalorder %s6193_s27, 1  ;;  %p240_p8 = scmp.lt.s32.totalorder %s6193_s27, 3 }
   0xc   : > { %p241_p9 = pnand %p4532_p7, %p240_p8 }
   0xe   : > { %244 = sbr.rel (%p241_p9) target bundleno = 1343 (0x53f), region = 48 }
  0x15   : > { %vm277_vm0 = vcmask 31744   ;;  %vm280_vm1 = vcmask 25600   ;;  %vm286_vm2 = vcmask 24576   ;;  %p271_p10 = scmp.lt.s32.totalorder %s6271_s28, 1  ;;  %v8275_v0 = vmov 0.0   ;;  %s6196_s18 = smov 4  }
  0x16   : > { %278 = vst.msk [vmem:[#allocation2] sm:$0xff] %vm277_vm0, %v8275_v0  ;;  %279 = vst.msk [vmem:[#allocation2 + $0x8] sm:$0xff] %vm277_vm0, %v8275_v0  ;;  %vm1739_vm3 = vcmask 64512   ;;  %s6197_s19 = smov 8   ;;  %s6198_s20 = smov 12   ;;  %vm2056_vm4 = vcmask 1041408  }
  0x17   : > { %281 = vst.msk [vmem:[#allocation2 + $0x10] sm:$0x3] %vm280_vm1, %v8275_v0  ;;  %285 = vst.msk [vmem:[#allocation2 + $0x1a8] sm:$0x3] %vm280_vm1, %v8275_v0  ;;  %s272_s13 = scalar_select %p271_p10, %s6271_s28, 1  ;;  %vm1772_vm5 = vcmask 97280  }
  0x18   : > { %283 = vst.msk [vmem:[#allocation2 + $0x198] sm:$0xff] %vm277_vm0, %v8275_v0  ;;  %284 = vst.msk [vmem:[#allocation2 + $0x1a0] sm:$0xff] %vm277_vm0, %v8275_v0  ;;  %s6199_s23 = smov 16   ;;  %s6200_s9 = smov 20   ;;  %vm1805_vm6 = vcmask 130048   ;;  %vm1838_vm7 = vcmask 162816  }
  0x19   : > { %288 = vst.msk [vmem:[#allocation2 + $0x18] sm:$0x1] %vm286_vm2, %v8275_v0  ;;  %289 = vst.msk [vmem:[#allocation2 + $0x30] sm:$0x1] %vm286_vm2, %v8275_v0  ;;  %s4582_s14 = sshll.u32 %s272_s13, 8  ;;  %s6201_s15 = smov 24  }
  0x1a   : > { %290 = vst.msk [vmem:[#allocation2 + $0x48] sm:$0x1] %vm286_vm2, %v8275_v0  ;;  %291 = vst.msk [vmem:[#allocation2 + $0x60] sm:$0x1] %vm286_vm2, %v8275_v0  ;;  %s6387_s17 = scalar_lea.vmem %s8267_s0, %s4582_s14  ;;  %s6202_s16 = smov 28   ;;  %vm1871_vm8 = vcmask 195584  }
  0x1b   : > { %292 = vst.msk [vmem:[#allocation2 + $0x78] sm:$0x1] %vm286_vm2, %v8275_v0  ;;  %293 = vst.msk [vmem:[#allocation2 + $0x90] sm:$0x1] %vm286_vm2, %v8275_v0  ;;  %v325_v1 = vld [vmem:[%s6387_s17 + $0x10] sm:$0xff]  ;;  %v326_v2 = vld [vmem:[%s6387_s17 + $0x18] sm:$0xff] }
  0x1c   : > { %294 = vst.msk [vmem:[#allocation2 + $0xa8] sm:$0x1] %vm286_vm2, %v8275_v0  ;;  %295 = vst.msk [vmem:[#allocation2 + $0xc0] sm:$0x1] %vm286_vm2, %v8275_v0  ;;  %v323_v3 = vld [vmem:[%s6387_s17] sm:$0xff]  ;;  %v324_v4 = vld [vmem:[%s6387_s17 + $0x8] sm:$0xff] }
  0x1d   : > { %296 = vst.msk [vmem:[#allocation2 + $0xd8] sm:$0x1] %vm286_vm2, %v8275_v0  ;;  %297 = vst.msk [vmem:[#allocation2 + $0xf0] sm:$0x1] %vm286_vm2, %v8275_v0  ;;  %v327_v5 = vld [vmem:[%s6387_s17 + $0x20] sm:$0xff]  ;;  %v328_v6 = vld [vmem:[%s6387_s17 + $0x28] sm:$0xff] }
  0x1e   : > { %298 = vst.msk [vmem:[#allocation2 + $0x108] sm:$0x1] %vm286_vm2, %v8275_v0  ;;  %299 = vst.msk [vmem:[#allocation2 + $0x120] sm:$0x1] %vm286_vm2, %v8275_v0  ;;  %v426_v7 = vld [vmem:[#allocation2 + $0x1] sm:$0xff]  ;;  %v427_v8 = vld [vmem:[#allocation2 + $0x9] sm:$0xff] }
  0x1f   : > { %300 = vst.msk [vmem:[#allocation2 + $0x138] sm:$0x1] %vm286_vm2, %v8275_v0  ;;  %301 = vst.msk [vmem:[#allocation2 + $0x150] sm:$0x1] %vm286_vm2, %v8275_v0  ;;  %v329_v9 = vld [vmem:[%s6387_s17 + $0x30] sm:$0xff]  ;;  %v4766_v10 = vpack.i.bf16 %v427_v8, %v426_v7  ;;  %v330_v11 = vld [vmem:[%s6387_s17 + $0x38] sm:$0xff] }
  0x20   : > { %302 = vst.msk [vmem:[#allocation2 + $0x168] sm:$0x1] %vm286_vm2, %v8275_v0  ;;  %303 = vst.msk [vmem:[#allocation2 + $0x180] sm:$0x1] %vm286_vm2, %v8275_v0  ;;  %v331_v12 = vld [vmem:[%s6387_s17 + $0x40] sm:$0xff]  ;;  %v332_v13 = vld [vmem:[%s6387_s17 + $0x48] sm:$0xff] }
  0x21   : > { %306 = vst.msk [vmem:[#allocation2 + $0x29] sm:$0x1] %vm286_vm2, %v8275_v0  ;;  %307 = vst.msk [vmem:[#allocation2 + $0x41] sm:$0x1] %vm286_vm2, %v8275_v0  ;;  %v333_v14 = vld [vmem:[%s6387_s17 + $0x50] sm:$0xff]  ;;  %v334_v15 = vld [vmem:[%s6387_s17 + $0x58] sm:$0xff]  ;;  %4767 = vrot.lane.b32.xlu0 %v4766_v10, %s6196_s18 }
  0x22   : > { %308 = vst.msk [vmem:[#allocation2 + $0x59] sm:$0x1] %vm286_vm2, %v8275_v0  ;;  %309 = vst.msk [vmem:[#allocation2 + $0x71] sm:$0x1] %vm286_vm2, %v8275_v0  ;;  %v335_v16 = vld [vmem:[%s6387_s17 + $0x60] sm:$0xff]  ;;  %v336_v17 = vld [vmem:[%s6387_s17 + $0x68] sm:$0xff] }
  0x23   : > { %310 = vst.msk [vmem:[#allocation2 + $0x89] sm:$0x1] %vm286_vm2, %v8275_v0  ;;  %311 = vst.msk [vmem:[#allocation2 + $0xa1] sm:$0x1] %vm286_vm2, %v8275_v0  ;;  %v337_v18 = vld [vmem:[%s6387_s17 + $0x70] sm:$0xff]  ;;  %v338_v19 = vld [vmem:[%s6387_s17 + $0x78] sm:$0xff] }
  0x24   : > { %312 = vst.msk [vmem:[#allocation2 + $0xb9] sm:$0x1] %vm286_vm2, %v8275_v0  ;;  %313 = vst.msk [vmem:[#allocation2 + $0xd1] sm:$0x1] %vm286_vm2, %v8275_v0  ;;  %v339_v20 = vld [vmem:[%s6387_s17 + $0x80] sm:$0xff]  ;;  %v340_v21 = vld [vmem:[%s6387_s17 + $0x88] sm:$0xff] }
  0x25   : > { %314 = vst.msk [vmem:[#allocation2 + $0xe9] sm:$0x1] %vm286_vm2, %v8275_v0  ;;  %315 = vst.msk [vmem:[#allocation2 + $0x101] sm:$0x1] %vm286_vm2, %v8275_v0  ;;  %v341_v22 = vld [vmem:[%s6387_s17 + $0x90] sm:$0xff]  ;;  %v342_v23 = vld [vmem:[%s6387_s17 + $0x98] sm:$0xff] }
  0x26   : > { %316 = vst.msk [vmem:[#allocation2 + $0x119] sm:$0x1] %vm286_vm2, %v8275_v0  ;;  %317 = vst.msk [vmem:[#allocation2 + $0x131] sm:$0x1] %vm286_vm2, %v8275_v0  ;;  %v343_v24 = vld [vmem:[%s6387_s17 + $0xa0] sm:$0xff]  ;;  %v344_v25 = vld [vmem:[%s6387_s17 + $0xa8] sm:$0xff] }
  0x27   : > { %318 = vst.msk [vmem:[#allocation2 + $0x149] sm:$0x1] %vm286_vm2, %v8275_v0  ;;  %319 = vst.msk [vmem:[#allocation2 + $0x161] sm:$0x1] %vm286_vm2, %v8275_v0  ;;  %v345_v35 = vld [vmem:[%s6387_s17 + $0xb0] sm:$0xff]  ;;  %v346_v36 = vld [vmem:[%s6387_s17 + $0xb8] sm:$0xff] }
  0x28   : > { %320 = vst.msk [vmem:[#allocation2 + $0x179] sm:$0x1] %vm286_vm2, %v8275_v0  ;;  %321 = vst.msk [vmem:[#allocation2 + $0x191] sm:$0x1] %vm286_vm2, %v8275_v0  ;;  %v347_v50 = vld [vmem:[%s6387_s17 + $0xc0] sm:$0xff]  ;;  %v348_v51 = vld [vmem:[%s6387_s17 + $0xc8] sm:$0xff] }
  0x29   : > { %305 = vst.msk [vmem:[#allocation2 + $0x11] sm:$0x1] %vm286_vm2, %v8275_v0  ;;  %322 = vst.msk [vmem:[#allocation2 + $0x1a9] sm:$0x1] %vm286_vm2, %v8275_v0  ;;  %v349_v52 = vld [vmem:[%s6387_s17 + $0xd0] sm:$0xff]  ;;  %v350_v53 = vld [vmem:[%s6387_s17 + $0xd8] sm:$0xff] }
  0x2a   : > { %287 = vst.msk [vmem:[#allocation2] sm:$0x1] %vm286_vm2, %v8275_v0  ;;  %304 = vst.msk [vmem:[#allocation2 + $0x198] sm:$0x1] %vm286_vm2, %v8275_v0  ;;  %v351_v54 = vld [vmem:[%s6387_s17 + $0xe0] sm:$0xff]  ;;  %v352_v55 = vld [vmem:[%s6387_s17 + $0xe8] sm:$0xff] }
  0x2b   : > { %358 = vst.msk [vmem:[#allocation2 + $0x31] sm:$0xff] %vm277_vm0, %v325_v1  ;;  %359 = vst.msk [vmem:[#allocation2 + $0x39] sm:$0xff] %vm277_vm0, %v326_v2  ;;  %vm1904_vm9 = vcmask 228352   ;;  %vm1937_vm10 = vcmask 261120   ;;  %vm2007_vm11 = vcmask 293888   ;;  %vm2288_vm12 = vcmask 58368  }
  0x2c   : > { %356 = vst.msk [vmem:[#allocation2 + $0x19] sm:$0xff] %vm277_vm0, %v323_v3  ;;  %357 = vst.msk [vmem:[#allocation2 + $0x21] sm:$0xff] %vm277_vm0, %v324_v4  ;;  %vm2294_vm13 = vcmask 57344   ;;  %s6204_s21 = smov 48   ;;  %s6205_s22 = smov 56   ;;  %vm4012_vm14 = vcmask 1043456  }
  0x2d   : > { %360 = vst.msk [vmem:[#allocation2 + $0x49] sm:$0xff] %vm277_vm0, %v327_v5  ;;  %361 = vst.msk [vmem:[#allocation2 + $0x51] sm:$0xff] %vm277_vm0, %v328_v6  ;;  %s6206_s29 = smov 64   ;;  %s6207_s8 = smov 40   ;;  %vm3782_vm15 = vcmask 326656   ;;  %vm3848_vm1 = vcmask 457728  }
  0x2e   : > { %362 = vst.msk [vmem:[#allocation2 + $0x61] sm:$0xff] %vm277_vm0, %v329_v9  ;;  %363 = vst.msk [vmem:[#allocation2 + $0x69] sm:$0xff] %vm277_vm0, %v330_v11  ;;  %vm3881_vm2 = vcmask 523264  }
  0x2f   : > { %364 = vst.msk [vmem:[#allocation2 + $0x79] sm:$0xff] %vm277_vm0, %v331_v12  ;;  %365 = vst.msk [vmem:[#allocation2 + $0x81] sm:$0xff] %vm277_vm0, %v332_v13 }
  0x30   : > { %366 = vst.msk [vmem:[#allocation2 + $0x91] sm:$0xff] %vm277_vm0, %v333_v14  ;;  %367 = vst.msk [vmem:[#allocation2 + $0x99] sm:$0xff] %vm277_vm0, %v334_v15  ;;  %v458_v15 = vld [vmem:[#allocation2 + $0x2] sm:$0xff] }
  0x31   : > { %368 = vst.msk [vmem:[#allocation2 + $0xa9] sm:$0xff] %vm277_vm0, %v335_v16  ;;  %369 = vst.msk [vmem:[#allocation2 + $0xb1] sm:$0xff] %vm277_vm0, %v336_v17  ;;  %v459_v16 = vld [vmem:[#allocation2 + $0xa] sm:$0xff] }
  0x32   : > { %370 = vst.msk [vmem:[#allocation2 + $0xc1] sm:$0xff] %vm277_vm0, %v337_v18  ;;  %371 = vst.msk [vmem:[#allocation2 + $0xc9] sm:$0xff] %vm277_vm0, %v338_v19  ;;  %v430_v26 = vld [vmem:[#allocation2 + $0x31] sm:$0xff]  ;;  %v431_v27 = vld [vmem:[#allocation2 + $0x39] sm:$0xff]  ;;  %v4846_v18 = vpack.i.bf16 %v459_v16, %v458_v15 }
  0x33   : > { %372 = vst.msk [vmem:[#allocation2 + $0xd9] sm:$0xff] %vm277_vm0, %v339_v20  ;;  %373 = vst.msk [vmem:[#allocation2 + $0xe1] sm:$0xff] %vm277_vm0, %v340_v21  ;;  %v428_v28 = vld [vmem:[#allocation2 + $0x19] sm:$0xff]  ;;  %v6434_v29 = vpack.i.bf16 %v431_v27, %v430_v26  ;;  %v429_v30 = vld [vmem:[#allocation2 + $0x21] sm:$0xff] }
  0x34   : > { %374 = vst.msk [vmem:[#allocation2 + $0xf1] sm:$0xff] %vm277_vm0, %v341_v22  ;;  %375 = vst.msk [vmem:[#allocation2 + $0xf9] sm:$0xff] %vm277_vm0, %v342_v23  ;;  %v432_v31 = vld [vmem:[#allocation2 + $0x49] sm:$0xff]  ;;  %v433_v32 = vld [vmem:[#allocation2 + $0x51] sm:$0xff]  ;;  %v6436_v33 = vpack.i.bf16 %v429_v30, %v428_v28 }
  0x35   : > { %376 = vst.msk [vmem:[#allocation2 + $0x109] sm:$0xff] %vm277_vm0, %v343_v24  ;;  %377 = vst.msk [vmem:[#allocation2 + $0x111] sm:$0xff] %vm277_vm0, %v344_v25  ;;  %v434_v34 = vld [vmem:[#allocation2 + $0x61] sm:$0xff]  ;;  %4777 = vrot.lane.b32.xlu1 %v6434_v29, %s6196_s18  ;;  %v6442_v37 = vpack.i.bf16 %v433_v32, %v432_v31  ;;  %v435_v38 = vld [vmem:[#allocation2 + $0x69] sm:$0xff] }
  0x36   : > { %378 = vst.msk [vmem:[#allocation2 + $0x121] sm:$0xff] %vm277_vm0, %v345_v35  ;;  %379 = vst.msk [vmem:[#allocation2 + $0x129] sm:$0xff] %vm277_vm0, %v346_v36  ;;  %4772 = vrot.lane.b32.xlu0 %v6436_v33, %s6196_s18  ;;  %v6448_v39 = vpack.i.bf16 %v435_v38, %v434_v34  ;;  %v436_v40 = vld [vmem:[#allocation2 + $0x79] sm:$0xff]  ;;  %v437_v41 = vld [vmem:[#allocation2 + $0x81] sm:$0xff] }
  0x37   : > { %v438_v42 = vld [vmem:[#allocation2 + $0x91] sm:$0xff]  ;;  %v439_v43 = vld [vmem:[#allocation2 + $0x99] sm:$0xff]  ;;  %v6452_v45 = vpack.i.bf16 %v437_v41, %v436_v40  ;;  %380 = vst.msk [vmem:[#allocation2 + $0x139] sm:$0xff] %vm277_vm0, %v347_v50  ;;  %381 = vst.msk [vmem:[#allocation2 + $0x141] sm:$0xff] %vm277_vm0, %v348_v51 }
  0x38   : > { %v440_v44 = vld [vmem:[#allocation2 + $0xa9] sm:$0xff]  ;;  %v441_v46 = vld [vmem:[#allocation2 + $0xb1] sm:$0xff]  ;;  %v6456_v49 = vpack.i.bf16 %v439_v43, %v438_v42  ;;  %382 = vst.msk [vmem:[#allocation2 + $0x151] sm:$0xff] %vm277_vm0, %v349_v52  ;;  %383 = vst.msk [vmem:[#allocation2 + $0x159] sm:$0xff] %vm277_vm0, %v350_v53 }
  0x39   : > { %4782 = vrot.lane.b32.xlu1 %v6442_v37, %s6196_s18  ;;  %v442_v47 = vld [vmem:[#allocation2 + $0xc1] sm:$0xff]  ;;  %v443_v48 = vld [vmem:[#allocation2 + $0xc9] sm:$0xff]  ;;  %384 = vst.msk [vmem:[#allocation2 + $0x169] sm:$0xff] %vm277_vm0, %v351_v54  ;;  %385 = vst.msk [vmem:[#allocation2 + $0x171] sm:$0xff] %vm277_vm0, %v352_v55  ;;  %v6472_v56 = vpack.i.bf16 %v441_v46, %v440_v44 }
  0x3a   : > { %4787 = vrot.lane.b32.xlu0 %v6448_v39, %s6196_s18  ;;  %v6476_v57 = vpack.i.bf16 %v443_v48, %v442_v47  ;;  %v444_v58 = vld [vmem:[#allocation2 + $0xd9] sm:$0xff]  ;;  %v445_v59 = vld [vmem:[#allocation2 + $0xe1] sm:$0xff]  ;;  %2286 = vst.msk [vmem:[#allocation3] sm:$0xff] %vm1739_vm3, %v8275_v0  ;;  %2287 = vst.msk [vmem:[#allocation3 + $0x8] sm:$0xff] %vm1739_vm3, %v8275_v0 }
  0x3b   : > { %v446_v60 = vld [vmem:[#allocation2 + $0xf1] sm:$0xff]  ;;  %v447_v61 = vld [vmem:[#allocation2 + $0xf9] sm:$0xff]  ;;  %v6480_v62 = vpack.i.bf16 %v445_v59, %v444_v58  ;;  %2291 = vst.msk [vmem:[#allocation3 + $0x198] sm:$0xff] %vm1739_vm3, %v8275_v0  ;;  %2292 = vst.msk [vmem:[#allocation3 + $0x1a0] sm:$0xff] %vm1739_vm3, %v8275_v0 }
  0x3c   : > { %v6484_v63 = vpack.i.bf16 %v447_v61, %v446_v60  ;;  %v448_v1 = vld [vmem:[#allocation2 + $0x109] sm:$0xff]  ;;  %v449_v2 = vld [vmem:[#allocation2 + $0x111] sm:$0xff]  ;;  %v460_v19 = vld [vmem:[#allocation2 + $0x1a] sm:$0xff] }
  0x3d   : > { %4792 = vrot.lane.b32.xlu1 %v6452_v45, %s6196_s18  ;;  %v450_v3 = vld [vmem:[#allocation2 + $0x121] sm:$0xff]  ;;  %v451_v4 = vld [vmem:[#allocation2 + $0x129] sm:$0xff]  ;;  %v4821_v5 = vpack.i.bf16 %v449_v2, %v448_v1  ;;  %v462_v21 = vld [vmem:[#allocation2 + $0x32] sm:$0xff] }
  0x3e   : > { %4797 = vrot.lane.b32.xlu0 %v6456_v49, %s6196_s18  ;;  %v4826_v6 = vpack.i.bf16 %v451_v4, %v450_v3  ;;  %v452_v7 = vld [vmem:[#allocation2 + $0x139] sm:$0xff]  ;;  %v453_v8 = vld [vmem:[#allocation2 + $0x141] sm:$0xff]  ;;  %v464_v25 = vld [vmem:[#allocation2 + $0x4a] sm:$0xff] }
  0x3f   : > { %v454_v9 = vld [vmem:[#allocation2 + $0x151] sm:$0xff]  ;;  %v455_v10 = vld [vmem:[#allocation2 + $0x159] sm:$0xff]  ;;  %v4831_v11 = vpack.i.bf16 %v453_v8, %v452_v7  ;;  %v461_v20 = vld [vmem:[#allocation2 + $0x22] sm:$0xff] }
  0x40   : > { %v4836_v12 = vpack.i.bf16 %v455_v10, %v454_v9  ;;  %v456_v13 = vld [vmem:[#allocation2 + $0x169] sm:$0xff]  ;;  %v457_v14 = vld [vmem:[#allocation2 + $0x171] sm:$0xff]  ;;  %v463_v22 = vld [vmem:[#allocation2 + $0x3a] sm:$0xff]  ;;  %v6503_v23 = vpack.i.bf16 %v461_v20, %v460_v19 }
  0x41   : > { %4802 = vrot.lane.b32.xlu1 %v6472_v56, %s6196_s18  ;;  %v4841_v17 = vpack.i.bf16 %v457_v14, %v456_v13  ;;  %v6506_v24 = vpack.i.bf16 %v463_v22, %v462_v21  ;;  %v465_v26 = vld [vmem:[#allocation2 + $0x52] sm:$0xff]  ;;  %v466_v27 = vld [vmem:[#allocation2 + $0x62] sm:$0xff]  ;;  %v467_v28 = vld [vmem:[#allocation2 + $0x6a] sm:$0xff] }
  0x42   : > { %4807 = vrot.lane.b32.xlu0 %v6476_v57, %s6196_s18  ;;  %v6510_v30 = vpack.i.bf16 %v465_v26, %v464_v25  ;;  %v6514_v31 = vpack.i.bf16 %v467_v28, %v466_v27  ;;  %v468_v32 = vld [vmem:[#allocation2 + $0x7a] sm:$0xff]  ;;  %v469_v34 = vld [vmem:[#allocation2 + $0x82] sm:$0xff]  ;;  %v470_v35 = vld [vmem:[#allocation2 + $0x92] sm:$0xff] }
  0x43   : > { %v471_v36 = vld [vmem:[#allocation2 + $0x9a] sm:$0xff]  ;;  %v6518_v38 = vpack.i.bf16 %v469_v34, %v468_v32  ;;  %v472_v41 = vld [vmem:[#allocation2 + $0xaa] sm:$0xff]  ;;  %v473_v42 = vld [vmem:[#allocation2 + $0xb2] sm:$0xff] }
  0x44   : > { %v6522_v40 = vpack.i.bf16 %v471_v36, %v470_v35  ;;  %v474_v43 = vld [vmem:[#allocation2 + $0xc2] sm:$0xff]  ;;  %v475_v44 = vld [vmem:[#allocation2 + $0xca] sm:$0xff]  ;;  %v6526_v46 = vpack.i.bf16 %v473_v42, %v472_v41  ;;  %v476_v48 = vld [vmem:[#allocation2 + $0xda] sm:$0xff] }
  0x45   : > { %4812 = vrot.lane.b32.xlu1 %v6480_v62, %s6196_s18  ;;  %v6530_v47 = vpack.i.bf16 %v475_v44, %v474_v43  ;;  %v477_v50 = vld [vmem:[#allocation2 + $0xe2] sm:$0xff]  ;;  %v478_v51 = vld [vmem:[#allocation2 + $0xf2] sm:$0xff]  ;;  %v479_v52 = vld [vmem:[#allocation2 + $0xfa] sm:$0xff] }
  0x46   : > { %4817 = vrot.lane.b32.xlu0 %v6484_v63, %s6196_s18  ;;  %v6534_v53 = vpack.i.bf16 %v477_v50, %v476_v48  ;;  %v6538_v54 = vpack.i.bf16 %v479_v52, %v478_v51  ;;  %v480_v55 = vld [vmem:[#allocation2 + $0x10a] sm:$0xff]  ;;  %v481_v58 = vld [vmem:[#allocation2 + $0x112] sm:$0xff]  ;;  %v482_v59 = vld [vmem:[#allocation2 + $0x122] sm:$0xff] }
  0x47   : > { %v483_v60 = vld [vmem:[#allocation2 + $0x12a] sm:$0xff]  ;;  %v6542_v61 = vpack.i.bf16 %v481_v58, %v480_v55  ;;  %v484_v2 = vld [vmem:[#allocation2 + $0x13a] sm:$0xff]  ;;  %v485_v3 = vld [vmem:[#allocation2 + $0x142] sm:$0xff] }
  0x48   : > { %v4906_v1 = vpack.i.bf16 %v483_v60, %v482_v59  ;;  %v486_v4 = vld [vmem:[#allocation2 + $0x152] sm:$0xff]  ;;  %v488_v8 = vld [vmem:[#allocation2 + $0x16a] sm:$0xff]  ;;  %v6686_v52 = vld [vmem:[#allocation2 + $0xc0] sm:$0xff] }
  0x49   : > { %4822 = vrot.lane.b32.xlu1 %v4821_v5, %s6196_s18  ;;  %v487_v5 = vld [vmem:[#allocation2 + $0x15a] sm:$0xff]  ;;  %v489_v9 = vld [vmem:[#allocation2 + $0x172] sm:$0xff]  ;;  %v6578_v19 = vld [vmem:[#allocation2 + $0x48] sm:$0xff]  ;;  %8295 = vst [vmem:[#allocation7_spill] sm:$0xff] %v6686_v52 }
  0x4a   : > { %4827 = vrot.lane.b32.xlu0 %v4826_v6, %s6196_s18  ;;  %v4911_v6 = vpack.i.bf16 %v485_v3, %v484_v2  ;;  %v4916_v7 = vpack.i.bf16 %v487_v5, %v486_v4  ;;  %v6549_v10 = vld [vmem:[#allocation2 + $0x18] sm:$0xff]  ;;  %v6557_v14 = vld [vmem:[#allocation2 + $0x30] sm:$0xff]  ;;  %v6600_v25 = vld [vmem:[#allocation2 + $0x68] sm:$0xff] }
  0x4b   : > { %v6559_v15 = vld [vmem:[#allocation2 + $0x38] sm:$0xff]  ;;  %v6580_v20 = vld [vmem:[#allocation2 + $0x50] sm:$0xff]  ;;  %v6656_v36 = vld [vmem:[#allocation2 + $0xa8] sm:$0xff] }
  0x4c   : > { %v4931_v16 = vpack.i.bf16 %v6559_v15, %v6557_v14  ;;  %v4961_v21 = vpack.i.bf16 %v6580_v20, %v6578_v19  ;;  %v353_v27 = vld [vmem:[%s6387_s17 + $0xf0] sm:$0xff]  ;;  %v354_v28 = vld [vmem:[%s6387_s17 + $0xf8] sm:$0xff]  ;;  %v6688_v55 = vld [vmem:[#allocation2 + $0xc8] sm:$0xff] }
  0x4d   : > { %4832 = vrot.lane.b32.xlu1 %v4831_v11, %s6196_s18  ;;  %v6551_v11 = vld [vmem:[#allocation2 + $0x20] sm:$0xff]  ;;  %386 = vst.msk [vmem:[#allocation2 + $0x181] sm:$0xff] %vm277_vm0, %v353_v27  ;;  %387 = vst.msk [vmem:[#allocation2 + $0x189] sm:$0xff] %vm277_vm0, %v354_v28  ;;  %v6636_v32 = vld [vmem:[#allocation2 + $0x98] sm:$0xff] }
  0x4e   : > { %4837 = vrot.lane.b32.xlu0 %v4836_v12, %s6196_s18  ;;  %v4921_v12 = vpack.i.bf16 %v489_v9, %v488_v8  ;;  %v4926_v13 = vpack.i.bf16 %v6551_v11, %v6549_v10  ;;  %v6658_v41 = vld [vmem:[#allocation2 + $0xb0] sm:$0xff]  ;;  %8296 = vst [vmem:[#allocation8_spill] sm:$0xff] %v6688_v55  ;;  %v6714_v3 = vld [vmem:[#allocation2 + $0xd8] sm:$0xff]  ;;  %v6716_v4 = vld [vmem:[#allocation2 + $0xe0] sm:$0xff] }
  0x4f   : > { %8303 = vst [vmem:[#allocation15_spill] sm:$0xff] %v6714_v3  ;;  %8304 = vst [vmem:[#allocation16_spill] sm:$0xff] %v6716_v4  ;;  %v416_v27 = vld [vmem:[#allocation2 + $0x108] sm:$0xff]  ;;  %v417_v28 = vld [vmem:[#allocation2 + $0x110] sm:$0xff] }
  0x51   : > { %4842 = vrot.lane.b32.xlu1 %v4841_v17, %s6196_s18  ;;  %v6046_v17 = vld [vmem:[%s8268_s1] sm:$0xff]   ;;  %s6203_s18 = smov 32  }
  0x52   : > { %4847 = vrot.lane.b32.xlu0 %v4846_v18, %s6197_s19  ;;  %4625 = vmatprep.subr.bf16.mxu0 %v6046_v17  ;;  %v6047_v18 = vld [vmem:[%s8268_s1 + $0x8] sm:$0xff]  }
  0x53   : > { %4626 = vmatpush3.bf16.msra.mxu0 %v6046_v17 }
  0x54   : > { %4627 = vmatprep.subr.bf16.mxu0 %v6047_v18 }
  0x55   : > { %4852 = vrot.lane.b32.xlu1 %v6503_v23, %s6197_s19 }
  0x56   : > { %4857 = vrot.lane.b32.xlu0 %v6506_v24, %s6197_s19 }
  0x57   : > { %4628 = vmatpush3.bf16.msra.mxu0 %v6047_v18 }
  0x59   : > { %4862 = vrot.lane.b32.xlu1 %v6510_v30, %s6197_s19 }
  0x5a   : > { %4867 = vrot.lane.b32.xlu0 %v6514_v31, %s6197_s19 }
  0x5d   : > { %4872 = vrot.lane.b32.xlu1 %v6518_v38, %s6197_s19 }
  0x5e   : > { %4877 = vrot.lane.b32.xlu0 %v6522_v40, %s6197_s19 }
  0x61   : > { %4882 = vrot.lane.b32.xlu1 %v6526_v46, %s6197_s19 }
  0x62   : > { %4887 = vrot.lane.b32.xlu0 %v6530_v47, %s6197_s19 }
  0x65   : > { %4892 = vrot.lane.b32.xlu1 %v6534_v53, %s6197_s19 }
  0x66   : > { %4897 = vrot.lane.b32.xlu0 %v6538_v54, %s6197_s19 }
  0x69   : > { %4902 = vrot.lane.b32.xlu1 %v6542_v61, %s6197_s19 }
  0x6a   : > { %4907 = vrot.lane.b32.xlu0 %v4906_v1, %s6197_s19 }
  0x6d   : > { %4912 = vrot.lane.b32.xlu1 %v4911_v6, %s6197_s19 }
  0x6e   : > { %4917 = vrot.lane.b32.xlu0 %v4916_v7, %s6197_s19 }
  0x71   : > { %4922 = vrot.lane.b32.xlu1 %v4921_v12, %s6197_s19  ;;  %v414_v12 = vld [vmem:[#allocation2 + $0xf0] sm:$0xff] }
  0x72   : > { %4927 = vrot.lane.b32.xlu0 %v4926_v13, %s6198_s20  ;;  %v415_v13 = vld [vmem:[#allocation2 + $0xf8] sm:$0xff] }
  0x75   : > { %4932 = vrot.lane.b32.xlu1 %v4931_v16, %s6198_s20 }
  0x76   : > { %4937 = vrot.lane.b32.xlu0 %v6436_v33, %s6199_s23  ;;  %v6048_v33 = vld [vmem:[%s8268_s1 + $0x10] ss:$0 sps:$4 sm:$0x33]  }
  0x77   : > { %4711 = vmatprep.subr.msk.bf16.mxu0 %vm2056_vm4, %v6048_v33  ;;  %v2058_v22 = vsel %vm2056_vm4, %v6048_v33, 0  ;;  %vm3963_vm4 = vcmask 588800  }
  0x78   : > { %4630 = vmatpush3.bf16.msra.mxu0 %v2058_v22  ;;  %v635_v22 = vld [vmem:[#allocation2 + $0xf1] sm:$0xff] }
  0x79   : > { %4942 = vrot.lane.b32.xlu1 %v6434_v29, %s6199_s23  ;;  %4705 = vmatprep.subr.bf16.mxu0 %v8275_v0  ;;  %v575_v0 = vld [vmem:[#allocation2 + $0x112] sm:$0xff] }
  0x7a   : > { %4947 = vrot.lane.b32.xlu0 %v6503_v23, %s6200_s9  ;;  %v6598_v23 = vld [vmem:[#allocation2 + $0x60] sm:$0xff] }
  0x7b   : > { %v4991_v26 = vpack.i.bf16 %v6600_v25, %v6598_v23 }
  0x7d   : > { %4952 = vrot.lane.b32.xlu1 %v6506_v24, %s6200_s9 }
  0x7e   : > { %4957 = vrot.lane.b32.xlu0 %v4931_v16, %s6201_s15 }
  0x81   : > { %4962 = vrot.lane.b32.xlu1 %v4961_v21, %s6201_s15 }
  0x82   : > { %4967 = vrot.lane.b32.xlu0 %v6434_v29, %s6202_s16  ;;  %v6614_v29 = vld [vmem:[#allocation2 + $0x78] sm:$0xff] }
  0x85   : > { %4972 = vrot.lane.b32.xlu1 %v6442_v37, %s6202_s16 }
  0x86   : > { %4977 = vrot.lane.b32.xlu0 %v6506_v24, %s6203_s18  ;;  %v6616_v24 = vld [vmem:[#allocation2 + $0x80] sm:$0xff] }
  0x89   : > { %4982 = vrot.lane.b32.xlu1 %v6510_v30, %s6203_s18 }
  0x8a   : > { %4987 = vrot.lane.b32.xlu0 %v4961_v21, %s6198_s20 }
  0x8d   : > { %4992 = vrot.lane.b32.xlu1 %v4991_v26, %s6198_s20 }
  0x8e   : > { %4997 = vrot.lane.b32.xlu0 %v6442_v37, %s6199_s23  ;;  %v5021_v37 = vpack.i.bf16 %v6616_v24, %v6614_v29 }
  0x91   : > { %5002 = vrot.lane.b32.xlu1 %v6448_v39, %s6199_s23 }
  0x92   : > { %5007 = vrot.lane.b32.xlu0 %v6510_v30, %s6200_s9  ;;  %v6634_v30 = vld [vmem:[#allocation2 + $0x90] sm:$0xff] }
  0x93   : > { %v5051_v34 = vpack.i.bf16 %v6636_v32, %v6634_v30  ;;  %v6643_v35 = vpop.permute.xlu0 %4767 }
  0x95   : > { %5012 = vrot.lane.b32.xlu1 %v6514_v31, %s6200_s9 }
  0x96   : > { %5017 = vrot.lane.b32.xlu0 %v4991_v26, %s6201_s15  ;;  %v636_v26 = vld [vmem:[#allocation2 + $0xf9] sm:$0xff] }
  0x99   : > { %5022 = vrot.lane.b32.xlu1 %v5021_v37, %s6201_s15 }
  0x9a   : > { %5027 = vrot.lane.b32.xlu0 %v6448_v39, %s6202_s16 }
  0x9d   : > { %5032 = vrot.lane.b32.xlu1 %v6452_v45, %s6202_s16 }
  0x9e   : > { %5037 = vrot.lane.b32.xlu0 %v6514_v31, %s6203_s18 }
  0xa1   : > { %5042 = vrot.lane.b32.xlu1 %v6518_v38, %s6203_s18 }
  0xa2   : > { %5047 = vrot.lane.b32.xlu0 %v5021_v37, %s6198_s20 }
  0xa5   : > { %5052 = vrot.lane.b32.xlu1 %v5051_v34, %s6198_s20 }
  0xa6   : > { %5057 = vrot.lane.b32.xlu0 %v6452_v45, %s6199_s23  ;;  %v5081_v45 = vpack.i.bf16 %v6658_v41, %v6656_v36 }
  0xa7   : > { %v6648_v39 = vpop.permute.xlu1 %4777 }
  0xa8   : > { %v6650_v31 = vpop.permute.xlu0 %4772 }
  0xa9   : > { %5062 = vrot.lane.b32.xlu1 %v6456_v49, %s6199_s23 }
  0xaa   : > { %5067 = vrot.lane.b32.xlu0 %v6518_v38, %s6200_s9 }
  0xab   : > { %v6660_v42 = vpop.permute.xlu1 %4782 }
  0xac   : > { %v6662_v43 = vpop.permute.xlu0 %4787 }
  0xad   : > { %5072 = vrot.lane.b32.xlu1 %v6522_v40, %s6200_s9 }
  0xae   : > { %5077 = vrot.lane.b32.xlu0 %v5051_v34, %s6201_s15  ;;  %v5206_v34 = vpack.i.bf16 %v636_v26, %v635_v22  ;;  %v418_v22 = vld [vmem:[#allocation2 + $0x120] sm:$0xff]  ;;  %v419_v26 = vld [vmem:[#allocation2 + $0x128] sm:$0xff] }
  0xaf   : > { %v6669_v44 = vpop.permute.xlu1 %4792 }
  0xb0   : > { %v6671_v48 = vpop.permute.xlu0 %4797 }
  0xb1   : > { %5082 = vrot.lane.b32.xlu1 %v5081_v45, %s6201_s15 }
  0xb2   : > { %5087 = vrot.lane.b32.xlu0 %v6456_v49, %s6202_s16  ;;  %v5111_v49 = vpack.i.bf16 %v6688_v55, %v6686_v52 }
  0xb3   : > { %v6676_v38 = vpop.permute.xlu1 %4802 }
  0xb4   : > { %v6678_v50 = vpop.permute.xlu0 %4807 }
  0xb5   : > { %5092 = vrot.lane.b32.xlu1 %v6472_v56, %s6202_s16 }
  0xb6   : > { %5097 = vrot.lane.b32.xlu0 %v6522_v40, %s6203_s18 }
  0xb7   : > { %v6684_v51 = vpop.permute.xlu1 %4812 }
  0xb8   : > { %v6690_v58 = vpop.permute.xlu0 %4817 }
  0xb9   : > { %8297 = vst [vmem:[#allocation9_spill] sm:$0xff] %v6690_v58  ;;  %5102 = vrot.lane.b32.xlu1 %v6526_v46, %s6203_s18 }
  0xba   : > { %5107 = vrot.lane.b32.xlu0 %v5081_v45, %s6198_s20  ;;  %v637_v45 = vld [vmem:[#allocation2 + $0x109] sm:$0xff] }
  0xbb   : > { %v6697_v59 = vpop.permute.xlu1 %4822 }
  0xbc   : > { %8298 = vst [vmem:[#allocation10_spill] sm:$0xff] %v6697_v59  ;;  %v6699_v60 = vpop.permute.xlu0 %4827  ;;  %v421_v59 = vld [vmem:[#allocation2 + $0x140] sm:$0xff] }
  0xbd   : > { %8299 = vst [vmem:[#allocation11_spill] sm:$0xff] %v6699_v60  ;;  %5112 = vrot.lane.b32.xlu1 %v5111_v49, %s6198_s20 }
  0xbe   : > { %5117 = vrot.lane.b32.xlu0 %v6472_v56, %s6199_s23  ;;  %v5141_v56 = vpack.i.bf16 %v6716_v4, %v6714_v3 }
  0xbf   : > { %v6704_v40 = vpop.permute.xlu1 %4832 }
  0xc0   : > { %8300 = vst [vmem:[#allocation12_spill] sm:$0xff] %v6704_v40  ;;  %v6706_v1 = vpop.permute.xlu0 %4837 }
  0xc1   : > { %8301 = vst [vmem:[#allocation13_spill] sm:$0xff] %v6706_v1  ;;  %5122 = vrot.lane.b32.xlu1 %v6476_v57, %s6199_s23  ;;  %v4769_v1 = vunpack.i.l.bf16 %v6643_v35 }
  0xc2   : > { %5127 = vrot.lane.b32.xlu0 %v6526_v46, %s6200_s9 }
  0xc3   : > { %v6712_v2 = vpop.permute.xlu1 %4842 }
  0xc4   : > { %8302 = vst [vmem:[#allocation14_spill] sm:$0xff] %v6712_v2  ;;  %v6718_v5 = vpop.permute.xlu0 %4847  ;;  %v4770_v2 = vunpack.i.h.bf16 %v6643_v35  ;;  %v4775_v35 = vunpack.i.h.bf16 %v6650_v31 }
  0xc5   : > { %5132 = vrot.lane.b32.xlu1 %v6530_v47, %s6200_s9  ;;  %v4850_v58 = vunpack.i.h.bf16 %v6718_v5  ;;  %v4849_v3 = vunpack.i.l.bf16 %v6718_v5 }
  0xc6   : > { %5137 = vrot.lane.b32.xlu0 %v5111_v49, %s6201_s15 }
  0xc7   : > { %v6725_v6 = vpop.permute.xlu1 %4852 }
  0xc8   : > { %v6727_v7 = vpop.permute.xlu0 %4857  ;;  %v4854_v4 = vunpack.i.l.bf16 %v6725_v6  ;;  %v4855_v55 = vunpack.i.h.bf16 %v6725_v6 }
  0xc9   : > { %5142 = vrot.lane.b32.xlu1 %v5141_v56, %s6201_s15 }
  0xca   : > { %5147 = vrot.lane.b32.xlu0 %v6476_v57, %s6202_s16  ;;  %v5171_v57 = vpack.i.bf16 %v415_v13, %v414_v12 }
  0xcb   : > { %v6732_v46 = vpop.permute.xlu1 %4862 }
  0xcc   : > { %v6734_v8 = vpop.permute.xlu0 %4867 }
  0xcd   : > { %5152 = vrot.lane.b32.xlu1 %v6480_v62, %s6202_s16 }
  0xce   : > { %5157 = vrot.lane.b32.xlu0 %v6530_v47, %s6203_s18 }
  0xcf   : > { %v6740_v9 = vpop.permute.xlu1 %4872 }
  0xd0   : > { %v6742_v16 = vpop.permute.xlu0 %4877 }
  0xd1   : > { %5162 = vrot.lane.b32.xlu1 %v6534_v53, %s6203_s18 }
  0xd2   : > { %5167 = vrot.lane.b32.xlu0 %v5141_v56, %s6198_s20 }
  0xd3   : > { %v6747_v17 = vpop.permute.xlu1 %4882 }
  0xd4   : > { %v6749_v18 = vpop.permute.xlu0 %4887 }
  0xd5   : > { %5172 = vrot.lane.b32.xlu1 %v5171_v57, %s6198_s20 }
  0xd6   : > { %5177 = vrot.lane.b32.xlu0 %v6480_v62, %s6199_s23  ;;  %v5201_v62 = vpack.i.bf16 %v417_v28, %v416_v27  ;;  %v6788_v28 = vpack.i.bf16 %v419_v26, %v418_v22  ;;  %v641_v26 = vld [vmem:[#allocation2 + $0x139] sm:$0xff] }
  0xd7   : > { %v6754_v47 = vpop.permute.xlu1 %4892 }
  0xd8   : > { %v6756_v33 = vpop.permute.xlu0 %4897 }
  0xd9   : > { %8305 = vst [vmem:[#allocation17_spill] sm:$0xff] %v6756_v33  ;;  %5182 = vrot.lane.b32.xlu1 %v6484_v63, %s6199_s23  ;;  %v638_v63 = vld [vmem:[#allocation2 + $0x111] sm:$0xff] }
  0xda   : > { %5187 = vrot.lane.b32.xlu0 %v6534_v53, %s6200_s9  ;;  %v5211_v56 = vpack.i.bf16 %v638_v63, %v637_v45  ;;  %v545_v45 = vld [vmem:[#allocation2 + $0x129] sm:$0xff]  ;;  %v420_v33 = vld [vmem:[#allocation2 + $0x138] sm:$0xff] }
  0xdb   : > { %v6762_v21 = vpop.permute.xlu1 %4902  ;;  %v574_v63 = vld [vmem:[#allocation2 + $0x10a] sm:$0xff] }
  0xdc   : > { %8306 = vst [vmem:[#allocation18_spill] sm:$0xff] %v6762_v21  ;;  %v6764_v37 = vpop.permute.xlu0 %4907  ;;  %v5246_v60 = vpack.i.bf16 %v575_v0, %v574_v63 }
  0xdd   : > { %8307 = vst [vmem:[#allocation19_spill] sm:$0xff] %v6764_v37  ;;  %5192 = vrot.lane.b32.xlu1 %v6538_v54, %s6200_s9  ;;  %v395_v37 = vld [vmem:[#allocation2 + $0x8] sm:$0xff] }
  0xde   : > { %5197 = vrot.lane.b32.xlu0 %v5171_v57, %s6201_s15 }
  0xdf   : > { %v6769_v49 = vpop.permute.xlu1 %4912 }
  0xe0   : > { %8308 = vst [vmem:[#allocation20_spill] sm:$0xff] %v6769_v49  ;;  %v6771_v53 = vpop.permute.xlu0 %4917  ;;  %v642_v49 = vld [vmem:[#allocation2 + $0x141] sm:$0xff] }
  0xe1   : > { %8309 = vst [vmem:[#allocation21_spill] sm:$0xff] %v6771_v53  ;;  %5202 = vrot.lane.b32.xlu1 %v5201_v62, %s6201_s15  ;;  %v577_v53 = vld [vmem:[#allocation2 + $0x12a] sm:$0xff] }
  0xe2   : > { %5207 = vrot.lane.b32.xlu0 %v5206_v34, %s6202_s16  ;;  %v544_v34 = vld [vmem:[#allocation2 + $0x121] sm:$0xff] }
  0xe3   : > { %v6775_v12 = vpop.permute.xlu1 %4922  ;;  %v6800_v40 = vpack.i.bf16 %v545_v45, %v544_v34 }
  0xe4   : > { %8310 = vst [vmem:[#allocation22_spill] sm:$0xff] %v6775_v12  ;;  %v6777_v13 = vpop.permute.xlu0 %4927  ;;  %v576_v12 = vld [vmem:[#allocation2 + $0x122] sm:$0xff] }
  0xe5   : > { %5212 = vrot.lane.b32.xlu1 %v5211_v56, %s6202_s16  ;;  %v6802_v21 = vpack.i.bf16 %v577_v53, %v576_v12  ;;  %v4929_v34 = vunpack.i.l.bf16 %v6777_v13  ;;  %v6813_v53 = vpack.i.bf16 %v421_v59, %v420_v33  ;;  %v1708_v12 = vsel %vm277_vm0, %v395_v37, %v4770_v2 }
  0xe6   : > { %5217 = vrot.lane.b32.xlu0 %v6538_v54, %s6203_s18 }
  0xe7   : > { %v6782_v57 = vpop.permute.xlu1 %4932 }
  0xe8   : > { %v6784_v27 = vpop.permute.xlu0 %4937  ;;  %v4935_v6 = vunpack.i.h.bf16 %v6782_v57  ;;  %v4934_v52 = vunpack.i.l.bf16 %v6782_v57 }
  0xe9   : > { %5222 = vrot.lane.b32.xlu1 %v6542_v61, %s6203_s18  ;;  %v4774_v61 = vunpack.i.l.bf16 %v6650_v31  ;;  %v6815_v31 = vpack.i.bf16 %v642_v49, %v641_v26  ;;  %v4940_v59 = vunpack.i.h.bf16 %v6784_v27  ;;  %v4939_v33 = vunpack.i.l.bf16 %v6784_v27 }
  0xea   : > { %5227 = vrot.lane.b32.xlu0 %v5201_v62, %s6198_s20  ;;  %v394_v62 = vld [vmem:[#allocation2] sm:$0xff] }
  0xeb   : > { %v6791_v54 = vpop.permute.xlu1 %4942  ;;  %v1707_v45 = vsel %vm277_vm0, %v394_v62, %v4769_v1  ;;  %v1709_v5 = vsel %vm277_vm0, %v6549_v10, %v4774_v61  ;;  %v1710_v1 = vsel %vm277_vm0, %v6551_v11, %v4775_v35  ;;  %v1741_v10 = vsel %vm1739_vm3, %v1708_v12, %v4850_v58 }
  0xec   : > { %v6796_v22 = vpop.permute.xlu0 %4947  ;;  %v1740_v2 = vsel %vm1739_vm3, %v1707_v45, %v4849_v3  ;;  %v1742_v37 = vsel %vm1739_vm3, %v1709_v5, %v4854_v4  ;;  %v1743_v49 = vsel %vm1739_vm3, %v1710_v1, %v4855_v55  ;;  %v4944_v58 = vunpack.i.l.bf16 %v6791_v54 }
  0xed   : > { %5232 = vrot.lane.b32.xlu1 %v6788_v28, %s6198_s20  ;;  %v4950_v57 = vunpack.i.h.bf16 %v6796_v22  ;;  %v4949_v27 = vunpack.i.l.bf16 %v6796_v22  ;;  %v1775_v4 = vsel %vm1772_vm5, %v1742_v37, %v4934_v52  ;;  %v4945_v22 = vunpack.i.h.bf16 %v6791_v54 }
  0xee   : > { %5237 = vrot.lane.b32.xlu0 %v5211_v56, %s6199_s23  ;;  %v4930_v56 = vunpack.i.h.bf16 %v6777_v13  ;;  %v1773_v13 = vsel %vm1772_vm5, %v1740_v2, %v4929_v34 }
  0xef   : > { %v6811_v0 = vpop.permute.xlu1 %4952  ;;  %v1806_v55 = vsel %vm1805_vm6, %v1773_v13, %v4939_v33 }
  0xf0   : > { %v4958_v63 = vpop.permute.xlu0 %4957  ;;  %v1774_v11 = vsel %vm1772_vm5, %v1741_v10, %v4930_v56  ;;  %v4954_v34 = vunpack.i.l.bf16 %v6811_v0  ;;  %v1839_v52 = vsel %vm1838_vm7, %v1806_v55, %v4949_v27  ;;  %v4955_v56 = vunpack.i.h.bf16 %v6811_v0 }
  0xf1   : > { %5242 = vrot.lane.b32.xlu1 %v6800_v40, %s6199_s23  ;;  %v4960_v26 = vunpack.i.h.bf16 %v4958_v63  ;;  %v4959_v3 = vunpack.i.l.bf16 %v4958_v63  ;;  %v1807_v35 = vsel %vm1805_vm6, %v1774_v11, %v4940_v59  ;;  %v1808_v59 = vsel %vm1805_vm6, %v1775_v4, %v4944_v58  ;;  %v674_v11 = vld [vmem:[#allocation2 + $0x142] sm:$0xff] }
  0xf2   : > { %5247 = vrot.lane.b32.xlu0 %v5246_v60, %s6200_s9  ;;  %v1776_v60 = vsel %vm1772_vm5, %v1743_v49, %v4935_v6  ;;  %v1840_v5 = vsel %vm1838_vm7, %v1807_v35, %v4950_v57  ;;  %v1841_v0 = vsel %vm1838_vm7, %v1808_v59, %v4954_v34  ;;  %v423_v59 = vld [vmem:[#allocation2 + $0x158] sm:$0xff] }
  0xf3   : > { %v4963_v61 = vpop.permute.xlu1 %4962  ;;  %v1872_v54 = vsel %vm1871_vm8, %v1839_v52, %v4959_v3  ;;  %v1873_v10 = vsel %vm1871_vm8, %v1840_v5, %v4960_v26  ;;  %v1809_v13 = vsel %vm1805_vm6, %v1776_v60, %v4945_v22 }
  0xf4   : > { %v4968_v62 = vpop.permute.xlu0 %4967  ;;  %v4964_v63 = vunpack.i.l.bf16 %v4963_v61  ;;  %v4965_v33 = vunpack.i.h.bf16 %v4963_v61  ;;  %v673_v61 = vld [vmem:[#allocation2 + $0x13a] sm:$0xff]  ;;  %v1842_v58 = vsel %vm1838_vm7, %v1809_v13, %v4955_v56  ;;  %v4785_v13 = vunpack.i.h.bf16 %v6660_v42 }
  0xf5   : > { %5252 = vrot.lane.b32.xlu1 %v6802_v21, %s6200_s9  ;;  %v4970_v12 = vunpack.i.h.bf16 %v4968_v62  ;;  %v4969_v45 = vunpack.i.l.bf16 %v4968_v62 }
  0xf6   : > { %5257 = vrot.lane.b32.xlu0 %v6788_v28, %s6201_s15  ;;  %v1874_v26 = vsel %vm1871_vm8, %v1841_v0, %v4964_v63  ;;  %v1875_v60 = vsel %vm1871_vm8, %v1842_v58, %v4965_v33  ;;  %v424_v58 = vld [vmem:[#allocation2 + $0x168] sm:$0xff] }
  0xf7   : > { %v4973_v6 = vpop.permute.xlu1 %4972  ;;  %v1905_v57 = vsel %vm1904_vm9, %v1872_v54, %v4969_v45  ;;  %v1906_v27 = vsel %vm1904_vm9, %v1873_v10, %v4970_v12  ;;  %v5281_v45 = vpack.i.bf16 %v674_v11, %v673_v61  ;;  %v548_v54 = vld [vmem:[#allocation2 + $0x151] sm:$0xff]  ;;  %v549_v10 = vld [vmem:[#allocation2 + $0x159] sm:$0xff] }
  0xf8   : > { %v4978_v1 = vpop.permute.xlu0 %4977  ;;  %v4975_v2 = vunpack.i.h.bf16 %v4973_v6  ;;  %v4974_v37 = vunpack.i.l.bf16 %v4973_v6  ;;  %v422_v6 = vld [vmem:[#allocation2 + $0x150] sm:$0xff]  ;;  %v6892_v61 = vpack.i.bf16 %v549_v10, %v548_v54 }
  0xf9   : > { %v4980_v49 = vunpack.i.h.bf16 %v4978_v1  ;;  %v4979_v28 = vunpack.i.l.bf16 %v4978_v1  ;;  %5262 = vrot.lane.b32.xlu1 %v6813_v53, %s6201_s15  ;;  %v5291_v1 = vpack.i.bf16 %v423_v59, %v422_v6 }
  0xfa   : > { %5267 = vrot.lane.b32.xlu0 %v6800_v40, %s6202_s16  ;;  %v1907_v34 = vsel %vm1904_vm9, %v1874_v26, %v4974_v37  ;;  %v1908_v12 = vsel %vm1904_vm9, %v1875_v60, %v4975_v2  ;;  %v580_v2 = vld [vmem:[#allocation2 + $0x152] sm:$0xff] }
  0xfb   : > { %v4983_v3 = vpop.permute.xlu1 %4982  ;;  %v1938_v62 = vsel %vm1937_vm10, %v1905_v57, %v4979_v28  ;;  %v1939_v4 = vsel %vm1937_vm10, %v1906_v27, %v4980_v49  ;;  %v4780_v49 = vunpack.i.h.bf16 %v6648_v39  ;;  %v4779_v28 = vunpack.i.l.bf16 %v6648_v39  ;;  %v645_v57 = vld [vmem:[#allocation2 + $0x169] sm:$0xff]  ;;  %v646_v27 = vld [vmem:[#allocation2 + $0x171] sm:$0xff] }
  0xfc   : > { %v4985_v55 = vunpack.i.h.bf16 %v4983_v3  ;;  %v4984_v35 = vunpack.i.l.bf16 %v4983_v3  ;;  %v6869_v40 = vpop.permute.xlu0 %4987  ;;  %v1970_v22 = vpack.c.bf16 %v1939_v4, %v1938_v62  ;;  %v425_v26 = vld [vmem:[#allocation2 + $0x170] sm:$0xff]  ;;  %v4860_v3 = vunpack.i.h.bf16 %v6727_v7 }
  0xfd   : > { %5272 = vrot.lane.b32.xlu1 %v6815_v31, %s6202_s16  ;;  %v4859_v62 = vunpack.i.l.bf16 %v6727_v7  ;;  %v4865_v39 = vunpack.i.h.bf16 %v6732_v46  ;;  %v4864_v4 = vunpack.i.l.bf16 %v6732_v46  ;;  %v4989_v60 = vunpack.i.l.bf16 %v6869_v40 }
  0xfe   : > { %v1940_v52 = vsel %vm1937_vm10, %v1907_v34, %v4984_v35  ;;  %v1941_v5 = vsel %vm1937_vm10, %v1908_v12, %v4985_v55  ;;  %5277 = vrot.lane.b32.xlu0 %v6802_v21, %s6203_s18  ;;  %4631 = vmatprep.mubr.msk.bf16.mxu0 %vm2007_vm11, %v1970_v22  ;;  %v581_v21 = vld [vmem:[#allocation2 + $0x15a] sm:$0xff]  ;;  %v6904_v35 = vpack.i.bf16 %v425_v26, %v424_v58 }
  0xff   : > { %v6880_v56 = vpop.permute.xlu1 %4992  ;;  %v1971_v63 = vpack.c.bf16 %v1941_v5, %v1940_v52  ;;  %v6894_v11 = vpack.i.bf16 %v581_v21, %v580_v2  ;;  %v6906_v22 = vpack.i.bf16 %v646_v27, %v645_v57  ;;  %v1712_v7 = vsel %vm277_vm0, %v6559_v15, %v4780_v49 }
 0x100   : > { %v4998_v33 = vpop.permute.xlu0 %4997  ;;  %v1714_v34 = vsel %vm277_vm0, %v6580_v20, %v4785_v13  ;;  %v4995_v46 = vunpack.i.h.bf16 %v6880_v56  ;;  %v4994_v52 = vunpack.i.l.bf16 %v6880_v56  ;;  %v1745_v15 = vsel %vm1739_vm3, %v1712_v7, %v4860_v3 }
 0x101   : > { %5282 = vrot.lane.b32.xlu1 %v5281_v45, %s6203_s18  ;;  %4632 = vmatmul.mubr.msk.bf16.vlgmr.msra.gmra.mrb[0].mxu0 %vm2007_vm11, %v1971_v63  ;;  %v5000_v5 = vunpack.i.h.bf16 %v4998_v33  ;;  %v4999_v63 = vunpack.i.l.bf16 %v4998_v33  ;;  %v1747_v20 = vsel %vm1739_vm3, %v1714_v34, %v4865_v39 }
 0x102   : > { %5287 = vrot.lane.b32.xlu0 %v6813_v53, %s6198_s20  ;;  %v4784_v53 = vunpack.i.l.bf16 %v6660_v42  ;;  %v1711_v42 = vsel %vm277_vm0, %v6557_v14, %v4779_v28  ;;  %v1780_v13 = vsel %vm1772_vm5, %v1747_v20, %v4995_v46 }
 0x103   : > { %v6886_v37 = vpop.permute.xlu1 %5002  ;;  %v1744_v6 = vsel %vm1739_vm3, %v1711_v42, %v4859_v62 }
 0x104   : > { %v5008_v0 = vpop.permute.xlu0 %5007  ;;  %v1713_v14 = vsel %vm277_vm0, %v6578_v19, %v4784_v53  ;;  %v1777_v56 = vsel %vm1772_vm5, %v1744_v6, %v4989_v60  ;;  %v5004_v2 = vunpack.i.l.bf16 %v6886_v37 }
 0x105   : > { %5292 = vrot.lane.b32.xlu1 %v5291_v1, %s6198_s20  ;;  %v5010_v59 = vunpack.i.h.bf16 %v5008_v0  ;;  %v5009_v33 = vunpack.i.l.bf16 %v5008_v0  ;;  %v5005_v0 = vunpack.i.h.bf16 %v6886_v37 }
 0x106   : > { %5297 = vrot.lane.b32.xlu0 %v6815_v31, %s6199_s23  ;;  %v4990_v31 = vunpack.i.h.bf16 %v6869_v40  ;;  %v1746_v40 = vsel %vm1739_vm3, %v1713_v14, %v4864_v4  ;;  %v677_v14 = vld [vmem:[#allocation2 + $0x16a] sm:$0xff] }
 0x107   : > { %v5013_v55 = vpop.permute.xlu1 %5012  ;;  %v1779_v28 = vsel %vm1772_vm5, %v1746_v40, %v4994_v52 }
 0x108   : > { %v5018_v12 = vpop.permute.xlu0 %5017  ;;  %v1778_v10 = vsel %vm1772_vm5, %v1745_v15, %v4990_v31  ;;  %v5014_v27 = vunpack.i.l.bf16 %v5013_v55  ;;  %v5015_v62 = vunpack.i.h.bf16 %v5013_v55  ;;  %v1812_v60 = vsel %vm1805_vm6, %v1779_v28, %v5004_v2  ;;  %v678_v15 = vld [vmem:[#allocation2 + $0x172] sm:$0xff] }
 0x109   : > { %5302 = vrot.lane.b32.xlu1 %v6892_v61, %s6199_s23  ;;  %v5020_v19 = vunpack.i.h.bf16 %v5018_v12  ;;  %v5019_v21 = vunpack.i.l.bf16 %v5018_v12  ;;  %v1811_v57 = vsel %vm1805_vm6, %v1778_v10, %v5000_v5 }
 0x10a   : > { %5307 = vrot.lane.b32.xlu0 %v5281_v45, %s6200_s9  ;;  %v1810_v45 = vsel %vm1805_vm6, %v1777_v56, %v4999_v63  ;;  %v1844_v3 = vsel %vm1838_vm7, %v1811_v57, %v5010_v59  ;;  %v1845_v55 = vsel %vm1838_vm7, %v1812_v60, %v5014_v27  ;;  %v521_v57 = vld [vmem:[#allocation2 + $0x188] sm:$0xff]  ;;  %v4790_v60 = vunpack.i.h.bf16 %v6662_v43 }
 0x10b   : > { %v5023_v54 = vpop.permute.xlu1 %5022  ;;  %v1843_v26 = vsel %vm1838_vm7, %v1810_v45, %v5009_v33  ;;  %v1877_v7 = vsel %vm1871_vm8, %v1844_v3, %v5020_v19  ;;  %v520_v45 = vld [vmem:[#allocation2 + $0x180] sm:$0xff]  ;;  %v553_v3 = vld [vmem:[#allocation2 + $0x189] sm:$0xff] }
 0x10c   : > { %v5028_v49 = vpop.permute.xlu0 %5027  ;;  %v5024_v39 = vunpack.i.l.bf16 %v5023_v54  ;;  %v1876_v42 = vsel %vm1871_vm8, %v1843_v26, %v5019_v21  ;;  %v5025_v34 = vunpack.i.h.bf16 %v5023_v54  ;;  %v552_v26 = vld [vmem:[#allocation2 + $0x181] sm:$0xff] }
 0x10d   : > { %5312 = vrot.lane.b32.xlu1 %v6894_v11, %s6200_s9  ;;  %v5030_v53 = vunpack.i.h.bf16 %v5028_v49  ;;  %v5029_v58 = vunpack.i.l.bf16 %v5028_v49  ;;  %v5341_v49 = vpack.i.bf16 %v678_v15, %v677_v14 }
 0x10e   : > { %5317 = vrot.lane.b32.xlu0 %v5291_v1, %s6201_s15  ;;  %v1813_v1 = vsel %vm1805_vm6, %v1780_v13, %v5005_v0  ;;  %v1878_v20 = vsel %vm1871_vm8, %v1845_v55, %v5024_v39  ;;  %v585_v39 = vld [vmem:[#allocation2 + $0x18a] sm:$0xff]  ;;  %v4875_v55 = vunpack.i.h.bf16 %v6740_v9 }
 0x10f   : > { %v5033_v4 = vpop.permute.xlu1 %5032  ;;  %v1909_v5 = vsel %vm1904_vm9, %v1876_v42, %v5029_v58  ;;  %v1910_v63 = vsel %vm1904_vm9, %v1877_v7, %v5030_v53  ;;  %v1846_v6 = vsel %vm1838_vm7, %v1813_v1, %v5015_v62  ;;  %v5351_v58 = vpack.i.bf16 %v521_v57, %v520_v45  ;;  %v584_v62 = vld [vmem:[#allocation2 + $0x182] sm:$0xff] }
 0x110   : > { %v5038_v37 = vpop.permute.xlu0 %5037  ;;  %v5035_v31 = vunpack.i.h.bf16 %v5033_v4  ;;  %v5034_v12 = vunpack.i.l.bf16 %v5033_v4  ;;  %v1879_v33 = vsel %vm1871_vm8, %v1846_v6, %v5025_v34  ;;  %v6972_v4 = vld [vmem:[#allocation2 + $0x198] sm:$0xff]  ;;  %v4789_v42 = vunpack.i.l.bf16 %v6662_v43 }
 0x111   : > { %v5040_v46 = vunpack.i.h.bf16 %v5038_v37  ;;  %v5039_v52 = vunpack.i.l.bf16 %v5038_v37  ;;  %5322 = vrot.lane.b32.xlu1 %v6904_v35, %s6201_s15  ;;  %v4795_v7 = vunpack.i.h.bf16 %v6669_v44  ;;  %v6977_v37 = vld [vmem:[#allocation2 + $0x1a0] sm:$0xff]  ;;  %v4870_v1 = vunpack.i.h.bf16 %v6734_v8 }
 0x112   : > { %5327 = vrot.lane.b32.xlu0 %v6892_v61, %s6202_s16  ;;  %v1911_v61 = vsel %vm1904_vm9, %v1878_v20, %v5034_v12  ;;  %v1912_v21 = vsel %vm1904_vm9, %v1879_v33, %v5035_v31  ;;  %v6979_v31 = vld [vmem:[#allocation2 + $0x199] sm:$0xff]  ;;  %v6981_v12 = vld [vmem:[#allocation2 + $0x1a1] sm:$0xff]  ;;  %v4869_v43 = vunpack.i.l.bf16 %v6734_v8  ;;  %v5381_v15 = vpack.i.bf16 %v6977_v37, %v6972_v4 }
 0x113   : > { %v1942_v40 = vsel %vm1937_vm10, %v1909_v5, %v5039_v52  ;;  %v1943_v56 = vsel %vm1937_vm10, %v1910_v63, %v5040_v46  ;;  %v5043_v59 = vpop.permute.xlu1 %5042  ;;  %v6986_v46 = vpack.i.bf16 %v585_v39, %v584_v62  ;;  %v4794_v52 = vunpack.i.l.bf16 %v6669_v44 }
 0x114   : > { %v5045_v54 = vunpack.i.h.bf16 %v5043_v59  ;;  %v5044_v10 = vunpack.i.l.bf16 %v5043_v59  ;;  %v6955_v2 = vpop.permute.xlu0 %5047  ;;  %v1972_v19 = vpack.c.bf16 %v1943_v56, %v1942_v40  ;;  %v4874_v5 = vunpack.i.l.bf16 %v6740_v9 }
 0x115   : > { %5332 = vrot.lane.b32.xlu1 %v6906_v22, %s6202_s16  ;;  %v5049_v63 = vunpack.i.l.bf16 %v6955_v2  ;;  %v5391_v44 = vpack.i.bf16 %v6981_v12, %v6979_v31  ;;  %v1716_v6 = vsel %vm277_vm0, %v6600_v25, %v4790_v60  ;;  %v1715_v8 = vsel %vm277_vm0, %v6598_v23, %v4789_v42 }
 0x116   : > { %v1944_v28 = vsel %vm1937_vm10, %v1911_v61, %v5044_v10  ;;  %v1945_v13 = vsel %vm1937_vm10, %v1912_v21, %v5045_v54  ;;  %5337 = vrot.lane.b32.xlu0 %v6894_v11, %s6203_s18  ;;  %4635 = vmatprep.mubr.msk.bf16.mxu0 %vm2007_vm11, %v1972_v19  ;;  %v5050_v9 = vunpack.i.h.bf16 %v6955_v2  ;;  %v1717_v54 = vsel %vm277_vm0, %v6614_v29, %v4794_v52 }
 0x117   : > { %v5053_v0 = vpop.permute.xlu1 %5052  ;;  %v1973_v27 = vpack.c.bf16 %v1945_v13, %v1944_v28  ;;  %v1748_v25 = vsel %vm1739_vm3, %v1715_v8, %v4869_v43  ;;  %v1749_v23 = vsel %vm1739_vm3, %v1716_v6, %v4870_v1  ;;  %v4800_v31 = vunpack.i.h.bf16 %v6671_v48 }
 0x118   : > { %v5058_v53 = vpop.permute.xlu0 %5057  ;;  %v5055_v40 = vunpack.i.h.bf16 %v5053_v0  ;;  %v5054_v56 = vunpack.i.l.bf16 %v5053_v0  ;;  %v1781_v2 = vsel %vm1772_vm5, %v1748_v25, %v5049_v63  ;;  %v1782_v28 = vsel %vm1772_vm5, %v1749_v23, %v5050_v9  ;;  %v681_v9 = vld [vmem:[#allocation2 + $0x19a] sm:$0xff] }
 0x119   : > { %5342 = vrot.lane.b32.xlu1 %v5341_v49, %s6203_s18  ;;  %4636 = vmatmul.mubr.msk.bf16.gmra.mrb[4].mxu0 %vm2007_vm11, %v1973_v27  ;;  %v5060_v59 = vunpack.i.h.bf16 %v5058_v53  ;;  %v5059_v33 = vunpack.i.l.bf16 %v5058_v53  ;;  %v4799_v12 = vunpack.i.l.bf16 %v6671_v48 }
 0x11a   : > { %5347 = vrot.lane.b32.xlu0 %v6904_v35, %s6198_s20  ;;  %v6984_v35 = vpack.i.bf16 %v553_v3, %v552_v26 }
 0x11b   : > { %v6970_v11 = vpop.permute.xlu1 %5062  ;;  %v1815_v53 = vsel %vm1805_vm6, %v1782_v28, %v5060_v59  ;;  %v1719_v48 = vsel %vm277_vm0, %v6634_v30, %v4799_v12 }
 0x11c   : > { %v5068_v34 = vpop.permute.xlu0 %5067  ;;  %v5064_v13 = vunpack.i.l.bf16 %v6970_v11  ;;  %v5065_v26 = vunpack.i.h.bf16 %v6970_v11 }
 0x11d   : > { %5352 = vrot.lane.b32.xlu1 %v5351_v58, %s6198_s20  ;;  %v5070_v19 = vunpack.i.h.bf16 %v5068_v34  ;;  %v5069_v61 = vunpack.i.l.bf16 %v5068_v34 }
 0x11e   : > { %5357 = vrot.lane.b32.xlu0 %v6906_v22, %s6199_s23  ;;  %v1718_v22 = vsel %vm277_vm0, %v6616_v24, %v4795_v7  ;;  %v1750_v24 = vsel %vm1739_vm3, %v1717_v54, %v4874_v5 }
 0x11f   : > { %v5073_v14 = vpop.permute.xlu1 %5072  ;;  %v1751_v10 = vsel %vm1739_vm3, %v1718_v22, %v4875_v55  ;;  %v1783_v0 = vsel %vm1772_vm5, %v1750_v24, %v5054_v56  ;;  %v1848_v60 = vsel %vm1838_vm7, %v1815_v53, %v5070_v19  ;;  %v4884_v53 = vunpack.i.l.bf16 %v6747_v17 }
 0x120   : > { %v5078_v20 = vpop.permute.xlu0 %5077  ;;  %v1784_v27 = vsel %vm1772_vm5, %v1751_v10, %v5055_v40  ;;  %v5074_v3 = vunpack.i.l.bf16 %v5073_v14  ;;  %v5075_v42 = vunpack.i.h.bf16 %v5073_v14  ;;  %v1816_v37 = vsel %vm1805_vm6, %v1783_v0, %v5064_v13 }
 0x121   : > { %5362 = vrot.lane.b32.xlu1 %v6984_v35, %s6199_s23  ;;  %v5080_v29 = vunpack.i.h.bf16 %v5078_v20  ;;  %v5079_v45 = vunpack.i.l.bf16 %v5078_v20  ;;  %v682_v20 = vld [vmem:[#allocation2 + $0x1a2] sm:$0xff]  ;;  %v4804_v0 = vunpack.i.l.bf16 %v6676_v38 }
 0x122   : > { %5367 = vrot.lane.b32.xlu0 %v5341_v49, %s6200_s9  ;;  %v1814_v49 = vsel %vm1805_vm6, %v1781_v2, %v5059_v33  ;;  %v1849_v14 = vsel %vm1838_vm7, %v1816_v37, %v5074_v3  ;;  %v5401_v19 = vpack.i.bf16 %v682_v20, %v681_v9 }
 0x123   : > { %v5083_v21 = vpop.permute.xlu1 %5082  ;;  %v1847_v4 = vsel %vm1838_vm7, %v1814_v49, %v5069_v61  ;;  %v1881_v1 = vsel %vm1871_vm8, %v1848_v60, %v5080_v29  ;;  %v4885_v49 = vunpack.i.h.bf16 %v6747_v17  ;;  %v1721_v17 = vsel %vm277_vm0, %v6656_v36, %v4804_v0 }
 0x124   : > { %v5088_v57 = vpop.permute.xlu0 %5087  ;;  %v5084_v7 = vunpack.i.l.bf16 %v5083_v21  ;;  %v1880_v52 = vsel %vm1871_vm8, %v1847_v4, %v5079_v45  ;;  %v5085_v43 = vunpack.i.h.bf16 %v5083_v21  ;;  %v1754_v30 = vsel %vm1739_vm3, %v1721_v17, %v4884_v53 }
 0x125   : > { %5372 = vrot.lane.b32.xlu1 %v6986_v46, %s6200_s9  ;;  %v5090_v62 = vunpack.i.h.bf16 %v5088_v57  ;;  %v5089_v39 = vunpack.i.l.bf16 %v5088_v57  ;;  %v4815_v17 = vunpack.i.h.bf16 %v6684_v51 }
 0x126   : > { %5377 = vrot.lane.b32.xlu0 %v5351_v58, %s6201_s15  ;;  %v1817_v58 = vsel %vm1805_vm6, %v1784_v27, %v5065_v26  ;;  %v1882_v56 = vsel %vm1871_vm8, %v1849_v14, %v5084_v7  ;;  %v4879_v27 = vunpack.i.l.bf16 %v6742_v16 }
 0x127   : > { %v5093_v34 = vpop.permute.xlu1 %5092  ;;  %v1913_v8 = vsel %vm1904_vm9, %v1880_v52, %v5089_v39  ;;  %v1914_v22 = vsel %vm1904_vm9, %v1881_v1, %v5090_v62  ;;  %v1850_v40 = vsel %vm1838_vm7, %v1817_v58, %v5075_v42  ;;  %v1720_v62 = vsel %vm277_vm0, %v6636_v32, %v4800_v31 }
 0x128   : > { %v5098_v11 = vpop.permute.xlu0 %5097  ;;  %v5095_v55 = vunpack.i.h.bf16 %v5093_v34  ;;  %v5094_v5 = vunpack.i.l.bf16 %v5093_v34  ;;  %v1883_v54 = vsel %vm1871_vm8, %v1850_v40, %v5085_v43  ;;  %v1752_v34 = vsel %vm1739_vm3, %v1719_v48, %v4879_v27 }
 0x129   : > { %v5100_v63 = vunpack.i.h.bf16 %v5098_v11  ;;  %v5099_v6 = vunpack.i.l.bf16 %v5098_v11  ;;  %5382 = vrot.lane.b32.xlu1 %v5381_v15, %s6201_s15 }
 0x12a   : > { %5387 = vrot.lane.b32.xlu0 %v6984_v35, %s6202_s16  ;;  %v1915_v2 = vsel %vm1904_vm9, %v1882_v56, %v5094_v5  ;;  %v1916_v35 = vsel %vm1904_vm9, %v1883_v54, %v5095_v55 }
 0x12b   : > { %v1946_v59 = vsel %vm1937_vm10, %v1913_v8, %v5099_v6  ;;  %v1947_v15 = vsel %vm1937_vm10, %v1914_v22, %v5100_v63  ;;  %v5103_v33 = vpop.permute.xlu1 %5102 }
 0x12c   : > { %v5105_v25 = vunpack.i.h.bf16 %v5103_v33  ;;  %v5104_v23 = vunpack.i.l.bf16 %v5103_v33  ;;  %v5108_v10 = vpop.permute.xlu0 %5107  ;;  %v1974_v24 = vpack.c.bf16 %v1947_v15, %v1946_v59 }
 0x12d   : > { %5392 = vrot.lane.b32.xlu1 %v5391_v44, %s6202_s16  ;;  %v4805_v44 = vunpack.i.h.bf16 %v6676_v38  ;;  %v5109_v26 = vunpack.i.l.bf16 %v5108_v10  ;;  %v5110_v38 = vunpack.i.h.bf16 %v5108_v10 }
 0x12e   : > { %v1948_v61 = vsel %vm1937_vm10, %v1915_v2, %v5104_v23  ;;  %v1949_v21 = vsel %vm1937_vm10, %v1916_v35, %v5105_v25  ;;  %5397 = vrot.lane.b32.xlu0 %v6986_v46, %s6203_s18  ;;  %4639 = vmatprep.mubr.msk.bf16.mxu0 %vm2007_vm11, %v1974_v24  ;;  %v4880_v46 = vunpack.i.h.bf16 %v6742_v16 }
 0x12f   : > { %v5113_v28 = vpop.permute.xlu1 %5112  ;;  %v1975_v13 = vpack.c.bf16 %v1949_v21, %v1948_v61  ;;  %v1722_v39 = vsel %vm277_vm0, %v6658_v41, %v4805_v44  ;;  %v1785_v52 = vsel %vm1772_vm5, %v1752_v34, %v5109_v26  ;;  %v4814_v34 = vunpack.i.l.bf16 %v6684_v51 }
 0x130   : > { %v5118_v29 = vpop.permute.xlu0 %5117  ;;  %v5115_v60 = vunpack.i.h.bf16 %v5113_v28  ;;  %v5114_v42 = vunpack.i.l.bf16 %v5113_v28  ;;  %v1753_v37 = vsel %vm1739_vm3, %v1720_v62, %v4880_v46  ;;  %v1755_v32 = vsel %vm1739_vm3, %v1722_v39, %v4885_v49 }
 0x131   : > { %5402 = vrot.lane.b32.xlu1 %v5401_v19, %s6203_s18  ;;  %4640 = vmatmul.mubr.msk.bf16.gmra.mrb[8].mxu0 %vm2007_vm11, %v1975_v13  ;;  %v5120_v16 = vunpack.i.h.bf16 %v5118_v29  ;;  %v5119_v7 = vunpack.i.l.bf16 %v5118_v29  ;;  %v1786_v11 = vsel %vm1772_vm5, %v1753_v37, %v5110_v38  ;;  %v4889_v37 = vunpack.i.l.bf16 %v6749_v18 }
 0x132   : > { %v1787_v36 = vsel %vm1772_vm5, %v1754_v30, %v5114_v42  ;;  %v1788_v58 = vsel %vm1772_vm5, %v1755_v32, %v5115_v60  ;;  %v4809_v42 = vunpack.i.l.bf16 %v6678_v50  ;;  %v4890_v30 = vunpack.i.h.bf16 %v6749_v18 }
 0x133   : > { %v5123_v45 = vpop.permute.xlu1 %5122  ;;  %v1818_v14 = vsel %vm1805_vm6, %v1785_v52, %v5119_v7  ;;  %v1819_v8 = vsel %vm1805_vm6, %v1786_v11, %v5120_v16  ;;  %v4810_v7 = vunpack.i.h.bf16 %v6678_v50  ;;  %v4895_v52 = vunpack.i.h.bf16 %v6754_v47 }
 0x134   : > { %v5128_v57 = vpop.permute.xlu0 %5127  ;;  %v5124_v55 = vunpack.i.l.bf16 %v5123_v45  ;;  %v5125_v22 = vunpack.i.h.bf16 %v5123_v45 }
 0x135   : > { %v5130_v41 = vunpack.i.h.bf16 %v5128_v57  ;;  %v5129_v1 = vunpack.i.l.bf16 %v5128_v57 }
 0x136   : > { %v1820_v25 = vsel %vm1805_vm6, %v1787_v36, %v5124_v55  ;;  %v1821_v28 = vsel %vm1805_vm6, %v1788_v58, %v5125_v22  ;;  %v8314_v58 = vld [vmem:[#allocation15_spill] sm:$0xff] }
 0x137   : > { %v5133_v3 = vpop.permute.xlu1 %5132  ;;  %v1851_v56 = vsel %vm1838_vm7, %v1818_v14, %v5129_v1  ;;  %v1852_v59 = vsel %vm1838_vm7, %v1819_v8, %v5130_v41  ;;  %v4894_v41 = vunpack.i.l.bf16 %v6754_v47  ;;  %v1725_v18 = vsel %vm277_vm0, %v8314_v58, %v4814_v34 }
 0x138   : > { %v5138_v4 = vpop.permute.xlu0 %5137  ;;  %v5134_v9 = vunpack.i.l.bf16 %v5133_v3  ;;  %v5135_v15 = vunpack.i.h.bf16 %v5133_v3 }
 0x139   : > { %v5140_v5 = vunpack.i.h.bf16 %v5138_v4  ;;  %v5139_v63 = vunpack.i.l.bf16 %v5138_v4 }
 0x13a   : > { %v1853_v13 = vsel %vm1838_vm7, %v1820_v25, %v5134_v9  ;;  %v1854_v31 = vsel %vm1838_vm7, %v1821_v28, %v5135_v15 }
 0x13b   : > { %v5143_v43 = vpop.permute.xlu1 %5142  ;;  %v1884_v23 = vsel %vm1871_vm8, %v1851_v56, %v5139_v63  ;;  %v1885_v10 = vsel %vm1871_vm8, %v1852_v59, %v5140_v5  ;;  %v8312_v63 = vld [vmem:[#allocation8_spill] sm:$0xff]  ;;  %v1758_v59 = vsel %vm1739_vm3, %v1725_v18, %v4894_v41 }
 0x13c   : > { %v5148_v6 = vpop.permute.xlu0 %5147  ;;  %v5144_v33 = vunpack.i.l.bf16 %v5143_v43  ;;  %v5145_v24 = vunpack.i.h.bf16 %v5143_v43  ;;  %v8311_v43 = vld [vmem:[#allocation7_spill] sm:$0xff]  ;;  %v1724_v51 = vsel %vm277_vm0, %v8312_v63, %v4810_v7 }
 0x13d   : > { %v5150_v20 = vunpack.i.h.bf16 %v5148_v6  ;;  %v5149_v40 = vunpack.i.l.bf16 %v5148_v6  ;;  %v1723_v11 = vsel %vm277_vm0, %v8311_v43, %v4809_v42  ;;  %v8313_v6 = vld [vmem:[#allocation16_spill] sm:$0xff] }
 0x13e   : > { %v1886_v12 = vsel %vm1871_vm8, %v1853_v13, %v5144_v33  ;;  %v1887_v46 = vsel %vm1871_vm8, %v1854_v31, %v5145_v24  ;;  %v1726_v36 = vsel %vm277_vm0, %v8313_v6, %v4815_v17  ;;  %v1756_v14 = vsel %vm1739_vm3, %v1723_v11, %v4889_v37 }
 0x13f   : > { %v5153_v54 = vpop.permute.xlu1 %5152  ;;  %v1917_v29 = vsel %vm1904_vm9, %v1884_v23, %v5149_v40  ;;  %v1918_v45 = vsel %vm1904_vm9, %v1885_v10, %v5150_v20  ;;  %v1757_v40 = vsel %vm1739_vm3, %v1724_v51, %v4890_v30  ;;  %v1759_v56 = vsel %vm1739_vm3, %v1726_v36, %v4895_v52  ;;  %v2373_v52 = vld [vmem:[#allocation3 + $0x1] sm:$0xff] }
 0x140   : > { %v5158_v2 = vpop.permute.xlu0 %5157  ;;  %v5155_v35 = vunpack.i.h.bf16 %v5153_v54  ;;  %v5154_v19 = vunpack.i.l.bf16 %v5153_v54  ;;  %v2405_v51 = vld [vmem:[#allocation3 + $0x2] sm:$0xff] }
 0x141   : > { %v5160_v61 = vunpack.i.h.bf16 %v5158_v2  ;;  %v5159_v21 = vunpack.i.l.bf16 %v5158_v2 }
 0x142   : > { %v1919_v3 = vsel %vm1904_vm9, %v1886_v12, %v5154_v19  ;;  %v1920_v62 = vsel %vm1904_vm9, %v1887_v46, %v5155_v35 }
 0x143   : > { %v1950_v44 = vsel %vm1937_vm10, %v1917_v29, %v5159_v21  ;;  %v1951_v57 = vsel %vm1937_vm10, %v1918_v45, %v5160_v61  ;;  %v5163_v0 = vpop.permute.xlu1 %5162  ;;  %v8315_v61 = vmov 0.0  }
 0x144   : > { %v5165_v27 = vunpack.i.h.bf16 %v5163_v0  ;;  %v5164_v49 = vunpack.i.l.bf16 %v5163_v0  ;;  %v5168_v53 = vpop.permute.xlu0 %5167  ;;  %v1976_v26 = vpack.c.bf16 %v1951_v57, %v1950_v44  ;;  %2289 = vst.msk [vmem:[#allocation3 + $0x10] sm:$0x3] %vm2288_vm12, %v8315_v61  ;;  %2293 = vst.msk [vmem:[#allocation3 + $0x1a8] sm:$0x3] %vm2288_vm12, %v8315_v61 }
 0x145   : > { %v5169_v1 = vunpack.i.l.bf16 %v5168_v53  ;;  %v5170_v55 = vunpack.i.h.bf16 %v5168_v53  ;;  %2313 = vst.msk [vmem:[#allocation3 + $0x11] sm:$0x1] %vm2294_vm13, %v8315_v61  ;;  %2295 = vst.msk [vmem:[#allocation3] sm:$0x1] %vm2294_vm13, %v8315_v61 }
 0x146   : > { %v1952_v48 = vsel %vm1937_vm10, %v1919_v3, %v5164_v49  ;;  %v1953_v39 = vsel %vm1937_vm10, %v1920_v62, %v5165_v27  ;;  %4643 = vmatprep.mubr.msk.bf16.mxu0 %vm2007_vm11, %v1976_v26  ;;  %2296 = vst.msk [vmem:[#allocation3 + $0x18] sm:$0x1] %vm2294_vm13, %v8315_v61  ;;  %2297 = vst.msk [vmem:[#allocation3 + $0x30] sm:$0x1] %vm2294_vm13, %v8315_v61 }
 0x147   : > { %v5173_v38 = vpop.permute.xlu1 %5172  ;;  %v1977_v4 = vpack.c.bf16 %v1953_v39, %v1952_v48  ;;  %v1789_v15 = vsel %vm1772_vm5, %v1756_v14, %v5169_v1  ;;  %v1790_v33 = vsel %vm1772_vm5, %v1757_v40, %v5170_v55  ;;  %2298 = vst.msk [vmem:[#allocation3 + $0x48] sm:$0x1] %vm2294_vm13, %v8315_v61  ;;  %2299 = vst.msk [vmem:[#allocation3 + $0x60] sm:$0x1] %vm2294_vm13, %v8315_v61 }
 0x148   : > { %v5178_v60 = vpop.permute.xlu0 %5177  ;;  %v5175_v8 = vunpack.i.h.bf16 %v5173_v38  ;;  %v5174_v22 = vunpack.i.l.bf16 %v5173_v38  ;;  %2300 = vst.msk [vmem:[#allocation3 + $0x78] sm:$0x1] %vm2294_vm13, %v8315_v61  ;;  %2301 = vst.msk [vmem:[#allocation3 + $0x90] sm:$0x1] %vm2294_vm13, %v8315_v61 }
 0x149   : > { %4644 = vmatmul.mubr.msk.bf16.gmra.mrb[12].mxu0 %vm2007_vm11, %v1977_v4  ;;  %v5179_v5 = vunpack.i.l.bf16 %v5178_v60  ;;  %v5180_v9 = vunpack.i.h.bf16 %v5178_v60  ;;  %2302 = vst.msk [vmem:[#allocation3 + $0xa8] sm:$0x1] %vm2294_vm13, %v8315_v61  ;;  %2303 = vst.msk [vmem:[#allocation3 + $0xc0] sm:$0x1] %vm2294_vm13, %v8315_v61 }
 0x14a   : > { %v1791_v21 = vsel %vm1772_vm5, %v1758_v59, %v5174_v22  ;;  %v1792_v28 = vsel %vm1772_vm5, %v1759_v56, %v5175_v8  ;;  %2304 = vst.msk [vmem:[#allocation3 + $0xd8] sm:$0x1] %vm2294_vm13, %v8315_v61  ;;  %2305 = vst.msk [vmem:[#allocation3 + $0xf0] sm:$0x1] %vm2294_vm13, %v8315_v61  ;;  %v8317_v56 = vld [vmem:[#allocation10_spill] sm:$0xff] }
 0x14b   : > { %v5183_v16 = vpop.permute.xlu1 %5182  ;;  %v1822_v54 = vsel %vm1805_vm6, %v1789_v15, %v5179_v5  ;;  %v1823_v13 = vsel %vm1805_vm6, %v1790_v33, %v5180_v9  ;;  %2306 = vst.msk [vmem:[#allocation3 + $0x108] sm:$0x1] %vm2294_vm13, %v8315_v61  ;;  %2307 = vst.msk [vmem:[#allocation3 + $0x120] sm:$0x1] %vm2294_vm13, %v8315_v61  ;;  %v2374_v41 = vld [vmem:[#allocation3 + $0x9] sm:$0xff]  ;;  %v4825_v59 = vunpack.i.h.bf16 %v8317_v56  ;;  %v4824_v33 = vunpack.i.l.bf16 %v8317_v56 }
 0x14c   : > { %v5188_v32 = vpop.permute.xlu0 %5187  ;;  %v5185_v10 = vunpack.i.h.bf16 %v5183_v16  ;;  %v5184_v24 = vunpack.i.l.bf16 %v5183_v16  ;;  %2308 = vst.msk [vmem:[#allocation3 + $0x138] sm:$0x1] %vm2294_vm13, %v8315_v61  ;;  %2309 = vst.msk [vmem:[#allocation3 + $0x150] sm:$0x1] %vm2294_vm13, %v8315_v61  ;;  %v5406_v5 = vpack.i.bf16 %v2374_v41, %v2373_v52  ;;  %v2406_v14 = vld [vmem:[#allocation3 + $0xa] sm:$0xff]  ;;  %v8316_v9 = vld [vmem:[#allocation9_spill] sm:$0xff] }
 0x14d   : > { %v5189_v20 = vunpack.i.l.bf16 %v5188_v32  ;;  %v5190_v25 = vunpack.i.h.bf16 %v5188_v32  ;;  %2310 = vst.msk [vmem:[#allocation3 + $0x168] sm:$0x1] %vm2294_vm13, %v8315_v61  ;;  %2311 = vst.msk [vmem:[#allocation3 + $0x180] sm:$0x1] %vm2294_vm13, %v8315_v61  ;;  %v5411_v8 = vpack.i.bf16 %v2406_v14, %v2405_v51  ;;  %v4819_v40 = vunpack.i.l.bf16 %v8316_v9 }
 0x14e   : > { %v1824_v49 = vsel %vm1805_vm6, %v1791_v21, %v5184_v24  ;;  %v1825_v53 = vsel %vm1805_vm6, %v1792_v28, %v5185_v10  ;;  %2312 = vst.msk [vmem:[#allocation3 + $0x198] sm:$0x1] %vm2294_vm13, %v8315_v61  ;;  %2314 = vst.msk [vmem:[#allocation3 + $0x29] sm:$0x1] %vm2294_vm13, %v8315_v61  ;;  %5407 = vrot.lane.b32.xlu0 %v5406_v5, %s6197_s19  ;;  %v8319_v10 = vld [vmem:[#allocation18_spill] sm:$0xff] }
 0x14f   : > { %v7113_v50 = vpop.permute.xlu1 %5192  ;;  %v1855_v29 = vsel %vm1838_vm7, %v1822_v54, %v5189_v20  ;;  %v1856_v57 = vsel %vm1838_vm7, %v1823_v13, %v5190_v25  ;;  %2315 = vst.msk [vmem:[#allocation3 + $0x41] sm:$0x1] %vm2294_vm13, %v8315_v61  ;;  %2316 = vst.msk [vmem:[#allocation3 + $0x59] sm:$0x1] %vm2294_vm13, %v8315_v61  ;;  %v4820_v20 = vunpack.i.h.bf16 %v8316_v9  ;;  %v8318_v54 = vld [vmem:[#allocation17_spill] sm:$0xff]  ;;  %v4905_v24 = vunpack.i.h.bf16 %v8319_v10 }
 0x150   : > { %v5198_v47 = vpop.permute.xlu0 %5197  ;;  %v5195_v45 = vunpack.i.h.bf16 %v7113_v50  ;;  %v5194_v31 = vunpack.i.l.bf16 %v7113_v50  ;;  %2317 = vst.msk [vmem:[#allocation3 + $0x71] sm:$0x1] %vm2294_vm13, %v8315_v61  ;;  %2318 = vst.msk [vmem:[#allocation3 + $0x89] sm:$0x1] %vm2294_vm13, %v8315_v61  ;;  %v4900_v25 = vunpack.i.h.bf16 %v8318_v54  ;;  %v6119_v21 = vld [vmem:[#allocation2 + $0xf8] sm:$0xff]  ;;  %v6120_v13 = vld [vmem:[#allocation2 + $0xf0] sm:$0xff] }
 0x151   : > { %v5200_v2 = vunpack.i.h.bf16 %v5198_v47  ;;  %v5199_v35 = vunpack.i.l.bf16 %v5198_v47  ;;  %2319 = vst.msk [vmem:[#allocation3 + $0xa1] sm:$0x1] %vm2294_vm13, %v8315_v61  ;;  %2320 = vst.msk [vmem:[#allocation3 + $0xb9] sm:$0x1] %vm2294_vm13, %v8315_v61  ;;  %v1728_v28 = vsel %vm277_vm0, %v6119_v21, %v4820_v20 }
 0x152   : > { %2321 = vst.msk [vmem:[#allocation3 + $0xd1] sm:$0x1] %vm2294_vm13, %v8315_v61  ;;  %2322 = vst.msk [vmem:[#allocation3 + $0xe9] sm:$0x1] %vm2294_vm13, %v8315_v61  ;;  %v1857_v60 = vsel %vm1838_vm7, %v1824_v49, %v5194_v31  ;;  %v1858_v42 = vsel %vm1838_vm7, %v1825_v53, %v5195_v45  ;;  %5412 = vrot.lane.b32.xlu0 %v5411_v8, %s6199_s23  ;;  %v6121_v45 = vld [vmem:[#allocation2 + $0x110] sm:$0xff]  ;;  %v6122_v49 = vld [vmem:[#allocation2 + $0x108] sm:$0xff] }
 0x153   : > { %v7128_v23 = vpop.permute.xlu1 %5202  ;;  %v1888_v26 = vsel %vm1871_vm8, %v1855_v29, %v5199_v35  ;;  %v1889_v3 = vsel %vm1871_vm8, %v1856_v57, %v5200_v2  ;;  %2323 = vst.msk [vmem:[#allocation3 + $0x101] sm:$0x1] %vm2294_vm13, %v8315_v61  ;;  %2324 = vst.msk [vmem:[#allocation3 + $0x119] sm:$0x1] %vm2294_vm13, %v8315_v61  ;;  %v4904_v2 = vunpack.i.l.bf16 %v8319_v10  ;;  %v1727_v29 = vsel %vm277_vm0, %v6120_v13, %v4819_v40 }
 0x154   : > { %v7130_v19 = vpop.permute.xlu0 %5207  ;;  %v5205_v0 = vunpack.i.h.bf16 %v7128_v23  ;;  %v5204_v46 = vunpack.i.l.bf16 %v7128_v23  ;;  %2325 = vst.msk [vmem:[#allocation3 + $0x131] sm:$0x1] %vm2294_vm13, %v8315_v61  ;;  %2326 = vst.msk [vmem:[#allocation3 + $0x149] sm:$0x1] %vm2294_vm13, %v8315_v61  ;;  %v4899_v23 = vunpack.i.l.bf16 %v8318_v54  ;;  %v1730_v31 = vsel %vm277_vm0, %v6121_v45, %v4825_v59 }
 0x155   : > { %v5210_v12 = vunpack.i.h.bf16 %v7130_v19  ;;  %v5209_v44 = vunpack.i.l.bf16 %v7130_v19  ;;  %2327 = vst.msk [vmem:[#allocation3 + $0x161] sm:$0x1] %vm2294_vm13, %v8315_v61  ;;  %2328 = vst.msk [vmem:[#allocation3 + $0x179] sm:$0x1] %vm2294_vm13, %v8315_v61  ;;  %v1729_v53 = vsel %vm277_vm0, %v6122_v49, %v4824_v33 }
 0x156   : > { %2329 = vst.msk [vmem:[#allocation3 + $0x191] sm:$0x1] %vm2294_vm13, %v8315_v61  ;;  %2330 = vst.msk [vmem:[#allocation3 + $0x1a9] sm:$0x1] %vm2294_vm13, %v8315_v61  ;;  %v1890_v17 = vsel %vm1871_vm8, %v1857_v60, %v5204_v46  ;;  %v1891_v34 = vsel %vm1871_vm8, %v1858_v42, %v5205_v0 }
 0x157   : > { %v7145_v27 = vpop.permute.xlu1 %5212  ;;  %v1921_v16 = vsel %vm1904_vm9, %v1888_v26, %v5209_v44  ;;  %v1922_v7 = vsel %vm1904_vm9, %v1889_v3, %v5210_v12  ;;  %v1760_v26 = vsel %vm1739_vm3, %v1727_v29, %v4899_v23  ;;  %v1761_v3 = vsel %vm1739_vm3, %v1728_v28, %v4900_v25 }
 0x158   : > { %v5218_v62 = vpop.permute.xlu0 %5217  ;;  %v5215_v48 = vunpack.i.h.bf16 %v7145_v27  ;;  %v5214_v39 = vunpack.i.l.bf16 %v7145_v27 }
 0x159   : > { %v5220_v38 = vunpack.i.h.bf16 %v5218_v62  ;;  %v5219_v4 = vunpack.i.l.bf16 %v5218_v62  ;;  %v1763_v62 = vsel %vm1739_vm3, %v1730_v31, %v4905_v24 }
 0x15a   : > { %v1923_v50 = vsel %vm1904_vm9, %v1890_v17, %v5214_v39  ;;  %v1924_v63 = vsel %vm1904_vm9, %v1891_v34, %v5215_v48  ;;  %v1762_v48 = vsel %vm1739_vm3, %v1729_v53, %v4904_v2 }
 0x15b   : > { %v1954_v37 = vsel %vm1937_vm10, %v1921_v16, %v5219_v4  ;;  %v1955_v32 = vsel %vm1937_vm10, %v1922_v7, %v5220_v38  ;;  %v5223_v30 = vpop.permute.xlu1 %5222 }
 0x15c   : > { %v5225_v1 = vunpack.i.h.bf16 %v5223_v30  ;;  %v5224_v43 = vunpack.i.l.bf16 %v5223_v30  ;;  %v5228_v11 = vpop.permute.xlu0 %5227  ;;  %v1978_v55 = vpack.c.bf16 %v1955_v32, %v1954_v37 }
 0x15d   : > { %v5229_v35 = vunpack.i.l.bf16 %v5228_v11  ;;  %v5230_v12 = vunpack.i.h.bf16 %v5228_v11 }
 0x15e   : > { %v1956_v6 = vsel %vm1937_vm10, %v1923_v50, %v5224_v43  ;;  %v1957_v36 = vsel %vm1937_vm10, %v1924_v63, %v5225_v1  ;;  %4647 = vmatprep.mubr.msk.bf16.mxu0 %vm2007_vm11, %v1978_v55 }
 0x15f   : > { %v5233_v58 = vpop.permute.xlu1 %5232  ;;  %v1979_v18 = vpack.c.bf16 %v1957_v36, %v1956_v6  ;;  %v1793_v39 = vsel %vm1772_vm5, %v1760_v26, %v5229_v35  ;;  %v1794_v42 = vsel %vm1772_vm5, %v1761_v3, %v5230_v12  ;;  %v8322_v3 = vld [vmem:[#allocation19_spill] sm:$0xff] }
 0x160   : > { %v5238_v47 = vpop.permute.xlu0 %5237  ;;  %v5235_v57 = vunpack.i.h.bf16 %v5233_v58  ;;  %v5234_v0 = vunpack.i.l.bf16 %v5233_v58 }
 0x161   : > { %4648 = vmatmul.mubr.msk.bf16.gmra.mrb[16].mxu0 %vm2007_vm11, %v1979_v18  ;;  %v5240_v46 = vunpack.i.h.bf16 %v5238_v47  ;;  %v5239_v27 = vunpack.i.l.bf16 %v5238_v47 }
 0x162   : > { %v1795_v37 = vsel %vm1772_vm5, %v1762_v48, %v5234_v0  ;;  %v1796_v32 = vsel %vm1772_vm5, %v1763_v62, %v5235_v57  ;;  %v8320_v57 = vld [vmem:[#allocation11_spill] sm:$0xff]  ;;  %v4910_v62 = vunpack.i.h.bf16 %v8322_v3  ;;  %v4909_v48 = vunpack.i.l.bf16 %v8322_v3 }
 0x163   : > { %v7241_v22 = vpop.permute.xlu1 %5242  ;;  %v1826_v30 = vsel %vm1805_vm6, %v1793_v39, %v5239_v27  ;;  %v1827_v52 = vsel %vm1805_vm6, %v1794_v42, %v5240_v46  ;;  %v4830_v0 = vunpack.i.h.bf16 %v8320_v57  ;;  %v4829_v46 = vunpack.i.l.bf16 %v8320_v57  ;;  %v8321_v27 = vld [vmem:[#allocation12_spill] sm:$0xff] }
 0x164   : > { %v5248_v15 = vpop.permute.xlu0 %5247  ;;  %v5244_v16 = vunpack.i.l.bf16 %v7241_v22  ;;  %v5245_v41 = vunpack.i.h.bf16 %v7241_v22  ;;  %v4835_v49 = vunpack.i.h.bf16 %v8321_v27  ;;  %v4834_v26 = vunpack.i.l.bf16 %v8321_v27  ;;  %v8323_v39 = vld [vmem:[#allocation20_spill] sm:$0xff] }
 0x165   : > { %v5250_v38 = vunpack.i.h.bf16 %v5248_v15  ;;  %v5249_v4 = vunpack.i.l.bf16 %v5248_v15 }
 0x166   : > { %v1828_v6 = vsel %vm1805_vm6, %v1795_v37, %v5244_v16  ;;  %v1829_v20 = vsel %vm1805_vm6, %v1796_v32, %v5245_v41  ;;  %v6123_v16 = vld [vmem:[#allocation2 + $0x128] sm:$0xff]  ;;  %v6125_v37 = vld [vmem:[#allocation2 + $0x140] sm:$0xff] }
 0x167   : > { %v5253_v19 = vpop.permute.xlu1 %5252  ;;  %v1859_v55 = vsel %vm1838_vm7, %v1826_v30, %v5249_v4  ;;  %v1860_v5 = vsel %vm1838_vm7, %v1827_v52, %v5250_v38  ;;  %v4915_v38 = vunpack.i.h.bf16 %v8323_v39  ;;  %v4914_v4 = vunpack.i.l.bf16 %v8323_v39 }
 0x168   : > { %v5258_v44 = vpop.permute.xlu0 %5257  ;;  %v5254_v1 = vunpack.i.l.bf16 %v5253_v19  ;;  %v5255_v50 = vunpack.i.h.bf16 %v5253_v19  ;;  %v1734_v32 = vsel %vm277_vm0, %v6125_v37, %v4835_v49 }
 0x169   : > { %v5260_v7 = vunpack.i.h.bf16 %v5258_v44  ;;  %v5259_v17 = vunpack.i.l.bf16 %v5258_v44 }
 0x16a   : > { %v1861_v40 = vsel %vm1838_vm7, %v1828_v6, %v5254_v1  ;;  %v1862_v15 = vsel %vm1838_vm7, %v1829_v20, %v5255_v50 }
 0x16b   : > { %v5263_v60 = vpop.permute.xlu1 %5262  ;;  %v1892_v36 = vsel %vm1871_vm8, %v1859_v55, %v5259_v17  ;;  %v1893_v58 = vsel %vm1871_vm8, %v1860_v5, %v5260_v7  ;;  %v1732_v7 = vsel %vm277_vm0, %v6123_v16, %v4830_v0  ;;  %v6124_v17 = vld [vmem:[#allocation2 + $0x120] sm:$0xff]  ;;  %v6126_v55 = vld [vmem:[#allocation2 + $0x138] sm:$0xff] }
 0x16c   : > { %v5268_v34 = vpop.permute.xlu0 %5267  ;;  %v5264_v63 = vunpack.i.l.bf16 %v5263_v60  ;;  %v5265_v18 = vunpack.i.h.bf16 %v5263_v60  ;;  %v1733_v5 = vsel %vm277_vm0, %v6126_v55, %v4834_v26 }
 0x16d   : > { %v5270_v43 = vunpack.i.h.bf16 %v5268_v34  ;;  %v5269_v11 = vunpack.i.l.bf16 %v5268_v34  ;;  %v1731_v34 = vsel %vm277_vm0, %v6124_v17, %v4829_v46  ;;  %v1766_v6 = vsel %vm1739_vm3, %v1733_v5, %v4914_v4 }
 0x16e   : > { %v1894_v33 = vsel %vm1871_vm8, %v1861_v40, %v5264_v63  ;;  %v1895_v10 = vsel %vm1871_vm8, %v1862_v15, %v5265_v18  ;;  %v1764_v50 = vsel %vm1739_vm3, %v1731_v34, %v4909_v48  ;;  %v1765_v63 = vsel %vm1739_vm3, %v1732_v7, %v4910_v62 }
 0x16f   : > { %v5273_v51 = vpop.permute.xlu1 %5272  ;;  %v1925_v56 = vsel %vm1904_vm9, %v1892_v36, %v5269_v11  ;;  %v1926_v59 = vsel %vm1904_vm9, %v1893_v58, %v5270_v43 }
 0x170   : > { %v5278_v14 = vpop.permute.xlu0 %5277  ;;  %v5275_v47 = vunpack.i.h.bf16 %v5273_v51  ;;  %v5274_v8 = vunpack.i.l.bf16 %v5273_v51  ;;  %v1767_v51 = vsel %vm1739_vm3, %v1734_v32, %v4915_v38 }
 0x171   : > { %v5280_v22 = vunpack.i.h.bf16 %v5278_v14  ;;  %v5279_v9 = vunpack.i.l.bf16 %v5278_v14 }
 0x172   : > { %v1927_v21 = vsel %vm1904_vm9, %v1894_v33, %v5274_v8  ;;  %v1928_v28 = vsel %vm1904_vm9, %v1895_v10, %v5275_v47 }
 0x173   : > { %v1958_v54 = vsel %vm1937_vm10, %v1925_v56, %v5279_v9  ;;  %v1959_v25 = vsel %vm1937_vm10, %v1926_v59, %v5280_v22  ;;  %v5283_v23 = vpop.permute.xlu1 %5282 }
 0x174   : > { %v5285_v24 = vunpack.i.h.bf16 %v5283_v23  ;;  %v5284_v2 = vunpack.i.l.bf16 %v5283_v23  ;;  %v5288_v35 = vpop.permute.xlu0 %5287  ;;  %v1980_v19 = vpack.c.bf16 %v1959_v25, %v1958_v54 }
 0x175   : > { %v5289_v60 = vunpack.i.l.bf16 %v5288_v35  ;;  %v5290_v30 = vunpack.i.h.bf16 %v5288_v35 }
 0x176   : > { %v1960_v13 = vsel %vm1937_vm10, %v1927_v21, %v5284_v2  ;;  %v1961_v29 = vsel %vm1937_vm10, %v1928_v28, %v5285_v24  ;;  %4651 = vmatprep.mubr.msk.bf16.mxu0 %vm2007_vm11, %v1980_v19 }
 0x177   : > { %v5293_v45 = vpop.permute.xlu1 %5292  ;;  %v1981_v31 = vpack.c.bf16 %v1961_v29, %v1960_v13  ;;  %v1797_v36 = vsel %vm1772_vm5, %v1764_v50, %v5289_v60  ;;  %v1798_v47 = vsel %vm1772_vm5, %v1765_v63, %v5290_v30  ;;  %v8326_v63 = vld [vmem:[#allocation21_spill] sm:$0xff] }
 0x178   : > { %v5298_v12 = vpop.permute.xlu0 %5297  ;;  %v5295_v41 = vunpack.i.h.bf16 %v5293_v45  ;;  %v5294_v1 = vunpack.i.l.bf16 %v5293_v45 }
 0x179   : > { %4652 = vmatmul.mubr.msk.bf16.gmra.mrb[20].mxu0 %vm2007_vm11, %v1981_v31  ;;  %v5300_v43 = vunpack.i.h.bf16 %v5298_v12  ;;  %v5299_v11 = vunpack.i.l.bf16 %v5298_v12 }
 0x17a   : > { %v1799_v40 = vsel %vm1772_vm5, %v1766_v6, %v5294_v1  ;;  %v1800_v56 = vsel %vm1772_vm5, %v1767_v51, %v5295_v41  ;;  %v8324_v41 = vld [vmem:[#allocation13_spill] sm:$0xff]  ;;  %v4920_v51 = vunpack.i.h.bf16 %v8326_v63  ;;  %v4919_v6 = vunpack.i.l.bf16 %v8326_v63 }
 0x17b   : > { %v7287_v44 = vpop.permute.xlu1 %5302  ;;  %v1830_v59 = vsel %vm1805_vm6, %v1797_v36, %v5299_v11  ;;  %v1831_v15 = vsel %vm1805_vm6, %v1798_v47, %v5300_v43  ;;  %v4840_v1 = vunpack.i.h.bf16 %v8324_v41  ;;  %v4839_v43 = vunpack.i.l.bf16 %v8324_v41  ;;  %v8325_v11 = vld [vmem:[#allocation14_spill] sm:$0xff] }
 0x17c   : > { %v5308_v53 = vpop.permute.xlu0 %5307  ;;  %v5304_v8 = vunpack.i.l.bf16 %v7287_v44  ;;  %v5305_v33 = vunpack.i.h.bf16 %v7287_v44  ;;  %v4845_v55 = vunpack.i.h.bf16 %v8325_v11  ;;  %v4844_v50 = vunpack.i.l.bf16 %v8325_v11  ;;  %v8327_v36 = vld [vmem:[#allocation22_spill] sm:$0xff] }
 0x17d   : > { %v5310_v58 = vunpack.i.h.bf16 %v5308_v53  ;;  %v5309_v18 = vunpack.i.l.bf16 %v5308_v53 }
 0x17e   : > { %v1832_v21 = vsel %vm1805_vm6, %v1799_v40, %v5304_v8  ;;  %v1833_v0 = vsel %vm1805_vm6, %v1800_v56, %v5305_v33  ;;  %v6127_v8 = vld [vmem:[#allocation2 + $0x158] sm:$0xff]  ;;  %v6129_v40 = vld [vmem:[#allocation2 + $0x170] sm:$0xff] }
 0x17f   : > { %v5313_v42 = vpop.permute.xlu1 %5312  ;;  %v1863_v10 = vsel %vm1838_vm7, %v1830_v59, %v5309_v18  ;;  %v1864_v24 = vsel %vm1838_vm7, %v1831_v15, %v5310_v58  ;;  %v4925_v58 = vunpack.i.h.bf16 %v8327_v36  ;;  %v4924_v18 = vunpack.i.l.bf16 %v8327_v36 }
 0x180   : > { %v5318_v52 = vpop.permute.xlu0 %5317  ;;  %v5314_v54 = vunpack.i.l.bf16 %v5313_v42  ;;  %v5315_v2 = vunpack.i.h.bf16 %v5313_v42  ;;  %v1738_v56 = vsel %vm277_vm0, %v6129_v40, %v4845_v55  ;;  %v7382_v40 = vld [vmem:[%s8269_s2] ss:$0 sm:$0xff] }
 0x181   : > { %v5320_v22 = vunpack.i.h.bf16 %v5318_v52  ;;  %v5319_v9 = vunpack.i.l.bf16 %v5318_v52 }
 0x182   : > { %v1865_v46 = vsel %vm1838_vm7, %v1832_v21, %v5314_v54  ;;  %v1866_v53 = vsel %vm1838_vm7, %v1833_v0, %v5315_v2 }
 0x183   : > { %v5323_v14 = vpop.permute.xlu1 %5322  ;;  %v1896_v28 = vsel %vm1871_vm8, %v1863_v10, %v5319_v9  ;;  %v1897_v13 = vsel %vm1871_vm8, %v1864_v24, %v5320_v22  ;;  %v1736_v22 = vsel %vm277_vm0, %v6127_v8, %v4840_v1  ;;  %v6128_v9 = vld [vmem:[#allocation2 + $0x150] sm:$0xff]  ;;  %v6130_v10 = vld [vmem:[#allocation2 + $0x168] sm:$0xff] }
 0x184   : > { %v5328_v20 = vpop.permute.xlu0 %5327  ;;  %v5324_v35 = vunpack.i.l.bf16 %v5323_v14  ;;  %v5325_v29 = vunpack.i.h.bf16 %v5323_v14  ;;  %v1737_v24 = vsel %vm277_vm0, %v6130_v10, %v4844_v50 }
 0x185   : > { %v5330_v25 = vunpack.i.h.bf16 %v5328_v20  ;;  %v5329_v23 = vunpack.i.l.bf16 %v5328_v20  ;;  %v1735_v20 = vsel %vm277_vm0, %v6128_v9, %v4839_v43  ;;  %v1770_v21 = vsel %vm1739_vm3, %v1737_v24, %v4924_v18 }
 0x186   : > { %v1898_v26 = vsel %vm1871_vm8, %v1865_v46, %v5324_v35  ;;  %v1899_v39 = vsel %vm1871_vm8, %v1866_v53, %v5325_v29  ;;  %v1768_v2 = vsel %vm1739_vm3, %v1735_v20, %v4919_v6  ;;  %v1769_v35 = vsel %vm1739_vm3, %v1736_v22, %v4920_v51 }
 0x187   : > { %v5333_v19 = vpop.permute.xlu1 %5332  ;;  %v1929_v27 = vsel %vm1904_vm9, %v1896_v28, %v5329_v23  ;;  %v1930_v49 = vsel %vm1904_vm9, %v1897_v13, %v5330_v25  ;;  %vm3815_vm0 = vcmask 392192  }
 0x188   : > { %v5338_v45 = vpop.permute.xlu0 %5337  ;;  %v5335_v31 = vunpack.i.h.bf16 %v5333_v19  ;;  %v5334_v12 = vunpack.i.l.bf16 %v5333_v19  ;;  %v1771_v19 = vsel %vm1739_vm3, %v1738_v56, %v4925_v58 }
 0x189   : > { %v5340_v44 = vunpack.i.h.bf16 %v5338_v45  ;;  %v5339_v57 = vunpack.i.l.bf16 %v5338_v45 }
 0x18a   : > { %v1931_v16 = vsel %vm1904_vm9, %v1898_v26, %v5334_v12  ;;  %v1932_v7 = vsel %vm1904_vm9, %v1899_v39, %v5335_v31 }
 0x18b   : > { %v1962_v3 = vsel %vm1937_vm10, %v1929_v27, %v5339_v57  ;;  %v1963_v62 = vsel %vm1937_vm10, %v1930_v49, %v5340_v44  ;;  %v5343_v48 = vpop.permute.xlu1 %5342 }
 0x18c   : > { %v5345_v38 = vunpack.i.h.bf16 %v5343_v48  ;;  %v5344_v4 = vunpack.i.l.bf16 %v5343_v48  ;;  %v5348_v60 = vpop.permute.xlu0 %5347  ;;  %v1982_v42 = vpack.c.bf16 %v1963_v62, %v1962_v3 }
 0x18d   : > { %v5349_v14 = vunpack.i.l.bf16 %v5348_v60  ;;  %v5350_v59 = vunpack.i.h.bf16 %v5348_v60 }
 0x18e   : > { %v1964_v17 = vsel %vm1937_vm10, %v1931_v16, %v5344_v4  ;;  %v1965_v34 = vsel %vm1937_vm10, %v1932_v7, %v5345_v38  ;;  %4655 = vmatprep.mubr.msk.bf16.mxu0 %vm2007_vm11, %v1982_v42 }
 0x18f   : > { %v5353_v37 = vpop.permute.xlu1 %5352  ;;  %v1983_v32 = vpack.c.bf16 %v1965_v34, %v1964_v17  ;;  %v1801_v28 = vsel %vm1772_vm5, %v1768_v2, %v5349_v14  ;;  %v1802_v31 = vsel %vm1772_vm5, %v1769_v35, %v5350_v59 }
 0x190   : > { %v5358_v30 = vpop.permute.xlu0 %5357  ;;  %v5355_v33 = vunpack.i.h.bf16 %v5353_v37  ;;  %v5354_v54 = vunpack.i.l.bf16 %v5353_v37 }
 0x191   : > { %4656 = vmatmul.mubr.msk.bf16.gmra.mrb[24].mxu0 %vm2007_vm11, %v1983_v32  ;;  %v5360_v25 = vunpack.i.h.bf16 %v5358_v30  ;;  %v5359_v23 = vunpack.i.l.bf16 %v5358_v30 }
 0x192   : > { %v1803_v46 = vsel %vm1772_vm5, %v1770_v21, %v5354_v54  ;;  %v1804_v27 = vsel %vm1772_vm5, %v1771_v19, %v5355_v33 }
 0x193   : > { %v7333_v52 = vpop.permute.xlu1 %5362  ;;  %v1834_v49 = vsel %vm1805_vm6, %v1801_v28, %v5359_v23  ;;  %v1835_v53 = vsel %vm1805_vm6, %v1802_v31, %v5360_v25 }
 0x194   : > { %v5368_v5 = vpop.permute.xlu0 %5367  ;;  %v5364_v12 = vunpack.i.l.bf16 %v7333_v52  ;;  %v5365_v26 = vunpack.i.h.bf16 %v7333_v52 }
 0x195   : > { %v5370_v13 = vunpack.i.h.bf16 %v5368_v5  ;;  %v5369_v29 = vunpack.i.l.bf16 %v5368_v5 }
 0x196   : > { %v1836_v16 = vsel %vm1805_vm6, %v1803_v46, %v5364_v12  ;;  %v1837_v1 = vsel %vm1805_vm6, %v1804_v27, %v5365_v26 }
 0x197   : > { %v5373_v47 = vpop.permute.xlu1 %5372  ;;  %v1867_v39 = vsel %vm1838_vm7, %v1834_v49, %v5369_v29  ;;  %v1868_v38 = vsel %vm1838_vm7, %v1835_v53, %v5370_v13 }
 0x198   : > { %v5378_v15 = vpop.permute.xlu0 %5377  ;;  %v5374_v3 = vunpack.i.l.bf16 %v5373_v47  ;;  %v5375_v4 = vunpack.i.h.bf16 %v5373_v47 }
 0x199   : > { %v5380_v44 = vunpack.i.h.bf16 %v5378_v15  ;;  %v5379_v57 = vunpack.i.l.bf16 %v5378_v15 }
 0x19a   : > { %v1869_v43 = vsel %vm1838_vm7, %v1836_v16, %v5374_v3  ;;  %v1870_v5 = vsel %vm1838_vm7, %v1837_v1, %v5375_v4 }
 0x19b   : > { %v5383_v45 = vpop.permute.xlu1 %5382  ;;  %v1900_v7 = vsel %vm1871_vm8, %v1867_v39, %v5379_v57  ;;  %v1901_v17 = vsel %vm1871_vm8, %v1868_v38, %v5380_v44 }
 0x19c   : > { %v5388_v0 = vpop.permute.xlu0 %5387  ;;  %v5384_v60 = vunpack.i.l.bf16 %v5383_v45  ;;  %v5385_v34 = vunpack.i.h.bf16 %v5383_v45 }
 0x19d   : > { %v5390_v62 = vunpack.i.h.bf16 %v5388_v0  ;;  %v5389_v48 = vunpack.i.l.bf16 %v5388_v0 }
 0x19e   : > { %v1902_v50 = vsel %vm1871_vm8, %v1869_v43, %v5384_v60  ;;  %v1903_v36 = vsel %vm1871_vm8, %v1870_v5, %v5385_v34 }
 0x19f   : > { %v5393_v42 = vpop.permute.xlu1 %5392  ;;  %v1933_v11 = vsel %vm1904_vm9, %v1900_v7, %v5389_v48  ;;  %v1934_v55 = vsel %vm1904_vm9, %v1901_v17, %v5390_v62 }
 0x1a0   : > { %v5398_v37 = vpop.permute.xlu0 %5397  ;;  %v5395_v32 = vunpack.i.h.bf16 %v5393_v42  ;;  %v5394_v30 = vunpack.i.l.bf16 %v5393_v42 }
 0x1a1   : > { %v5400_v52 = vunpack.i.h.bf16 %v5398_v37  ;;  %v5399_v41 = vunpack.i.l.bf16 %v5398_v37 }
 0x1a2   : > { %v1935_v47 = vsel %vm1904_vm9, %v1902_v50, %v5394_v30  ;;  %v1936_v8 = vsel %vm1904_vm9, %v1903_v36, %v5395_v32  ;;  %v6049_v30 = vld [vmem:[%s8270_s3] sm:$0xff]   ;;  %v6051_v50 = vld [vmem:[%s8270_s3 + $0x10] sm:$0xff]   ;;  %v6052_v36 = vld [vmem:[%s8270_s3 + $0x18] sm:$0xff]  }
 0x1a3   : > { %v1966_v63 = vsel %vm1937_vm10, %v1933_v11, %v5399_v41  ;;  %v1967_v51 = vsel %vm1937_vm10, %v1934_v55, %v5400_v52  ;;  %v5403_v6 = vpop.permute.xlu1 %5402  ;;  %4663 = vmatprep.subr.bf16.mxu1 %v6049_v30  ;;  %v6050_v41 = vld [vmem:[%s8270_s3 + $0x8] sm:$0xff]  }
 0x1a4   : > { %v5405_v58 = vunpack.i.h.bf16 %v5403_v6  ;;  %v5404_v18 = vunpack.i.l.bf16 %v5403_v6  ;;  %v1984_v14 = vpack.c.bf16 %v1967_v51, %v1966_v63  ;;  %4664 = vmatpush3.bf16.msra.mxu1 %v6049_v30 }
 0x1a5   : > { %4665 = vmatprep.subr.bf16.mxu1 %v6050_v41 }
 0x1a6   : > { %v1968_v22 = vsel %vm1937_vm10, %v1935_v47, %v5404_v18  ;;  %v1969_v9 = vsel %vm1937_vm10, %v1936_v8, %v5405_v58  ;;  %4659 = vmatprep.mubr.msk.bf16.mxu0 %vm2007_vm11, %v1984_v14 }
 0x1a7   : > { %v1985_v20 = vpack.c.bf16 %v1969_v9, %v1968_v22  ;;  %v6053_v9 = vld [vmem:[%s8270_s3 + $0x20] ss:$0 sps:$4 sm:$0xff]  }
 0x1a8   : > { %4666 = vmatpush3.bf16.msra.mxu1 %v6050_v41 }
 0x1a9   : > { %4660 = vmatmul.mubr.msk.bf16.gmra.mrb[28].mxu0 %vm2007_vm11, %v1985_v20  ;;  %4667 = vmatprep.subr.bf16.mxu1 %v6051_v50 }
 0x1ac   : > { %4668 = vmatpush3.bf16.msra.mxu1 %v6051_v50 }
 0x1ad   : > { %4669 = vmatprep.subr.bf16.mxu1 %v6052_v36 }
 0x1b0   : > { %4670 = vmatpush3.bf16.msra.mxu1 %v6052_v36 }
 0x1b1   : > { %4712 = vmatprep.subr.msk.bf16.mxu1 %vm4012_vm14, %v6053_v9 }
 0x1d4   : > { %v4633_v56 = vpop.f32.mrb[0].mxu0 }
 0x1d5   : > { %v2103_v59 = vadd.f32 %v4633_v56, %v7382_v40  ;;  %v2094_v15 = vpop.f32.mrb[1].mxu0 }
 0x1d6   : > { %v2095_v33 = vadd.f32 %v7382_v40, %v2094_v15  ;;  %v4634_v54 = vpop.f32.mrb[2].mxu0 }
 0x1d7   : > { %v2223_v25 = vmax.f32 %v2103_v59, 0.0  ;;  %v2106_v23 = vadd.f32 %v4634_v54, %v7382_v40  ;;  %v2097_v10 = vpop.f32.mrb[3].mxu0 }
 0x1d8   : > { %v2221_v24 = vmax.f32 %v2095_v33, 0.0  ;;  %v2098_v2 = vadd.f32 %v7382_v40, %v2097_v10 }
 0x1d9   : > { %2256 = vst.msk [vmem:[#allocation3 + $0x31] sm:$0xff] %vm1739_vm3, %v2223_v25  ;;  %v2224_v35 = vmax.f32 %v2106_v23, 0.0  ;;  %v4014_v25 = vsel %vm4012_vm14, %v6053_v9, 0 }
 0x1da   : > { %2254 = vst.msk [vmem:[#allocation3 + $0x19] sm:$0xff] %vm1739_vm3, %v2221_v24  ;;  %v2222_v19 = vmax.f32 %v2098_v2, 0.0  ;;  %4672 = vmatpush3.bf16.msra.mxu1 %v4014_v25 }
 0x1db   : > { %2257 = vst.msk [vmem:[#allocation3 + $0x39] sm:$0xff] %vm1739_vm3, %v2224_v35 }
 0x1dc   : > { %2255 = vst.msk [vmem:[#allocation3 + $0x21] sm:$0xff] %vm1739_vm3, %v2222_v19 }
 0x1e0   : > { %v7392_v21 = vld [vmem:[#allocation3 + $0x30] sm:$0xff] }
 0x1e1   : > { %v2566_v45 = vld [vmem:[#allocation3 + $0x31] sm:$0xff]  ;;  %v2375_v7 = vld [vmem:[#allocation3 + $0x19] sm:$0xff] }
 0x1e2   : > { %v7394_v28 = vld [vmem:[#allocation3 + $0x38] sm:$0xff] }
 0x1e3   : > { %v5431_v13 = vpack.i.bf16 %v7394_v28, %v7392_v21  ;;  %v2567_v29 = vld [vmem:[#allocation3 + $0x39] sm:$0xff]  ;;  %v2376_v4 = vld [vmem:[#allocation3 + $0x21] sm:$0xff] }
 0x1e4   : > { %v5436_v31 = vpack.i.bf16 %v2567_v29, %v2566_v45  ;;  %v2598_v12 = vld [vmem:[#allocation3 + $0x32] sm:$0xff]  ;;  %v2599_v44 = vld [vmem:[#allocation3 + $0x3a] sm:$0xff]  ;;  %v5456_v34 = vpack.i.bf16 %v2376_v4, %v2375_v7  ;;  %v2408_v32 = vld [vmem:[#allocation3 + $0x22] sm:$0xff] }
 0x1e5   : > { %5432 = vrot.lane.b32.xlu0 %v5431_v13, %s6204_s21  ;;  %5417 = vrot.lane.b32.xlu1 %v5431_v13, %s6201_s15  ;;  %v5441_v57 = vpack.i.bf16 %v2599_v44, %v2598_v12  ;;  %v7408_v38 = vld [vmem:[#allocation3 + $0x20] sm:$0xff]  ;;  %v7414_v16 = vld [vmem:[#allocation3 + $0x18] sm:$0xff] }
 0x1e6   : > { %v5466_v17 = vpack.i.bf16 %v7408_v38, %v7414_v16  ;;  %v2407_v37 = vld [vmem:[#allocation3 + $0x1a] sm:$0xff] }
 0x1e7   : > { %v5461_v52 = vpack.i.bf16 %v2408_v32, %v2407_v37 }
 0x1e9   : > { %5437 = vrot.lane.b32.xlu0 %v5436_v31, %s6205_s22  ;;  %5422 = vrot.lane.b32.xlu1 %v5436_v31, %s6203_s18 }
 0x1ec   : > { %v4637_v0 = vpop.f32.mrb[4].mxu0 }
 0x1ed   : > { %v2119_v46 = vadd.f32 %v4637_v0, %v7382_v40  ;;  %5442 = vrot.lane.b32.xlu0 %v5441_v57, %s6206_s29  ;;  %5427 = vrot.lane.b32.xlu1 %v5441_v57, %s6207_s8  ;;  %v2110_v27 = vpop.f32.mrb[5].mxu0 }
 0x1ee   : > { %v2111_v49 = vadd.f32 %v7382_v40, %v2110_v27  ;;  %v4638_v53 = vpop.f32.mrb[6].mxu0 }
 0x1ef   : > { %v2227_v26 = vmax.f32 %v2119_v46, 0.0  ;;  %v2122_v3 = vadd.f32 %v4638_v53, %v7382_v40  ;;  %v2113_v62 = vpop.f32.mrb[7].mxu0 }
 0x1f0   : > { %v2225_v48 = vmax.f32 %v2111_v49, 0.0  ;;  %v2114_v39 = vadd.f32 %v7382_v40, %v2113_v62 }
 0x1f1   : > { %2260 = vst.msk [vmem:[#allocation3 + $0x61] sm:$0xff] %vm1739_vm3, %v2227_v26  ;;  %v2228_v60 = vmax.f32 %v2122_v3, 0.0  ;;  %5452 = vrot.lane.b32.xlu0 %v5441_v57, %s6199_s23  ;;  %5447 = vrot.lane.b32.xlu1 %v5436_v31, %s6197_s19 }
 0x1f2   : > { %2258 = vst.msk [vmem:[#allocation3 + $0x49] sm:$0xff] %vm1739_vm3, %v2225_v48  ;;  %v2226_v42 = vmax.f32 %v2114_v39, 0.0 }
 0x1f3   : > { %2261 = vst.msk [vmem:[#allocation3 + $0x69] sm:$0xff] %vm1739_vm3, %v2228_v60 }
 0x1f4   : > { %2259 = vst.msk [vmem:[#allocation3 + $0x51] sm:$0xff] %vm1739_vm3, %v2226_v42 }
 0x1f5   : > { %5467 = vrot.lane.b32.xlu0 %v5466_v17, %s6201_s15  ;;  %5457 = vrot.lane.b32.xlu1 %v5456_v34, %s6197_s19 }
 0x1f8   : > { %v7430_v1 = vld [vmem:[#allocation3 + $0x60] sm:$0xff] }
 0x1f9   : > { %5472 = vrot.lane.b32.xlu0 %v5456_v34, %s6203_s18  ;;  %5462 = vrot.lane.b32.xlu1 %v5461_v52, %s6199_s23  ;;  %v2475_v5 = vld [vmem:[#allocation3 + $0x61] sm:$0xff]  ;;  %v2568_v29 = vld [vmem:[#allocation3 + $0x49] sm:$0xff] }
 0x1fa   : > { %v7432_v43 = vld [vmem:[#allocation3 + $0x68] sm:$0xff] }
 0x1fb   : > { %v5481_v11 = vpack.i.bf16 %v7432_v43, %v7430_v1  ;;  %v2476_v55 = vld [vmem:[#allocation3 + $0x69] sm:$0xff]  ;;  %v2601_v19 = vld [vmem:[#allocation3 + $0x52] sm:$0xff] }
 0x1fc   : > { %v5486_v63 = vpack.i.bf16 %v2476_v55, %v2475_v5  ;;  %v2507_v51 = vld [vmem:[#allocation3 + $0x62] sm:$0xff]  ;;  %v2508_v6 = vld [vmem:[#allocation3 + $0x6a] sm:$0xff] }
 0x1fd   : > { %5477 = vrot.lane.b32.xlu0 %v5461_v52, %s6207_s8  ;;  %5482 = vrot.lane.b32.xlu1 %v5481_v11, %s6201_s15  ;;  %v5491_v58 = vpack.i.bf16 %v2508_v6, %v2507_v51  ;;  %v7455_v54 = vld [vmem:[#allocation3 + $0x50] sm:$0xff]  ;;  %v7461_v24 = vld [vmem:[#allocation3 + $0x48] sm:$0xff] }
 0x1fe   : > { %v5521_v2 = vpack.i.bf16 %v7455_v54, %v7461_v24  ;;  %v2600_v35 = vld [vmem:[#allocation3 + $0x4a] sm:$0xff] }
 0x1ff   : > { %v2569_v13 = vld [vmem:[#allocation3 + $0x51] sm:$0xff]  ;;  %v5531_v45 = vpack.i.bf16 %v2601_v19, %v2600_v35 }
 0x200   : > { %v5526_v31 = vpack.i.bf16 %v2569_v13, %v2568_v29 }
 0x201   : > { %5497 = vrot.lane.b32.xlu0 %v5481_v11, %s6204_s21  ;;  %5487 = vrot.lane.b32.xlu1 %v5486_v63, %s6203_s18 }
 0x204   : > { %v4641_v18 = vpop.f32.mrb[8].mxu0 }
 0x205   : > { %v2135_v14 = vadd.f32 %v4641_v18, %v7382_v40  ;;  %v2126_v47 = vpop.f32.mrb[9].mxu0  ;;  %5502 = vrot.lane.b32.xlu0 %v5486_v63, %s6205_s22  ;;  %5492 = vrot.lane.b32.xlu1 %v5491_v58, %s6207_s8 }
 0x206   : > { %v2127_v8 = vadd.f32 %v7382_v40, %v2126_v47  ;;  %v4642_v22 = vpop.f32.mrb[10].mxu0 }
 0x207   : > { %v2231_v20 = vmax.f32 %v2135_v14, 0.0  ;;  %v2138_v56 = vadd.f32 %v4642_v22, %v7382_v40  ;;  %v2129_v59 = vpop.f32.mrb[11].mxu0 }
 0x208   : > { %v2229_v15 = vmax.f32 %v2127_v8, 0.0  ;;  %v2130_v33 = vadd.f32 %v7382_v40, %v2129_v59 }
 0x209   : > { %2264 = vst.msk [vmem:[#allocation3 + $0x91] sm:$0xff] %vm1739_vm3, %v2231_v20  ;;  %v2232_v23 = vmax.f32 %v2138_v56, 0.0  ;;  %5507 = vrot.lane.b32.xlu0 %v5491_v58, %s6206_s29  ;;  %5512 = vrot.lane.b32.xlu1 %v5486_v63, %s6197_s19 }
 0x20a   : > { %2262 = vst.msk [vmem:[#allocation3 + $0x79] sm:$0xff] %vm1739_vm3, %v2229_v15  ;;  %v2230_v10 = vmax.f32 %v2130_v33, 0.0 }
 0x20b   : > { %2265 = vst.msk [vmem:[#allocation3 + $0x99] sm:$0xff] %vm1739_vm3, %v2232_v23 }
 0x20c   : > { %2263 = vst.msk [vmem:[#allocation3 + $0x81] sm:$0xff] %vm1739_vm3, %v2230_v10 }
 0x20d   : > { %5517 = vrot.lane.b32.xlu0 %v5491_v58, %s6199_s23  ;;  %5522 = vrot.lane.b32.xlu1 %v5521_v2, %s6204_s21 }
 0x210   : > { %v2447_v44 = vld [vmem:[#allocation3 + $0x90] sm:$0xff] }
 0x211   : > { %5532 = vrot.lane.b32.xlu0 %v5531_v45, %s6206_s29  ;;  %5527 = vrot.lane.b32.xlu1 %v5526_v31, %s6205_s22  ;;  %v2479_v3 = vld [vmem:[#allocation3 + $0x91] sm:$0xff]  ;;  %v2572_v50 = vld [vmem:[#allocation3 + $0x79] sm:$0xff] }
 0x212   : > { %v2448_v12 = vld [vmem:[#allocation3 + $0x98] sm:$0xff] }
 0x213   : > { %v5561_v57 = vpack.i.bf16 %v2448_v12, %v2447_v44  ;;  %v2480_v46 = vld [vmem:[#allocation3 + $0x99] sm:$0xff]  ;;  %v2605_v55 = vld [vmem:[#allocation3 + $0x82] sm:$0xff]  ;;  %v7515_v12 = vpop.permute.xlu0 %5407 }
 0x214   : > { %v5566_v4 = vpack.i.bf16 %v2480_v46, %v2479_v3  ;;  %v2511_v7 = vld [vmem:[#allocation3 + $0x92] sm:$0xff]  ;;  %v2512_v17 = vld [vmem:[#allocation3 + $0x9a] sm:$0xff] }
 0x215   : > { %5547 = vrot.lane.b32.xlu0 %v5521_v2, %s6201_s15  ;;  %5537 = vrot.lane.b32.xlu1 %v5526_v31, %s6197_s19  ;;  %v5571_v32 = vpack.i.bf16 %v2512_v17, %v2511_v7  ;;  %v2541_v30 = vld [vmem:[#allocation3 + $0x80] sm:$0xff]  ;;  %v2540_v52 = vld [vmem:[#allocation3 + $0x78] sm:$0xff] }
 0x216   : > { %v5601_v41 = vpack.i.bf16 %v2541_v30, %v2540_v52  ;;  %v2604_v11 = vld [vmem:[#allocation3 + $0x7a] sm:$0xff] }
 0x217   : > { %v2573_v5 = vld [vmem:[#allocation3 + $0x81] sm:$0xff]  ;;  %v5611_v63 = vpack.i.bf16 %v2605_v55, %v2604_v11 }
 0x218   : > { %v5606_v51 = vpack.i.bf16 %v2573_v5, %v2572_v50 }
 0x219   : > { %5552 = vrot.lane.b32.xlu0 %v5526_v31, %s6203_s18  ;;  %5542 = vrot.lane.b32.xlu1 %v5531_v45, %s6199_s23 }
 0x21c   : > { %v4645_v0 = vpop.f32.mrb[12].mxu0 }
 0x21d   : > { %v2151_v27 = vadd.f32 %v4645_v0, %v7382_v40  ;;  %v2142_v49 = vpop.f32.mrb[13].mxu0  ;;  %5557 = vrot.lane.b32.xlu0 %v5531_v45, %s6207_s8  ;;  %5562 = vrot.lane.b32.xlu1 %v5561_v57, %s6201_s15 }
 0x21e   : > { %v2143_v53 = vadd.f32 %v7382_v40, %v2142_v49  ;;  %v4646_v26 = vpop.f32.mrb[14].mxu0 }
 0x21f   : > { %v2235_v62 = vmax.f32 %v2151_v27, 0.0  ;;  %v2154_v48 = vadd.f32 %v4646_v26, %v7382_v40  ;;  %v2145_v39 = vpop.f32.mrb[15].mxu0 }
 0x220   : > { %v2233_v60 = vmax.f32 %v2143_v53, 0.0  ;;  %v2146_v42 = vadd.f32 %v7382_v40, %v2145_v39 }
 0x221   : > { %2268 = vst.msk [vmem:[#allocation3 + $0xc1] sm:$0xff] %vm1739_vm3, %v2235_v62  ;;  %v2236_v34 = vmax.f32 %v2154_v48, 0.0  ;;  %5577 = vrot.lane.b32.xlu0 %v5561_v57, %s6204_s21  ;;  %5567 = vrot.lane.b32.xlu1 %v5566_v4, %s6203_s18 }
 0x222   : > { %2266 = vst.msk [vmem:[#allocation3 + $0xa9] sm:$0xff] %vm1739_vm3, %v2233_v60  ;;  %v2234_v37 = vmax.f32 %v2146_v42, 0.0 }
 0x223   : > { %2269 = vst.msk [vmem:[#allocation3 + $0xc9] sm:$0xff] %vm1739_vm3, %v2236_v34  ;;  %v7526_v34 = vpop.permute.xlu0 %5412 }
 0x224   : > { %2267 = vst.msk [vmem:[#allocation3 + $0xb1] sm:$0xff] %vm1739_vm3, %v2234_v37 }
 0x225   : > { %5582 = vrot.lane.b32.xlu0 %v5566_v4, %s6205_s22  ;;  %5572 = vrot.lane.b32.xlu1 %v5571_v32, %s6207_s8 }
 0x228   : > { %v2451_v33 = vld [vmem:[#allocation3 + $0xc0] sm:$0xff] }
 0x229   : > { %5587 = vrot.lane.b32.xlu0 %v5571_v32, %s6206_s29  ;;  %5592 = vrot.lane.b32.xlu1 %v5566_v4, %s6197_s19  ;;  %v2483_v10 = vld [vmem:[#allocation3 + $0xc1] sm:$0xff]  ;;  %v2576_v3 = vld [vmem:[#allocation3 + $0xa9] sm:$0xff] }
 0x22a   : > { %v2452_v56 = vld [vmem:[#allocation3 + $0xc8] sm:$0xff] }
 0x22b   : > { %v5641_v25 = vpack.i.bf16 %v2452_v56, %v2451_v33  ;;  %v2484_v23 = vld [vmem:[#allocation3 + $0xc9] sm:$0xff]  ;;  %v2609_v0 = vld [vmem:[#allocation3 + $0xb2] sm:$0xff] }
 0x22c   : > { %v5646_v2 = vpack.i.bf16 %v2484_v23, %v2483_v10  ;;  %v2515_v35 = vld [vmem:[#allocation3 + $0xc2] sm:$0xff]  ;;  %v2516_v19 = vld [vmem:[#allocation3 + $0xca] sm:$0xff] }
 0x22d   : > { %5597 = vrot.lane.b32.xlu0 %v5571_v32, %s6199_s23  ;;  %5602 = vrot.lane.b32.xlu1 %v5601_v41, %s6204_s21  ;;  %v5651_v13 = vpack.i.bf16 %v2516_v19, %v2515_v35  ;;  %v2545_v29 = vld [vmem:[#allocation3 + $0xb0] sm:$0xff]  ;;  %v2544_v45 = vld [vmem:[#allocation3 + $0xa8] sm:$0xff]  ;;  %v5409_v35 = vunpack.i.l.bf16 %v7515_v12 }
 0x22e   : > { %v5681_v31 = vpack.i.bf16 %v2545_v29, %v2544_v45  ;;  %v2608_v57 = vld [vmem:[#allocation3 + $0xaa] sm:$0xff] }
 0x22f   : > { %v2577_v46 = vld [vmem:[#allocation3 + $0xb1] sm:$0xff]  ;;  %v5691_v4 = vpack.i.bf16 %v2609_v0, %v2608_v57  ;;  %v2342_v57 = vld [vmem:[#allocation3 + $0x8] sm:$0xff] }
 0x230   : > { %v5686_v60 = vpack.i.bf16 %v2577_v46, %v2576_v3 }
 0x231   : > { %5612 = vrot.lane.b32.xlu0 %v5611_v63, %s6206_s29  ;;  %5607 = vrot.lane.b32.xlu1 %v5606_v51, %s6205_s22 }
 0x234   : > { %v4649_v6 = vpop.f32.mrb[16].mxu0 }
 0x235   : > { %v2167_v36 = vadd.f32 %v4649_v6, %v7382_v40  ;;  %v2158_v58 = vpop.f32.mrb[17].mxu0  ;;  %5627 = vrot.lane.b32.xlu0 %v5601_v41, %s6201_s15  ;;  %5617 = vrot.lane.b32.xlu1 %v5606_v51, %s6197_s19 }
 0x236   : > { %v2159_v18 = vadd.f32 %v7382_v40, %v2158_v58  ;;  %v4650_v14 = vpop.f32.mrb[18].mxu0 }
 0x237   : > { %v2239_v47 = vmax.f32 %v2167_v36, 0.0  ;;  %v2170_v8 = vadd.f32 %v4650_v14, %v7382_v40  ;;  %v2161_v22 = vpop.f32.mrb[19].mxu0 }
 0x238   : > { %v2237_v9 = vmax.f32 %v2159_v18, 0.0  ;;  %v2162_v20 = vadd.f32 %v7382_v40, %v2161_v22 }
 0x239   : > { %2272 = vst.msk [vmem:[#allocation3 + $0xf1] sm:$0xff] %vm1739_vm3, %v2239_v47  ;;  %v2240_v59 = vmax.f32 %v2170_v8, 0.0  ;;  %5632 = vrot.lane.b32.xlu0 %v5606_v51, %s6203_s18  ;;  %5622 = vrot.lane.b32.xlu1 %v5611_v63, %s6199_s23 }
 0x23a   : > { %2270 = vst.msk [vmem:[#allocation3 + $0xd9] sm:$0xff] %vm1739_vm3, %v2237_v9  ;;  %v2238_v15 = vmax.f32 %v2162_v20, 0.0 }
 0x23b   : > { %2273 = vst.msk [vmem:[#allocation3 + $0xf9] sm:$0xff] %vm1739_vm3, %v2240_v59 }
 0x23c   : > { %2271 = vst.msk [vmem:[#allocation3 + $0xe1] sm:$0xff] %vm1739_vm3, %v2238_v15 }
 0x23d   : > { %5637 = vrot.lane.b32.xlu0 %v5611_v63, %s6207_s8  ;;  %5642 = vrot.lane.b32.xlu1 %v5641_v25, %s6201_s15 }
 0x240   : > { %v2455_v41 = vld [vmem:[#allocation3 + $0xf0] sm:$0xff] }
 0x241   : > { %5657 = vrot.lane.b32.xlu0 %v5641_v25, %s6204_s21  ;;  %5647 = vrot.lane.b32.xlu1 %v5646_v2, %s6203_s18  ;;  %v2487_v6 = vld [vmem:[#allocation3 + $0xf1] sm:$0xff]  ;;  %v5410_v25 = vunpack.i.h.bf16 %v7515_v12  ;;  %v5415_v12 = vunpack.i.h.bf16 %v7526_v34 }
 0x242   : > { %v2456_v52 = vld [vmem:[#allocation3 + $0xf8] sm:$0xff] }
 0x243   : > { %v7543_v5 = vpack.i.bf16 %v2456_v52, %v2455_v41  ;;  %v2612_v50 = vld [vmem:[#allocation3 + $0xda] sm:$0xff]  ;;  %v2613_v63 = vld [vmem:[#allocation3 + $0xe2] sm:$0xff]  ;;  %v3655_v3 = vsel %vm1739_vm3, %v2342_v57, %v5410_v25 }
 0x244   : > { %v2488_v51 = vld [vmem:[#allocation3 + $0xf9] sm:$0xff]  ;;  %v7552_v18 = vpack.i.bf16 %v2613_v63, %v2612_v50  ;;  %v2486_v59 = vld [vmem:[#allocation3 + $0xe1] sm:$0xff]  ;;  %v3687_v52 = vsel %vm1805_vm6, %v3655_v3, %v5415_v12 }
 0x245   : > { %5662 = vrot.lane.b32.xlu0 %v5646_v2, %s6205_s22  ;;  %5652 = vrot.lane.b32.xlu1 %v5651_v13, %s6207_s8  ;;  %v7554_v14 = vpack.i.bf16 %v2488_v51, %v2487_v6  ;;  %v2454_v47 = vld [vmem:[#allocation3 + $0xe0] sm:$0xff]  ;;  %v2453_v8 = vld [vmem:[#allocation3 + $0xd8] sm:$0xff] }
 0x246   : > { %v5756_v20 = vpack.i.bf16 %v2454_v47, %v2453_v8 }
 0x249   : > { %5667 = vrot.lane.b32.xlu0 %v5651_v13, %s6206_s29  ;;  %5672 = vrot.lane.b32.xlu1 %v5646_v2, %s6197_s19  ;;  %v2485_v2 = vld [vmem:[#allocation3 + $0xd9] sm:$0xff] }
 0x24c   : > { %v4653_v44 = vpop.f32.mrb[20].mxu0 }
 0x24d   : > { %v2183_v27 = vadd.f32 %v4653_v44, %v7382_v40  ;;  %v2174_v49 = vpop.f32.mrb[21].mxu0  ;;  %5677 = vrot.lane.b32.xlu0 %v5651_v13, %s6199_s23  ;;  %5682 = vrot.lane.b32.xlu1 %v5681_v31, %s6204_s21  ;;  %v2341_v44 = vld [vmem:[#allocation3] sm:$0xff] }
 0x24e   : > { %v2175_v53 = vadd.f32 %v7382_v40, %v2174_v49  ;;  %v4654_v26 = vpop.f32.mrb[22].mxu0 }
 0x24f   : > { %v2243_v62 = vmax.f32 %v2183_v27, 0.0  ;;  %v2186_v48 = vadd.f32 %v4654_v26, %v7382_v40  ;;  %v2177_v39 = vpop.f32.mrb[23].mxu0 }
 0x250   : > { %v2241_v42 = vmax.f32 %v2175_v53, 0.0  ;;  %v2178_v7 = vadd.f32 %v7382_v40, %v2177_v39  ;;  %v5414_v53 = vunpack.i.l.bf16 %v7526_v34 }
 0x251   : > { %2276 = vst.msk [vmem:[#allocation3 + $0x121] sm:$0xff] %vm1739_vm3, %v2243_v62  ;;  %v2244_v17 = vmax.f32 %v2186_v48, 0.0  ;;  %5692 = vrot.lane.b32.xlu0 %v5691_v4, %s6206_s29  ;;  %5687 = vrot.lane.b32.xlu1 %v5686_v60, %s6205_s22  ;;  %v3654_v62 = vsel %vm1739_vm3, %v2341_v44, %v5409_v35 }
 0x252   : > { %2274 = vst.msk [vmem:[#allocation3 + $0x109] sm:$0xff] %vm1739_vm3, %v2241_v42  ;;  %v2242_v37 = vmax.f32 %v2178_v7, 0.0  ;;  %v2519_v42 = vld [vmem:[#allocation3 + $0xf2] sm:$0xff]  ;;  %v2520_v7 = vld [vmem:[#allocation3 + $0xfa] sm:$0xff] }
 0x253   : > { %2277 = vst.msk [vmem:[#allocation3 + $0x129] sm:$0xff] %vm1739_vm3, %v2244_v17  ;;  %v7591_v50 = vpack.i.bf16 %v2520_v7, %v2519_v42 }
 0x254   : > { %2275 = vst.msk [vmem:[#allocation3 + $0x111] sm:$0xff] %vm1739_vm3, %v2242_v37  ;;  %v3686_v37 = vsel %vm1805_vm6, %v3654_v62, %v5414_v53 }
 0x255   : > { %5707 = vrot.lane.b32.xlu0 %v5681_v31, %s6201_s15  ;;  %5697 = vrot.lane.b32.xlu1 %v5686_v60, %s6197_s19  ;;  %v5761_v31 = vpack.i.bf16 %v2486_v59, %v2485_v2 }
 0x257   : > { %v7533_v32 = vpop.permute.xlu0 %5432  ;;  %v7535_v30 = vpop.permute.xlu1 %5417 }
 0x259   : > { %5712 = vrot.lane.b32.xlu0 %v5686_v60, %s6203_s18  ;;  %5702 = vrot.lane.b32.xlu1 %v5691_v4, %s6199_s23  ;;  %v2552_v57 = vld [vmem:[#allocation3 + $0x108] sm:$0xff] }
 0x25b   : > { %v7539_v11 = vpop.permute.xlu0 %5437  ;;  %v7541_v55 = vpop.permute.xlu1 %5422  ;;  %v2616_v3 = vld [vmem:[#allocation3 + $0x10a] sm:$0xff]  ;;  %v2617_v62 = vld [vmem:[#allocation3 + $0x112] sm:$0xff] }
 0x25c   : > { %v5439_v25 = vunpack.i.l.bf16 %v7539_v11  ;;  %v7644_v7 = vpack.i.bf16 %v2617_v62, %v2616_v3 }
 0x25d   : > { %5717 = vrot.lane.b32.xlu0 %v5691_v4, %s6207_s8  ;;  %5722 = vrot.lane.b32.xlu1 %v7543_v5, %s6201_s15 }
 0x25f   : > { %v7548_v36 = vpop.permute.xlu0 %5442  ;;  %v7550_v58 = vpop.permute.xlu1 %5427 }
 0x260   : > { %v5444_v2 = vunpack.i.l.bf16 %v7548_v36 }
 0x261   : > { %5742 = vrot.lane.b32.xlu0 %v7552_v18, %s6206_s29  ;;  %5727 = vrot.lane.b32.xlu1 %v7554_v14, %s6203_s18 }
 0x263   : > { %v7560_v22 = vpop.permute.xlu0 %5452  ;;  %v7562_v9 = vpop.permute.xlu1 %5447 }
 0x264   : > { %v4657_v56 = vpop.f32.mrb[24].mxu0 }
 0x265   : > { %v2199_v15 = vadd.f32 %v4657_v56, %v7382_v40  ;;  %v2190_v33 = vpop.f32.mrb[25].mxu0  ;;  %5757 = vrot.lane.b32.xlu0 %v5756_v20, %s6201_s15  ;;  %5732 = vrot.lane.b32.xlu1 %v5756_v20, %s6204_s21  ;;  %v5435_v20 = vunpack.i.h.bf16 %v7533_v32  ;;  %v5434_v56 = vunpack.i.l.bf16 %v7533_v32  ;;  %v5445_v32 = vunpack.i.h.bf16 %v7548_v36 }
 0x266   : > { %v2191_v23 = vadd.f32 %v7382_v40, %v2190_v33  ;;  %v4658_v10 = vpop.f32.mrb[26].mxu0  ;;  %v5440_v33 = vunpack.i.h.bf16 %v7539_v11 }
 0x267   : > { %v2247_v19 = vmax.f32 %v2199_v15, 0.0  ;;  %v2202_v13 = vadd.f32 %v4658_v10, %v7382_v40  ;;  %v2193_v29 = vpop.f32.mrb[27].mxu0  ;;  %v5468_v45 = vpop.permute.xlu0 %5467 }
 0x268   : > { %v2245_v0 = vmax.f32 %v2191_v23, 0.0  ;;  %v2194_v46 = vadd.f32 %v7382_v40, %v2193_v29  ;;  %v7572_v27 = vpop.permute.xlu1 %5457  ;;  %v5470_v39 = vunpack.i.h.bf16 %v5468_v45  ;;  %v5469_v4 = vunpack.i.l.bf16 %v5468_v45  ;;  %v2553_v29 = vld [vmem:[#allocation3 + $0x110] sm:$0xff] }
 0x269   : > { %2280 = vst.msk [vmem:[#allocation3 + $0x151] sm:$0xff] %vm1739_vm3, %v2247_v19  ;;  %v2248_v49 = vmax.f32 %v2202_v13, 0.0  ;;  %5762 = vrot.lane.b32.xlu0 %v5761_v31, %s6203_s18  ;;  %5737 = vrot.lane.b32.xlu1 %v5761_v31, %s6205_s22  ;;  %v5786_v12 = vpack.i.bf16 %v2553_v29, %v2552_v57  ;;  %v5429_v29 = vunpack.i.l.bf16 %v7550_v58 }
 0x26a   : > { %2278 = vst.msk [vmem:[#allocation3 + $0x139] sm:$0xff] %vm1739_vm3, %v2245_v0  ;;  %v2246_v26 = vmax.f32 %v2194_v46, 0.0  ;;  %v3719_v63 = vsel %vm1871_vm8, %v3687_v52, %v5470_v39  ;;  %v3718_v51 = vsel %vm1871_vm8, %v3686_v37, %v5469_v4  ;;  %v5460_v0 = vunpack.i.h.bf16 %v7572_v27  ;;  %v2584_v39 = vld [vmem:[#allocation3 + $0x109] sm:$0xff] }
 0x26b   : > { %2281 = vst.msk [vmem:[#allocation3 + $0x159] sm:$0xff] %vm1739_vm3, %v2248_v49  ;;  %v5473_v48 = vpop.permute.xlu0 %5472 }
 0x26c   : > { %2279 = vst.msk [vmem:[#allocation3 + $0x141] sm:$0xff] %vm1739_vm3, %v2246_v26  ;;  %v7584_v60 = vpop.permute.xlu1 %5462  ;;  %v5475_v17 = vunpack.i.h.bf16 %v5473_v48  ;;  %v5474_v34 = vunpack.i.l.bf16 %v5473_v48  ;;  %v2585_v48 = vld [vmem:[#allocation3 + $0x111] sm:$0xff]  ;;  %v3657_v4 = vsel %vm1739_vm3, %v7408_v38, %v5460_v0 }
 0x26d   : > { %5767 = vrot.lane.b32.xlu0 %v7552_v18, %s6207_s8  ;;  %5747 = vrot.lane.b32.xlu1 %v5761_v31, %s6197_s19  ;;  %v5459_v31 = vunpack.i.l.bf16 %v7572_v27  ;;  %v5464_v46 = vunpack.i.l.bf16 %v7584_v60  ;;  %v5465_v53 = vunpack.i.h.bf16 %v7584_v60 }
 0x26e   : > { %v3750_v59 = vsel %vm1937_vm10, %v3718_v51, %v5474_v34  ;;  %v3751_v15 = vsel %vm1937_vm10, %v3719_v63, %v5475_v17  ;;  %v5791_v17 = vpack.i.bf16 %v2585_v48, %v2584_v39  ;;  %v5419_v34 = vunpack.i.l.bf16 %v7535_v30 }
 0x26f   : > { %v5478_v41 = vpop.permute.xlu0 %5477  ;;  %v3656_v27 = vsel %vm1739_vm3, %v7414_v16, %v5459_v31  ;;  %v3689_v37 = vsel %vm1805_vm6, %v3657_v4, %v5465_v53  ;;  %v5420_v16 = vunpack.i.h.bf16 %v7535_v30  ;;  %v5450_v48 = vunpack.i.h.bf16 %v7562_v9 }
 0x270   : > { %v5480_v6 = vunpack.i.h.bf16 %v5478_v41  ;;  %v5479_v47 = vunpack.i.l.bf16 %v5478_v41  ;;  %v7595_v8 = vpop.permute.xlu1 %5482  ;;  %v3688_v60 = vsel %vm1805_vm6, %v3656_v27, %v5464_v46  ;;  %v5449_v27 = vunpack.i.l.bf16 %v7562_v9 }
 0x271   : > { %5777 = vrot.lane.b32.xlu0 %v7543_v5, %s6204_s21  ;;  %5752 = vrot.lane.b32.xlu1 %v7552_v18, %s6199_s23  ;;  %v3720_v38 = vsel %vm1871_vm8, %v3688_v60, %v5419_v34  ;;  %v2460_v60 = vld [vmem:[#allocation3 + $0x128] sm:$0xff] }
 0x272   : > { %v3783_v23 = vsel %vm3782_vm15, %v3750_v59, %v5479_v47  ;;  %v3784_v10 = vsel %vm3782_vm15, %v3751_v15, %v5480_v6 }
 0x273   : > { %v7611_v35 = vpop.permute.xlu0 %5497  ;;  %v3816_v19 = vsel %vm3815_vm0, %v3783_v23, %v5434_v56  ;;  %v3817_v5 = vsel %vm3815_vm0, %v3784_v10, %v5435_v20  ;;  %v5424_v20 = vunpack.i.l.bf16 %v7541_v55  ;;  %v3721_v56 = vsel %vm1871_vm8, %v3689_v37, %v5420_v16  ;;  %v2459_v37 = vld [vmem:[#allocation3 + $0x120] sm:$0xff] }
 0x274   : > { %v7615_v13 = vpop.permute.xlu1 %5487  ;;  %v3849_v18 = vsel %vm3848_vm1, %v3816_v19, %v5439_v25  ;;  %v3850_v11 = vsel %vm3848_vm1, %v3817_v5, %v5440_v33  ;;  %v5425_v25 = vunpack.i.h.bf16 %v7541_v55  ;;  %v5454_v16 = vunpack.i.l.bf16 %v7560_v22 }
 0x275   : > { %5782 = vrot.lane.b32.xlu0 %v7554_v14, %s6205_s22  ;;  %5772 = vrot.lane.b32.xlu1 %v7591_v50, %s6207_s8  ;;  %v3882_v36 = vsel %vm3881_vm2, %v3849_v18, %v5444_v2  ;;  %v3883_v45 = vsel %vm3881_vm2, %v3850_v11, %v5445_v32  ;;  %v3752_v19 = vsel %vm1937_vm10, %v3720_v38, %v5424_v20  ;;  %v2492_v20 = vld [vmem:[#allocation3 + $0x129] sm:$0xff] }
 0x276   : > { %v3914_v44 = vpack.c.bf16 %v3883_v45, %v3882_v36  ;;  %v3753_v11 = vsel %vm1937_vm10, %v3721_v56, %v5425_v25  ;;  %v3659_v38 = vsel %vm1739_vm3, %v7394_v28, %v5450_v48  ;;  %v2523_v56 = vld [vmem:[#allocation3 + $0x122] sm:$0xff] }
 0x277   : > { %v7628_v49 = vpop.permute.xlu0 %5502 }
 0x278   : > { %v7631_v26 = vpop.permute.xlu1 %5492  ;;  %4673 = vmatprep.mubr.msk.bf16.mxu1 %vm3963_vm4, %v3914_v44 }
 0x279   : > { %5797 = vrot.lane.b32.xlu0 %v7591_v50, %s6206_s29  ;;  %5787 = vrot.lane.b32.xlu1 %v5786_v12, %s6204_s21 }
 0x27b   : > { %v7642_v42 = vpop.permute.xlu0 %5507 }
 0x27c   : > { %v7648_v52 = vpop.permute.xlu1 %5512  ;;  %v4661_v41 = vpop.f32.mrb[28].mxu0 }
 0x27d   : > { %v2215_v63 = vadd.f32 %v4661_v41, %v7382_v40  ;;  %v2206_v51 = vpop.f32.mrb[29].mxu0  ;;  %5807 = vrot.lane.b32.xlu0 %v7644_v7, %s6206_s29  ;;  %5792 = vrot.lane.b32.xlu1 %v5791_v17, %s6205_s22  ;;  %v5455_v41 = vunpack.i.h.bf16 %v7560_v22  ;;  %v2491_v22 = vld [vmem:[#allocation3 + $0x121] sm:$0xff] }
 0x27e   : > { %v2207_v6 = vadd.f32 %v7382_v40, %v2206_v51  ;;  %v4662_v47 = vpop.f32.mrb[30].mxu0  ;;  %v3658_v51 = vsel %vm1739_vm3, %v7392_v21, %v5449_v27 }
 0x27f   : > { %v2251_v59 = vmax.f32 %v2215_v63, 0.0  ;;  %v2218_v30 = vadd.f32 %v4662_v47, %v7382_v40  ;;  %v2209_v15 = vpop.f32.mrb[31].mxu0  ;;  %v7660_v33 = vpop.permute.xlu0 %5517  ;;  %v5831_v63 = vpack.i.bf16 %v2460_v60, %v2459_v37  ;;  %v3690_v21 = vsel %vm1805_vm6, %v3658_v51, %v5454_v16  ;;  %v2621_v16 = vld [vmem:[#allocation3 + $0x142] sm:$0xff] }
 0x280   : > { %v2249_v23 = vmax.f32 %v2207_v6, 0.0  ;;  %v2210_v10 = vadd.f32 %v7382_v40, %v2209_v15  ;;  %v5523_v32 = vpop.permute.xlu1 %5522  ;;  %v5430_v40 = vunpack.i.h.bf16 %v7550_v58  ;;  %v3691_v25 = vsel %vm1805_vm6, %v3659_v38, %v5455_v41  ;;  %v2620_v41 = vld [vmem:[#allocation3 + $0x13a] sm:$0xff] }
 0x281   : > { %2284 = vst.msk [vmem:[#allocation3 + $0x181] sm:$0xff] %vm1739_vm3, %v2251_v59  ;;  %v2252_v2 = vmax.f32 %v2218_v30, 0.0  ;;  %5817 = vrot.lane.b32.xlu0 %v7591_v50, %s6199_s23  ;;  %5802 = vrot.lane.b32.xlu1 %v7554_v14, %s6197_s19  ;;  %v5525_v18 = vunpack.i.h.bf16 %v5523_v32  ;;  %v5524_v55 = vunpack.i.l.bf16 %v5523_v32  ;;  %v3785_v14 = vsel %vm3782_vm15, %v3752_v19, %v5429_v29  ;;  %v2524_v59 = vld [vmem:[#allocation3 + $0x12a] sm:$0xff] }
 0x282   : > { %2282 = vst.msk [vmem:[#allocation3 + $0x169] sm:$0xff] %vm1739_vm3, %v2249_v23  ;;  %v2250_v5 = vmax.f32 %v2210_v10, 0.0  ;;  %v3786_v44 = vsel %vm3782_vm15, %v3753_v11, %v5430_v40  ;;  %v7707_v23 = vpack.i.bf16 %v2492_v20, %v2491_v22  ;;  %v5851_v10 = vpack.i.bf16 %v2524_v59, %v2523_v56 }
 0x283   : > { %2285 = vst.msk [vmem:[#allocation3 + $0x189] sm:$0xff] %vm1739_vm3, %v2252_v2  ;;  %v5533_v36 = vpop.permute.xlu0 %5532  ;;  %v3818_v58 = vsel %vm3815_vm0, %v3785_v14, %v5524_v55  ;;  %v3819_v46 = vsel %vm3815_vm0, %v3786_v44, %v5525_v18  ;;  %v5499_v55 = vunpack.i.l.bf16 %v7611_v35  ;;  %v5505_v29 = vunpack.i.h.bf16 %v7628_v49 }
 0x284   : > { %2283 = vst.msk [vmem:[#allocation3 + $0x171] sm:$0xff] %vm1739_vm3, %v2250_v5  ;;  %v5535_v50 = vunpack.i.h.bf16 %v5533_v36  ;;  %v5534_v45 = vunpack.i.l.bf16 %v5533_v36  ;;  %v5528_v31 = vpop.permute.xlu1 %5527  ;;  %v5504_v36 = vunpack.i.l.bf16 %v7628_v49  ;;  %v5485_v59 = vunpack.i.h.bf16 %v7595_v8 }
 0x285   : > { %v5530_v57 = vunpack.i.h.bf16 %v5528_v31  ;;  %v5529_v0 = vunpack.i.l.bf16 %v5528_v31  ;;  %5827 = vrot.lane.b32.xlu0 %v5786_v12, %s6201_s15  ;;  %5812 = vrot.lane.b32.xlu1 %v5791_v17, %s6197_s19  ;;  %v5510_v31 = vunpack.i.h.bf16 %v7642_v42  ;;  %v5490_v22 = vunpack.i.h.bf16 %v7615_v13 }
 0x287   : > { %v3851_v53 = vsel %vm3848_vm1, %v3818_v58, %v5529_v0  ;;  %v3852_v3 = vsel %vm3848_vm1, %v3819_v46, %v5530_v57  ;;  %v5548_v62 = vpop.permute.xlu0 %5547  ;;  %v7734_v46 = vld [vmem:[#allocation3 + $0x140] sm:$0xff] }
 0x288   : > { %v7686_v39 = vpop.permute.xlu1 %5537  ;;  %v3884_v4 = vsel %vm3881_vm2, %v3851_v53, %v5534_v45  ;;  %v3885_v12 = vsel %vm3881_vm2, %v3852_v3, %v5535_v50  ;;  %v5549_v6 = vunpack.i.l.bf16 %v5548_v62 }
 0x289   : > { %5837 = vrot.lane.b32.xlu0 %v5791_v17, %s6203_s18  ;;  %5822 = vrot.lane.b32.xlu1 %v7644_v7, %s6199_s23  ;;  %v3915_v34 = vpack.c.bf16 %v3885_v12, %v3884_v4  ;;  %v5550_v17 = vunpack.i.h.bf16 %v5548_v62  ;;  %v7741_v62 = vld [vmem:[#allocation3 + $0x138] sm:$0xff]  ;;  %v5540_v48 = vunpack.i.h.bf16 %v7686_v39  ;;  %v5539_v27 = vunpack.i.l.bf16 %v7686_v39 }
 0x28a   : > { %v3722_v2 = vsel %vm1871_vm8, %v3690_v21, %v5549_v6  ;;  %v5861_v12 = vpack.i.bf16 %v7734_v46, %v7741_v62  ;;  %v2588_v39 = vld [vmem:[#allocation3 + $0x139] sm:$0xff]  ;;  %v5489_v21 = vunpack.i.l.bf16 %v7615_v13 }
 0x28b   : > { %4674 = vmatmul.mubr.msk.bf16.vlgmr.msra.gmra.mrb[0].mxu1 %vm3963_vm4, %v3915_v34  ;;  %v5553_v9 = vpop.permute.xlu0 %5552  ;;  %v3723_v32 = vsel %vm1871_vm8, %v3691_v25, %v5550_v17  ;;  %v3660_v51 = vsel %vm1739_vm3, %v7461_v24, %v5539_v27  ;;  %v5886_v17 = vpack.i.bf16 %v2621_v16, %v2620_v41  ;;  %v5519_v27 = vunpack.i.l.bf16 %v7660_v33 }
 0x28c   : > { %v7700_v47 = vpop.permute.xlu1 %5542  ;;  %v5555_v30 = vunpack.i.h.bf16 %v5553_v9  ;;  %v5554_v15 = vunpack.i.l.bf16 %v5553_v9  ;;  %v2589_v9 = vld [vmem:[#allocation3 + $0x141] sm:$0xff] }
 0x28d   : > { %5847 = vrot.lane.b32.xlu0 %v7644_v7, %s6207_s8  ;;  %5832 = vrot.lane.b32.xlu1 %v5831_v63, %s6201_s15  ;;  %v5500_v7 = vunpack.i.h.bf16 %v7611_v35  ;;  %v5509_v35 = vunpack.i.l.bf16 %v7642_v42  ;;  %v5545_v60 = vunpack.i.h.bf16 %v7700_v47  ;;  %v5544_v34 = vunpack.i.l.bf16 %v7700_v47 }
 0x28e   : > { %v3754_v11 = vsel %vm1937_vm10, %v3722_v2, %v5554_v15  ;;  %v3755_v40 = vsel %vm1937_vm10, %v3723_v32, %v5555_v30  ;;  %v5871_v6 = vpack.i.bf16 %v2589_v9, %v2588_v39  ;;  %v5484_v30 = vunpack.i.l.bf16 %v7595_v8  ;;  %v2496_v9 = vld [vmem:[#allocation3 + $0x159] sm:$0xff] }
 0x28f   : > { %v5558_v28 = vpop.permute.xlu0 %5557  ;;  %v3692_v47 = vsel %vm1805_vm6, %v3660_v51, %v5544_v34  ;;  %v2527_v39 = vld [vmem:[#allocation3 + $0x152] sm:$0xff] }
 0x290   : > { %v5560_v19 = vunpack.i.h.bf16 %v5558_v28  ;;  %v5559_v5 = vunpack.i.l.bf16 %v5558_v28  ;;  %v7711_v18 = vpop.permute.xlu1 %5562 }
 0x291   : > { %5857 = vrot.lane.b32.xlu0 %v5831_v63, %s6204_s21  ;;  %5842 = vrot.lane.b32.xlu1 %v7707_v23, %s6203_s18  ;;  %v3661_v63 = vsel %vm1739_vm3, %v7455_v54, %v5540_v48  ;;  %v3724_v54 = vsel %vm1871_vm8, %v3692_v47, %v5484_v30  ;;  %v5520_v48 = vunpack.i.h.bf16 %v7660_v33  ;;  %v2495_v47 = vld [vmem:[#allocation3 + $0x151] sm:$0xff] }
 0x292   : > { %v3787_v50 = vsel %vm3782_vm15, %v3754_v11, %v5559_v5  ;;  %v3788_v45 = vsel %vm3782_vm15, %v3755_v40, %v5560_v19  ;;  %v3693_v20 = vsel %vm1805_vm6, %v3661_v63, %v5545_v60  ;;  %v3756_v32 = vsel %vm1937_vm10, %v3724_v54, %v5489_v21  ;;  %v2528_v63 = vld [vmem:[#allocation3 + $0x15a] sm:$0xff] }
 0x293   : > { %v3820_v14 = vsel %vm3815_vm0, %v3787_v50, %v5499_v55  ;;  %v3821_v44 = vsel %vm3815_vm0, %v3788_v45, %v5500_v7  ;;  %v7728_v57 = vpop.permute.xlu0 %5577  ;;  %v3725_v24 = vsel %vm1871_vm8, %v3693_v20, %v5485_v59  ;;  %v5495_v19 = vunpack.i.h.bf16 %v7631_v26 }
 0x294   : > { %v7730_v0 = vpop.permute.xlu1 %5567  ;;  %v3853_v58 = vsel %vm3848_vm1, %v3820_v14, %v5504_v36  ;;  %v3854_v49 = vsel %vm3848_vm1, %v3821_v44, %v5505_v29  ;;  %v3757_v2 = vsel %vm1937_vm10, %v3725_v24, %v5490_v22  ;;  %v5494_v5 = vunpack.i.l.bf16 %v7631_v26 }
 0x295   : > { %5867 = vrot.lane.b32.xlu0 %v7707_v23, %s6205_s22  ;;  %5852 = vrot.lane.b32.xlu1 %v5851_v10, %s6207_s8  ;;  %v3886_v42 = vsel %vm3881_vm2, %v3853_v58, %v5509_v35  ;;  %v3887_v53 = vsel %vm3881_vm2, %v3854_v49, %v5510_v31  ;;  %v7795_v58 = vld [vmem:[#allocation3 + $0x158] sm:$0xff]  ;;  %v7818_v54 = vpack.i.bf16 %v2496_v9, %v2495_v47  ;;  %v5564_v47 = vunpack.i.l.bf16 %v7711_v18 }
 0x296   : > { %v3916_v3 = vpack.c.bf16 %v3887_v53, %v3886_v42  ;;  %v3789_v40 = vsel %vm3782_vm15, %v3756_v32, %v5494_v5  ;;  %v5515_v42 = vunpack.i.h.bf16 %v7648_v52  ;;  %v5514_v53 = vunpack.i.l.bf16 %v7648_v52 }
 0x297   : > { %v7745_v4 = vpop.permute.xlu0 %5582  ;;  %v7820_v24 = vpack.i.bf16 %v2528_v63, %v2527_v39 }
 0x298   : > { %v7751_v37 = vpop.permute.xlu1 %5572  ;;  %4677 = vmatprep.mubr.msk.bf16.mxu1 %vm3963_vm4, %v3916_v3  ;;  %v7801_v3 = vld [vmem:[#allocation3 + $0x150] sm:$0xff]  ;;  %v3663_v33 = vsel %vm1739_vm3, %v7432_v43, %v5515_v42 }
 0x299   : > { %5877 = vrot.lane.b32.xlu0 %v5851_v10, %s6206_s29  ;;  %5862 = vrot.lane.b32.xlu1 %v5861_v12, %s6204_s21  ;;  %v5911_v60 = vpack.i.bf16 %v7795_v58, %v7801_v3  ;;  %v3695_v59 = vsel %vm1805_vm6, %v3663_v33, %v5520_v48  ;;  %v2624_v48 = vld [vmem:[#allocation3 + $0x16a] sm:$0xff] }
 0x29b   : > { %v7760_v38 = vpop.permute.xlu0 %5587 }
 0x29c   : > { %v7764_v56 = vpop.permute.xlu1 %5592 }
 0x29d   : > { %5887 = vrot.lane.b32.xlu0 %v5886_v17, %s6206_s29  ;;  %5872 = vrot.lane.b32.xlu1 %v5871_v6, %s6205_s22 }
 0x29f   : > { %v7772_v15 = vpop.permute.xlu0 %5597 }
 0x2a0   : > { %v5603_v25 = vpop.permute.xlu1 %5602 }
 0x2a1   : > { %5897 = vrot.lane.b32.xlu0 %v5851_v10, %s6199_s23  ;;  %5882 = vrot.lane.b32.xlu1 %v7707_v23, %s6197_s19  ;;  %v5605_v8 = vunpack.i.h.bf16 %v5603_v25  ;;  %v5604_v28 = vunpack.i.l.bf16 %v5603_v25  ;;  %v3790_v10 = vsel %vm3782_vm15, %v3757_v2, %v5495_v19  ;;  %v5585_v2 = vunpack.i.h.bf16 %v7745_v4 }
 0x2a2   : > { %v5584_v19 = vunpack.i.l.bf16 %v7745_v4 }
 0x2a3   : > { %v5613_v7 = vpop.permute.xlu0 %5612  ;;  %v3822_v36 = vsel %vm3815_vm0, %v3789_v40, %v5604_v28  ;;  %v3823_v50 = vsel %vm3815_vm0, %v3790_v10, %v5605_v8  ;;  %v5579_v8 = vunpack.i.l.bf16 %v7728_v57 }
 0x2a4   : > { %v5615_v55 = vunpack.i.h.bf16 %v5613_v7  ;;  %v5614_v11 = vunpack.i.l.bf16 %v5613_v7  ;;  %v5608_v13 = vpop.permute.xlu1 %5607 }
 0x2a5   : > { %v5610_v29 = vunpack.i.h.bf16 %v5608_v13  ;;  %v5609_v23 = vunpack.i.l.bf16 %v5608_v13  ;;  %5907 = vrot.lane.b32.xlu0 %v5861_v12, %s6201_s15  ;;  %5892 = vrot.lane.b32.xlu1 %v5871_v6, %s6197_s19 }
 0x2a7   : > { %v3855_v26 = vsel %vm3848_vm1, %v3822_v36, %v5609_v23  ;;  %v3856_v45 = vsel %vm3848_vm1, %v3823_v50, %v5610_v29  ;;  %v5628_v31 = vpop.permute.xlu0 %5627  ;;  %v7847_v23 = vld [vmem:[#allocation3 + $0x170] sm:$0xff] }
 0x2a8   : > { %v7791_v35 = vpop.permute.xlu1 %5617  ;;  %v3888_v14 = vsel %vm3881_vm2, %v3855_v26, %v5614_v11  ;;  %v3889_v44 = vsel %vm3881_vm2, %v3856_v45, %v5615_v55  ;;  %v5630_v34 = vunpack.i.h.bf16 %v5628_v31  ;;  %v5629_v41 = vunpack.i.l.bf16 %v5628_v31  ;;  %v7855_v26 = vld [vmem:[#allocation3 + $0x168] sm:$0xff] }
 0x2a9   : > { %5917 = vrot.lane.b32.xlu0 %v5871_v6, %s6203_s18  ;;  %5902 = vrot.lane.b32.xlu1 %v5886_v17, %s6199_s23  ;;  %v3917_v49 = vpack.c.bf16 %v3889_v44, %v3888_v14  ;;  %v3662_v6 = vsel %vm1739_vm3, %v7430_v1, %v5514_v53  ;;  %v5580_v1 = vunpack.i.h.bf16 %v7728_v57  ;;  %v5590_v55 = vunpack.i.h.bf16 %v7760_v38 }
 0x2aa   : > { %v3694_v20 = vsel %vm1805_vm6, %v3662_v6, %v5519_v27  ;;  %v3727_v22 = vsel %vm1871_vm8, %v3695_v59, %v5630_v34  ;;  %v5589_v57 = vunpack.i.l.bf16 %v7760_v38  ;;  %v5620_v45 = vunpack.i.h.bf16 %v7791_v35  ;;  %v2625_v27 = vld [vmem:[#allocation3 + $0x172] sm:$0xff]  ;;  %v2592_v34 = vld [vmem:[#allocation3 + $0x169] sm:$0xff] }
 0x2ab   : > { %4678 = vmatmul.mubr.msk.bf16.gmra.mrb[4].mxu1 %vm3963_vm4, %v3917_v49  ;;  %v5633_v12 = vpop.permute.xlu0 %5632  ;;  %v5619_v31 = vunpack.i.l.bf16 %v7791_v35  ;;  %v5941_v44 = vpack.i.bf16 %v7847_v23, %v7855_v26  ;;  %v2351_v35 = vld [vmem:[#allocation3 + $0x78] sm:$0xff]  ;;  %v7875_v39 = vpack.i.bf16 %v2625_v27, %v2624_v48  ;;  %v5565_v6 = vunpack.i.h.bf16 %v7711_v18  ;;  %v2500_v48 = vld [vmem:[#allocation3 + $0x189] sm:$0xff] }
 0x2ac   : > { %v7808_v16 = vpop.permute.xlu1 %5622  ;;  %v5635_v52 = vunpack.i.h.bf16 %v5633_v12  ;;  %v5634_v51 = vunpack.i.l.bf16 %v5633_v12  ;;  %v2593_v12 = vld [vmem:[#allocation3 + $0x171] sm:$0xff]  ;;  %v2531_v27 = vld [vmem:[#allocation3 + $0x182] sm:$0xff] }
 0x2ad   : > { %5927 = vrot.lane.b32.xlu0 %v5886_v17, %s6207_s8  ;;  %5912 = vrot.lane.b32.xlu1 %v5911_v60, %s6201_s15  ;;  %v3726_v17 = vsel %vm1871_vm8, %v3694_v20, %v5629_v41  ;;  %v5625_v49 = vunpack.i.h.bf16 %v7808_v16  ;;  %v5624_v42 = vunpack.i.l.bf16 %v7808_v16  ;;  %v3664_v9 = vsel %vm1739_vm3, %v2351_v35, %v5619_v31  ;;  %v7914_v31 = vld [vmem:[#allocation3 + $0x1a0] sm:$0xff] }
 0x2ae   : > { %v3758_v28 = vsel %vm1937_vm10, %v3726_v17, %v5634_v51  ;;  %v3759_v32 = vsel %vm1937_vm10, %v3727_v22, %v5635_v52  ;;  %v5951_v63 = vpack.i.bf16 %v2593_v12, %v2592_v34  ;;  %v5570_v17 = vunpack.i.h.bf16 %v7730_v0  ;;  %v2532_v12 = vld [vmem:[#allocation3 + $0x18a] sm:$0xff]  ;;  %v2467_v34 = vld [vmem:[#allocation3 + $0x180] sm:$0xff] }
 0x2af   : > { %v5638_v30 = vpop.permute.xlu0 %5637  ;;  %v3696_v52 = vsel %vm1805_vm6, %v3664_v9, %v5624_v42  ;;  %v5569_v22 = vunpack.i.l.bf16 %v7730_v0  ;;  %v5600_v35 = vunpack.i.h.bf16 %v7772_v15 }
 0x2b0   : > { %v5640_v21 = vunpack.i.h.bf16 %v5638_v30  ;;  %v5639_v25 = vunpack.i.l.bf16 %v5638_v30  ;;  %v7824_v43 = vpop.permute.xlu1 %5642  ;;  %v3728_v20 = vsel %vm1871_vm8, %v3696_v52, %v5564_v47 }
 0x2b1   : > { %5937 = vrot.lane.b32.xlu0 %v5911_v60, %s6204_s21  ;;  %5922 = vrot.lane.b32.xlu1 %v7818_v54, %s6203_s18  ;;  %v2352_v60 = vld [vmem:[#allocation3 + $0x80] sm:$0xff] }
 0x2b2   : > { %v3791_v5 = vsel %vm3782_vm15, %v3758_v28, %v5639_v25  ;;  %v3792_v7 = vsel %vm3782_vm15, %v3759_v32, %v5640_v21  ;;  %v3665_v41 = vsel %vm1739_vm3, %v2352_v60, %v5620_v45  ;;  %v5575_v28 = vunpack.i.h.bf16 %v7751_v37  ;;  %v7912_v45 = vld [vmem:[#allocation3 + $0x198] sm:$0xff] }
 0x2b3   : > { %v3824_v11 = vsel %vm3815_vm0, %v3791_v5, %v5579_v8  ;;  %v3825_v13 = vsel %vm3815_vm0, %v3792_v7, %v5580_v1  ;;  %v7841_v40 = vpop.permute.xlu0 %5657  ;;  %v3697_v51 = vsel %vm1805_vm6, %v3665_v41, %v5625_v49  ;;  %v3760_v1 = vsel %vm1937_vm10, %v3728_v20, %v5569_v22 }
 0x2b4   : > { %v7843_v10 = vpop.permute.xlu1 %5647  ;;  %v3857_v29 = vsel %vm3848_vm1, %v3824_v11, %v5584_v19  ;;  %v3858_v4 = vsel %vm3848_vm1, %v3825_v13, %v5585_v2  ;;  %v3729_v59 = vsel %vm1871_vm8, %v3697_v51, %v5565_v6  ;;  %v5574_v32 = vunpack.i.l.bf16 %v7751_v37  ;;  %v2499_v51 = vld [vmem:[#allocation3 + $0x181] sm:$0xff]  ;;  %v2354_v6 = vld [vmem:[#allocation3 + $0x98] sm:$0xff] }
 0x2b5   : > { %5947 = vrot.lane.b32.xlu0 %v7818_v54, %s6205_s22  ;;  %5932 = vrot.lane.b32.xlu1 %v7820_v24, %s6207_s8  ;;  %v3890_v38 = vsel %vm3881_vm2, %v3857_v29, %v5589_v57  ;;  %v3891_v36 = vsel %vm3881_vm2, %v3858_v4, %v5590_v55  ;;  %v3761_v8 = vsel %vm1937_vm10, %v3729_v59, %v5570_v17  ;;  %v5594_v49 = vunpack.i.l.bf16 %v7764_v56 }
 0x2b6   : > { %v3918_v50 = vpack.c.bf16 %v3891_v36, %v3890_v38  ;;  %v3793_v7 = vsel %vm3782_vm15, %v3760_v1, %v5574_v32  ;;  %v5599_v60 = vunpack.i.l.bf16 %v7772_v15  ;;  %v6001_v20 = vpack.i.bf16 %v2500_v48, %v2499_v51 }
 0x2b7   : > { %v7859_v14 = vpop.permute.xlu0 %5662  ;;  %v6011_v59 = vpack.i.bf16 %v2532_v12, %v2531_v27  ;;  %v6021_v17 = vpack.i.bf16 %v7914_v31, %v7912_v45 }
 0x2b8   : > { %v7865_v53 = vpop.permute.xlu1 %5652  ;;  %4681 = vmatprep.mubr.msk.bf16.mxu1 %vm3963_vm4, %v3918_v50  ;;  %v2468_v50 = vld [vmem:[#allocation3 + $0x188] sm:$0xff] }
 0x2b9   : > { %5957 = vrot.lane.b32.xlu0 %v7820_v24, %s6206_s29  ;;  %5942 = vrot.lane.b32.xlu1 %v5941_v44, %s6204_s21 }
 0x2bb   : > { %v7873_v16 = vpop.permute.xlu0 %5667 }
 0x2bc   : > { %v7879_v33 = vpop.permute.xlu1 %5672 }
 0x2bd   : > { %5967 = vrot.lane.b32.xlu0 %v7875_v39, %s6206_s29  ;;  %5952 = vrot.lane.b32.xlu1 %v5951_v63, %s6205_s22 }
 0x2bf   : > { %v7888_v30 = vpop.permute.xlu0 %5677 }
 0x2c0   : > { %v5683_v21 = vpop.permute.xlu1 %5682 }
 0x2c1   : > { %5977 = vrot.lane.b32.xlu0 %v7820_v24, %s6199_s23  ;;  %5962 = vrot.lane.b32.xlu1 %v7818_v54, %s6197_s19  ;;  %v5685_v18 = vunpack.i.h.bf16 %v5683_v21  ;;  %v5684_v25 = vunpack.i.l.bf16 %v5683_v21  ;;  %v3794_v24 = vsel %vm3782_vm15, %v3761_v8, %v5575_v28  ;;  %v5660_v8 = vunpack.i.h.bf16 %v7841_v40 }
 0x2c2   : > { %v5659_v28 = vunpack.i.l.bf16 %v7841_v40 }
 0x2c3   : > { %v5693_v2 = vpop.permute.xlu0 %5692  ;;  %v3826_v57 = vsel %vm3815_vm0, %v3793_v7, %v5684_v25  ;;  %v3827_v11 = vsel %vm3815_vm0, %v3794_v24, %v5685_v18 }
 0x2c4   : > { %v5695_v19 = vunpack.i.h.bf16 %v5693_v2  ;;  %v5694_v0 = vunpack.i.l.bf16 %v5693_v2  ;;  %v5688_v5 = vpop.permute.xlu1 %5687 }
 0x2c5   : > { %v5690_v55 = vunpack.i.h.bf16 %v5688_v5  ;;  %v5689_v54 = vunpack.i.l.bf16 %v5688_v5  ;;  %5987 = vrot.lane.b32.xlu0 %v5941_v44, %s6201_s15  ;;  %5972 = vrot.lane.b32.xlu1 %v5951_v63, %s6197_s19  ;;  %v5595_v44 = vunpack.i.h.bf16 %v7764_v56  ;;  %v5991_v56 = vpack.i.bf16 %v2468_v50, %v2467_v34  ;;  %s6209_s19 = smov [#allocation4]  }
 0x2c7   : > { %v3859_v37 = vsel %vm3848_vm1, %v3826_v57, %v5689_v54  ;;  %v3860_v13 = vsel %vm3848_vm1, %v3827_v11, %v5690_v55  ;;  %v5708_v29 = vpop.permute.xlu0 %5707  ;;  %v3667_v22 = vsel %vm1739_vm3, %v2354_v6, %v5595_v44  ;;  %v5665_v57 = vunpack.i.h.bf16 %v7859_v14 }
 0x2c8   : > { %v7908_v4 = vpop.permute.xlu1 %5697  ;;  %v3892_v38 = vsel %vm3881_vm2, %v3859_v37, %v5694_v0  ;;  %v3893_v36 = vsel %vm3881_vm2, %v3860_v13, %v5695_v19  ;;  %v5710_v41 = vunpack.i.h.bf16 %v5708_v29  ;;  %v5709_v9 = vunpack.i.l.bf16 %v5708_v29 }
 0x2c9   : > { %5997 = vrot.lane.b32.xlu0 %v5951_v63, %s6203_s18  ;;  %5982 = vrot.lane.b32.xlu1 %v7875_v39, %s6199_s23  ;;  %v3919_v42 = vpack.c.bf16 %v3893_v36, %v3892_v38  ;;  %v2353_v63 = vld [vmem:[#allocation3 + $0x90] sm:$0xff]  ;;  %v3699_v1 = vsel %vm1805_vm6, %v3667_v22, %v5600_v35  ;;  %v5700_v19 = vunpack.i.h.bf16 %v7908_v4  ;;  %v5699_v0 = vunpack.i.l.bf16 %v7908_v4  ;;  %v2355_v4 = vld [vmem:[#allocation3 + $0xa8] sm:$0xff]  ;;  %s6135_s23 = sshll.u32 %s6209_s19, 4  ;;  %s6136_s23 = int_to_ptr.vmem [resolvable:$false] %s6135_s23 }
 0x2ca   : > { %v3666_v15 = vsel %vm1739_vm3, %v2353_v63, %v5594_v49  ;;  %v3731_v2 = vsel %vm1871_vm8, %v3699_v1, %v5710_v41  ;;  %v5664_v11 = vunpack.i.l.bf16 %v7859_v14  ;;  %v5670_v13 = vunpack.i.h.bf16 %v7873_v16  ;;  %v2356_v38 = vld [vmem:[#allocation3 + $0xb0] sm:$0xff] }
 0x2cb   : > { %4682 = vmatmul.mubr.msk.bf16.gmra.mrb[8].mxu1 %vm3963_vm4, %v3919_v42  ;;  %v5713_v52 = vpop.permute.xlu0 %5712  ;;  %v3698_v25 = vsel %vm1805_vm6, %v3666_v15, %v5599_v60  ;;  %v5669_v29 = vunpack.i.l.bf16 %v7873_v16  ;;  %v3669_v14 = vsel %vm1739_vm3, %v2356_v38, %v5700_v19  ;;  %v3668_v45 = vsel %vm1739_vm3, %v2355_v4, %v5699_v0  ;;  %v2628_v15 = vld [vmem:[#allocation3 + $0x19a] sm:$0xff] }
 0x2cc   : > { %v5703_v47 = vpop.permute.xlu1 %5702  ;;  %v5715_v21 = vunpack.i.h.bf16 %v5713_v52  ;;  %v5714_v18 = vunpack.i.l.bf16 %v5713_v52  ;;  %v3730_v32 = vsel %vm1871_vm8, %v3698_v25, %v5709_v9  ;;  %v5645_v35 = vunpack.i.h.bf16 %v7824_v43  ;;  %v2596_v52 = vld [vmem:[#allocation3 + $0x199] sm:$0xff] }
 0x2cd   : > { %6007 = vrot.lane.b32.xlu0 %v7875_v39, %s6207_s8  ;;  %5992 = vrot.lane.b32.xlu1 %v5991_v56, %s6201_s15  ;;  %v5705_v39 = vunpack.i.h.bf16 %v5703_v47  ;;  %v5704_v7 = vunpack.i.l.bf16 %v5703_v47  ;;  %v5644_v60 = vunpack.i.l.bf16 %v7824_v43  ;;  %v5650_v47 = vunpack.i.h.bf16 %v7843_v10  ;;  %s6137_s15 = scalar_lea.vmem %s6136_s23, 32 }
 0x2ce   : > { %v3762_v40 = vsel %vm1937_vm10, %v3730_v32, %v5714_v18  ;;  %v3763_v37 = vsel %vm1937_vm10, %v3731_v2, %v5715_v21  ;;  %v5649_v43 = vunpack.i.l.bf16 %v7843_v10  ;;  %v2629_v21 = vld [vmem:[#allocation3 + $0x1a2] sm:$0xff]  ;;  %v5654_v10 = vunpack.i.l.bf16 %v7865_v53 }
 0x2cf   : > { %v5718_v5 = vpop.permute.xlu0 %5717  ;;  %v3700_v42 = vsel %vm1805_vm6, %v3668_v45, %v5704_v7  ;;  %v3701_v48 = vsel %vm1805_vm6, %v3669_v14, %v5705_v39  ;;  %v6041_v19 = vpack.i.bf16 %v2629_v21, %v2628_v15  ;;  %v2357_v14 = vld [vmem:[#allocation3 + $0xc0] sm:$0xff]  ;;  %v2358_v45 = vld [vmem:[#allocation3 + $0xc8] sm:$0xff] }
 0x2d0   : > { %v5720_v24 = vunpack.i.h.bf16 %v5718_v5  ;;  %v5719_v55 = vunpack.i.l.bf16 %v5718_v5  ;;  %v7939_v54 = vpop.permute.xlu1 %5722  ;;  %v3732_v51 = vsel %vm1871_vm8, %v3700_v42, %v5644_v60  ;;  %v3733_v63 = vsel %vm1871_vm8, %v3701_v48, %v5645_v35 }
 0x2d1   : > { %6017 = vrot.lane.b32.xlu0 %v5991_v56, %s6204_s21  ;;  %6002 = vrot.lane.b32.xlu1 %v6001_v20, %s6203_s18  ;;  %v2597_v56 = vld [vmem:[#allocation3 + $0x1a1] sm:$0xff]  ;;  %v3764_v1 = vsel %vm1937_vm10, %v3732_v51, %v5649_v43 }
 0x2d2   : > { %v3795_v36 = vsel %vm3782_vm15, %v3762_v40, %v5719_v55  ;;  %v3796_v50 = vsel %vm3782_vm15, %v3763_v37, %v5720_v24  ;;  %v6031_v22 = vpack.i.bf16 %v2597_v56, %v2596_v52 }
 0x2d3   : > { %v3828_v31 = vsel %vm3815_vm0, %v3795_v36, %v5659_v28  ;;  %v3829_v44 = vsel %vm3815_vm0, %v3796_v50, %v5660_v8  ;;  %v5743_v49 = vpop.permute.xlu0 %5742  ;;  %v3765_v8 = vsel %vm1937_vm10, %v3733_v63, %v5650_v47  ;;  %v5655_v28 = vunpack.i.h.bf16 %v7865_v53 }
 0x2d4   : > { %v7957_v16 = vpop.permute.xlu1 %5727  ;;  %v3861_v27 = vsel %vm3848_vm1, %v3828_v31, %v5664_v11  ;;  %v3862_v12 = vsel %vm3848_vm1, %v3829_v44, %v5665_v57  ;;  %v5745_v39 = vunpack.i.h.bf16 %v5743_v49  ;;  %v5744_v7 = vunpack.i.l.bf16 %v5743_v49 }
 0x2d5   : > { %6027 = vrot.lane.b32.xlu0 %v6001_v20, %s6205_s22  ;;  %6012 = vrot.lane.b32.xlu1 %v6011_v59, %s6207_s8  ;;  %v3894_v34 = vsel %vm3881_vm2, %v3861_v27, %v5669_v29  ;;  %v3895_v41 = vsel %vm3881_vm2, %v3862_v12, %v5670_v13  ;;  %v5675_v57 = vunpack.i.h.bf16 %v7879_v33  ;;  %v5674_v53 = vunpack.i.l.bf16 %v7879_v33  ;;  %s4579_s8 = sshll.u32 %s6271_s28, 4 }
 0x2d6   : > { %v3920_v9 = vpack.c.bf16 %v3895_v41, %v3894_v34  ;;  %v5680_v13 = vunpack.i.h.bf16 %v7888_v30  ;;  %v5679_v29 = vunpack.i.l.bf16 %v7888_v30  ;;  %v2359_v41 = vld [vmem:[#allocation3 + $0xd8] sm:$0xff]  ;;  %s8225_s14 = scalar_lea.hbm %s8274_s7, %s4579_s8 }
 0x2d7   : > { %v7969_v6 = vpop.permute.xlu0 %5757  ;;  %v3671_v44 = vsel %vm1739_vm3, %v2358_v45, %v5675_v57  ;;  %v3670_v49 = vsel %vm1739_vm3, %v2357_v14, %v5674_v53 }
 0x2d8   : > { %v5733_v20 = vpop.permute.xlu1 %5732  ;;  %4685 = vmatprep.mubr.msk.bf16.mxu1 %vm3963_vm4, %v3920_v9  ;;  %v3702_v30 = vsel %vm1805_vm6, %v3670_v49, %v5679_v29  ;;  %v3703_v48 = vsel %vm1805_vm6, %v3671_v44, %v5680_v13  ;;  %v5760_v27 = vunpack.i.h.bf16 %v7969_v6  ;;  %v5759_v12 = vunpack.i.l.bf16 %v7969_v6  ;;  %v2360_v9 = vld [vmem:[#allocation3 + $0xe0] sm:$0xff] }
 0x2d9   : > { %6037 = vrot.lane.b32.xlu0 %v6011_v59, %s6206_s29  ;;  %6022 = vrot.lane.b32.xlu1 %v6021_v17, %s6204_s21  ;;  %v5735_v18 = vunpack.i.h.bf16 %v5733_v20  ;;  %v5734_v25 = vunpack.i.l.bf16 %v5733_v20  ;;  %v3797_v59 = vsel %vm3782_vm15, %v3764_v1, %v5654_v10  ;;  %v3798_v17 = vsel %vm3782_vm15, %v3765_v8, %v5655_v28  ;;  %s269_s21 = sand.u32 1, %s6185_s25  }
 0x2da   : > { %v3734_v1 = vsel %vm1871_vm8, %v3702_v30, %v5759_v12  ;;  %v3735_v8 = vsel %vm1871_vm8, %v3703_v48, %v5760_v27  ;;  %s270_s17 = scalar_lea.vmem [#allocation4], %s269_s21  ;;  %s4462_s16 = scalar_lea.sflag [#allocation5], %s269_s21 }
 0x2db   : > { %v5763_v32 = vpop.permute.xlu0 %5762  ;;  %v3830_v24 = vsel %vm3815_vm0, %v3797_v59, %v5734_v25  ;;  %v3831_v55 = vsel %vm3815_vm0, %v3798_v17, %v5735_v18  ;;  %v5725_v18 = vunpack.i.h.bf16 %v7939_v54  ;;  %v5724_v25 = vunpack.i.l.bf16 %v7939_v54  ;;  %s4474_s20 = sshll.u32 %s270_s17, 4  ;;  %s8227_s20 = int_to_ptr.vmem [resolvable:$true] %s4474_s20 }
 0x2dc   : > { %v5738_v2 = vpop.permute.xlu1 %5737  ;;  %v5765_v60 = vunpack.i.h.bf16 %v5763_v32  ;;  %v5764_v34 = vunpack.i.l.bf16 %v5763_v32  ;;  %v5730_v54 = vunpack.i.h.bf16 %v7957_v16  ;;  %s6131_s28 = scalar_lea.vmem %s8227_s20, 16  ;;  %p6138_p0 = scmp.lt.s32.totalorder %s8227_s20, %s6136_s23 }
 0x2dd   : > { %v5740_v0 = vunpack.i.h.bf16 %v5738_v2  ;;  %v5739_v5 = vunpack.i.l.bf16 %v5738_v2  ;;  %6032 = vrot.lane.b32.xlu1 %v6031_v22, %s6205_s22  ;;  %p6132_p11 = scmp.ne.s32.totalorder %s8227_s20, %s6131_s28  ;;  %p6139_p1 = scmp.lt.s32.totalorder %s6137_s15, %s6131_s28 }
 0x2de   : > { %v3766_v10 = vsel %vm1937_vm10, %v3734_v1, %v5764_v34  ;;  %v3767_v32 = vsel %vm1937_vm10, %v3735_v8, %v5765_v60  ;;  %v2361_v1 = vld [vmem:[#allocation3 + $0xf0] sm:$0xff]  ;;  %v2362_v8 = vld [vmem:[#allocation3 + $0xf8] sm:$0xff] }
 0x2df   : > { %v3863_v11 = vsel %vm3848_vm1, %v3830_v24, %v5739_v5  ;;  %v3864_v40 = vsel %vm3848_vm1, %v3831_v55, %v5740_v0  ;;  %v5768_v37 = vpop.permute.xlu0 %5767  ;;  %p6133_p12 = pnand %p6132_p11, %p6288_p5  ;;  %p6140_p2 = por %p6139_p1, %p6138_p0 }
 0x2e0   : > { %v5748_v4 = vpop.permute.xlu1 %5747  ;;  %v3896_v38 = vsel %vm3881_vm2, %v3863_v11, %v5744_v7  ;;  %v3897_v36 = vsel %vm3881_vm2, %v3864_v40, %v5745_v39  ;;  %v5770_v51 = vunpack.i.h.bf16 %v5768_v37  ;;  %v5769_v63 = vunpack.i.l.bf16 %v5768_v37 }
 0x2e1   : > { %6042 = vrot.lane.b32.xlu1 %v6041_v19, %s6206_s29  ;;  %v3921_v50 = vpack.c.bf16 %v3897_v36, %v3896_v38  ;;  %v5750_v33 = vunpack.i.h.bf16 %v5748_v4  ;;  %v5749_v31 = vunpack.i.l.bf16 %v5748_v4  ;;  %v5729_v39 = vunpack.i.l.bf16 %v7957_v16  ;;  %p6134_p13 = pneg %p6133_p12 }
 0x2e2   : > { %v3799_v59 = vsel %vm3782_vm15, %v3766_v10, %v5769_v63  ;;  %v3800_v17 = vsel %vm3782_vm15, %v3767_v32, %v5770_v51 }
 0x2e3   : > { %4686 = vmatmul.mubr.msk.bf16.gmra.mrb[12].mxu1 %vm3963_vm4, %v3921_v50  ;;  %v5778_v42 = vpop.permute.xlu0 %5777  ;;  %v3673_v47 = vsel %vm1739_vm3, %v2360_v9, %v5750_v33  ;;  %v3672_v43 = vsel %vm1739_vm3, %v2359_v41, %v5749_v31  ;;  %p6141_p3 = pnand %p6140_p2, %p6134_p13 }
 0x2e4   : > { %v5753_v35 = vpop.permute.xlu1 %5752  ;;  %v5780_v20 = vunpack.i.h.bf16 %v5778_v42  ;;  %v5779_v22 = vunpack.i.l.bf16 %v5778_v42 }
 0x2e5   : > { %v5755_v52 = vunpack.i.h.bf16 %v5753_v35  ;;  %v5754_v56 = vunpack.i.l.bf16 %v5753_v35 }
 0x2e6   : > { %v3832_v7 = vsel %vm3815_vm0, %v3799_v59, %v5779_v22  ;;  %v3833_v24 = vsel %vm3815_vm0, %v3800_v17, %v5780_v20 }
 0x2e7   : > { %v3704_v15 = vsel %vm1805_vm6, %v3672_v43, %v5754_v56  ;;  %v3705_v21 = vsel %vm1805_vm6, %v3673_v47, %v5755_v52  ;;  %v5783_v6 = vpop.permute.xlu0 %5782 }
 0x2e8   : > { %v5773_v28 = vpop.permute.xlu1 %5772  ;;  %v5785_v2 = vunpack.i.h.bf16 %v5783_v6  ;;  %v5784_v19 = vunpack.i.l.bf16 %v5783_v6  ;;  %v3736_v0 = vsel %vm1871_vm8, %v3704_v15, %v5724_v25  ;;  %v3737_v5 = vsel %vm1871_vm8, %v3705_v21, %v5725_v18 }
 0x2e9   : > { %v5775_v57 = vunpack.i.h.bf16 %v5773_v28  ;;  %v5774_v53 = vunpack.i.l.bf16 %v5773_v28  ;;  %v3768_v4 = vsel %vm1937_vm10, %v3736_v0, %v5729_v39  ;;  %v3769_v38 = vsel %vm1937_vm10, %v3737_v5, %v5730_v54 }
 0x2ea   : > { %v3865_v13 = vsel %vm3848_vm1, %v3832_v7, %v5784_v19  ;;  %v3866_v29 = vsel %vm3848_vm1, %v3833_v24, %v5785_v2 }
 0x2eb   : > { %v5798_v55 = vpop.permute.xlu0 %5797  ;;  %v3801_v42 = vsel %vm3782_vm15, %v3768_v4, %v5774_v53  ;;  %v3802_v30 = vsel %vm3782_vm15, %v3769_v38, %v5775_v57 }
 0x2ec   : > { %v5800_v11 = vunpack.i.h.bf16 %v5798_v55  ;;  %v5799_v40 = vunpack.i.l.bf16 %v5798_v55  ;;  %v5788_v37 = vpop.permute.xlu1 %5787 }
 0x2ed   : > { %v5790_v50 = vunpack.i.h.bf16 %v5788_v37  ;;  %v5789_v14 = vunpack.i.l.bf16 %v5788_v37 }
 0x2ee   : > { %v3898_v16 = vsel %vm3881_vm2, %v3865_v13, %v5799_v40  ;;  %v3899_v36 = vsel %vm3881_vm2, %v3866_v29, %v5800_v11  ;;  %v2363_v11 = vld [vmem:[#allocation3 + $0x108] sm:$0xff]  ;;  %v2364_v40 = vld [vmem:[#allocation3 + $0x110] sm:$0xff] }
 0x2ef   : > { %v3922_v45 = vpack.c.bf16 %v3899_v36, %v3898_v16  ;;  %v5808_v33 = vpop.permute.xlu0 %5807  ;;  %v3834_v12 = vsel %vm3815_vm0, %v3801_v42, %v5789_v14  ;;  %v3835_v35 = vsel %vm3815_vm0, %v3802_v30, %v5790_v50 }
 0x2f0   : > { %v5810_v31 = vunpack.i.h.bf16 %v5808_v33  ;;  %v5809_v44 = vunpack.i.l.bf16 %v5808_v33  ;;  %v5793_v49 = vpop.permute.xlu1 %5792 }
 0x2f1   : > { %v5795_v48 = vunpack.i.h.bf16 %v5793_v49  ;;  %v5794_v27 = vunpack.i.l.bf16 %v5793_v49  ;;  %4689 = vmatprep.mubr.msk.bf16.mxu1 %vm3963_vm4, %v3922_v45 }
 0x2f3   : > { %v3867_v60 = vsel %vm3848_vm1, %v3834_v12, %v5794_v27  ;;  %v3868_v34 = vsel %vm3848_vm1, %v3835_v35, %v5795_v48  ;;  %v5818_v41 = vpop.permute.xlu0 %5817 }
 0x2f4   : > { %v5803_v9 = vpop.permute.xlu1 %5802  ;;  %v3900_v52 = vsel %vm3881_vm2, %v3867_v60, %v5809_v44  ;;  %v3901_v56 = vsel %vm3881_vm2, %v3868_v34, %v5810_v31  ;;  %v5820_v18 = vunpack.i.h.bf16 %v5818_v41  ;;  %v5819_v25 = vunpack.i.l.bf16 %v5818_v41 }
 0x2f5   : > { %v3923_v51 = vpack.c.bf16 %v3901_v56, %v3900_v52  ;;  %v5805_v22 = vunpack.i.h.bf16 %v5803_v9  ;;  %v5804_v15 = vunpack.i.l.bf16 %v5803_v9 }
 0x2f7   : > { %4690 = vmatmul.mubr.msk.bf16.gmra.mrb[16].mxu1 %vm3963_vm4, %v3923_v51  ;;  %v5828_v63 = vpop.permute.xlu0 %5827  ;;  %v3675_v28 = vsel %vm1739_vm3, %v2362_v8, %v5805_v22  ;;  %v3674_v10 = vsel %vm1739_vm3, %v2361_v1, %v5804_v15 }
 0x2f8   : > { %v5813_v47 = vpop.permute.xlu1 %5812  ;;  %v5830_v32 = vunpack.i.h.bf16 %v5828_v63  ;;  %v5829_v2 = vunpack.i.l.bf16 %v5828_v63  ;;  %v3706_v39 = vsel %vm1805_vm6, %v3674_v10, %v5819_v25  ;;  %v3707_v7 = vsel %vm1805_vm6, %v3675_v28, %v5820_v18 }
 0x2f9   : > { %v5815_v59 = vunpack.i.h.bf16 %v5813_v47  ;;  %v5814_v17 = vunpack.i.l.bf16 %v5813_v47 }
 0x2fa   : > { %v3738_v57 = vsel %vm1871_vm8, %v3706_v39, %v5829_v2  ;;  %v3739_v53 = vsel %vm1871_vm8, %v3707_v7, %v5830_v32 }
 0x2fb   : > { %v5838_v43 = vpop.permute.xlu0 %5837  ;;  %v3677_v4 = vsel %vm1739_vm3, %v2364_v40, %v5815_v59  ;;  %v3676_v38 = vsel %vm1739_vm3, %v2363_v11, %v5814_v17 }
 0x2fc   : > { %v5823_v20 = vpop.permute.xlu1 %5822  ;;  %v5840_v5 = vunpack.i.h.bf16 %v5838_v43  ;;  %v5839_v54 = vunpack.i.l.bf16 %v5838_v43 }
 0x2fd   : > { %v5825_v24 = vunpack.i.h.bf16 %v5823_v20  ;;  %v5824_v55 = vunpack.i.l.bf16 %v5823_v20 }
 0x2fe   : > { %v3770_v14 = vsel %vm1937_vm10, %v3738_v57, %v5839_v54  ;;  %v3771_v45 = vsel %vm1937_vm10, %v3739_v53, %v5840_v5 }
 0x2ff   : > { %v5848_v21 = vpop.permute.xlu0 %5847  ;;  %v3708_v44 = vsel %vm1805_vm6, %v3676_v38, %v5824_v55  ;;  %v3709_v49 = vsel %vm1805_vm6, %v3677_v4, %v5825_v24 }
 0x300   : > { %v5833_v6 = vpop.permute.xlu1 %5832  ;;  %v5850_v37 = vunpack.i.h.bf16 %v5848_v21  ;;  %v5849_v13 = vunpack.i.l.bf16 %v5848_v21 }
 0x301   : > { %v5835_v42 = vunpack.i.h.bf16 %v5833_v6  ;;  %v5834_v30 = vunpack.i.l.bf16 %v5833_v6 }
 0x302   : > { %v3803_v48 = vsel %vm3782_vm15, %v3770_v14, %v5849_v13  ;;  %v3804_v27 = vsel %vm3782_vm15, %v3771_v45, %v5850_v37  ;;  %v2365_v45 = vld [vmem:[#allocation3 + $0x120] sm:$0xff] }
 0x303   : > { %v5858_v19 = vpop.permute.xlu0 %5857  ;;  %v3740_v6 = vsel %vm1871_vm8, %v3708_v44, %v5834_v30  ;;  %v3741_v18 = vsel %vm1871_vm8, %v3709_v49, %v5835_v42 }
 0x304   : > { %v5843_v0 = vpop.permute.xlu1 %5842  ;;  %v5860_v16 = vunpack.i.h.bf16 %v5858_v19  ;;  %v5859_v36 = vunpack.i.l.bf16 %v5858_v19 }
 0x305   : > { %v5845_v12 = vunpack.i.h.bf16 %v5843_v0  ;;  %v5844_v35 = vunpack.i.l.bf16 %v5843_v0 }
 0x306   : > { %v3836_v34 = vsel %vm3815_vm0, %v3803_v48, %v5859_v36  ;;  %v3837_v41 = vsel %vm3815_vm0, %v3804_v27, %v5860_v16 }
 0x307   : > { %v5868_v29 = vpop.permute.xlu0 %5867  ;;  %v3772_v8 = vsel %vm1937_vm10, %v3740_v6, %v5844_v35  ;;  %v3773_v28 = vsel %vm1937_vm10, %v3741_v18, %v5845_v12 }
 0x308   : > { %v5853_v50 = vpop.permute.xlu1 %5852  ;;  %v5870_v33 = vunpack.i.h.bf16 %v5868_v29  ;;  %v5869_v31 = vunpack.i.l.bf16 %v5868_v29 }
 0x309   : > { %v5855_v47 = vunpack.i.h.bf16 %v5853_v50  ;;  %v5854_v43 = vunpack.i.l.bf16 %v5853_v50 }
 0x30a   : > { %v3869_v51 = vsel %vm3848_vm1, %v3836_v34, %v5869_v31  ;;  %v3870_v63 = vsel %vm3848_vm1, %v3837_v41, %v5870_v33  ;;  %v2366_v33 = vld [vmem:[#allocation3 + $0x128] sm:$0xff] }
 0x30b   : > { %v5878_v60 = vpop.permute.xlu0 %5877  ;;  %v3805_v19 = vsel %vm3782_vm15, %v3772_v8, %v5854_v43  ;;  %v3806_v59 = vsel %vm3782_vm15, %v3773_v28, %v5855_v47 }
 0x30c   : > { %v5880_v9 = vunpack.i.h.bf16 %v5878_v60  ;;  %v5879_v52 = vunpack.i.l.bf16 %v5878_v60  ;;  %v5863_v56 = vpop.permute.xlu1 %5862 }
 0x30d   : > { %v5865_v15 = vunpack.i.h.bf16 %v5863_v56  ;;  %v5864_v21 = vunpack.i.l.bf16 %v5863_v56 }
 0x30e   : > { %v3902_v20 = vsel %vm3881_vm2, %v3869_v51, %v5879_v52  ;;  %v3903_v22 = vsel %vm3881_vm2, %v3870_v63, %v5880_v9 }
 0x30f   : > { %v3924_v25 = vpack.c.bf16 %v3903_v22, %v3902_v20  ;;  %v5888_v1 = vpop.permute.xlu0 %5887  ;;  %v3838_v5 = vsel %vm3815_vm0, %v3805_v19, %v5864_v21  ;;  %v3839_v54 = vsel %vm3815_vm0, %v3806_v59, %v5865_v15 }
 0x310   : > { %v5890_v10 = vunpack.i.h.bf16 %v5888_v1  ;;  %v5889_v32 = vunpack.i.l.bf16 %v5888_v1  ;;  %v5873_v2 = vpop.permute.xlu1 %5872 }
 0x311   : > { %v5875_v17 = vunpack.i.h.bf16 %v5873_v2  ;;  %v5874_v0 = vunpack.i.l.bf16 %v5873_v2  ;;  %4693 = vmatprep.mubr.msk.bf16.mxu1 %vm3963_vm4, %v3924_v25 }
 0x313   : > { %v3871_v39 = vsel %vm3848_vm1, %v3838_v5, %v5874_v0  ;;  %v3872_v7 = vsel %vm3848_vm1, %v3839_v54, %v5875_v17  ;;  %v5898_v24 = vpop.permute.xlu0 %5897 }
 0x314   : > { %v5883_v55 = vpop.permute.xlu1 %5882  ;;  %v3904_v57 = vsel %vm3881_vm2, %v3871_v39, %v5889_v32  ;;  %v3905_v53 = vsel %vm3881_vm2, %v3872_v7, %v5890_v10  ;;  %v5900_v50 = vunpack.i.h.bf16 %v5898_v24  ;;  %v5899_v14 = vunpack.i.l.bf16 %v5898_v24 }
 0x315   : > { %v3925_v11 = vpack.c.bf16 %v3905_v53, %v3904_v57  ;;  %v5885_v4 = vunpack.i.h.bf16 %v5883_v55  ;;  %v5884_v38 = vunpack.i.l.bf16 %v5883_v55 }
 0x317   : > { %4694 = vmatmul.mubr.msk.bf16.gmra.mrb[20].mxu1 %vm3963_vm4, %v3925_v11  ;;  %v5908_v40 = vpop.permute.xlu0 %5907  ;;  %v3679_v31 = vsel %vm1739_vm3, %v2366_v33, %v5885_v4  ;;  %v3678_v44 = vsel %vm1739_vm3, %v2365_v45, %v5884_v38 }
 0x318   : > { %v5893_v37 = vpop.permute.xlu1 %5892  ;;  %v5910_v49 = vunpack.i.h.bf16 %v5908_v40  ;;  %v5909_v42 = vunpack.i.l.bf16 %v5908_v40  ;;  %v3710_v34 = vsel %vm1805_vm6, %v3678_v44, %v5899_v14  ;;  %v3711_v41 = vsel %vm1805_vm6, %v3679_v31, %v5900_v50 }
 0x319   : > { %v5895_v48 = vunpack.i.h.bf16 %v5893_v37  ;;  %v5894_v27 = vunpack.i.l.bf16 %v5893_v37 }
 0x31a   : > { %v3742_v56 = vsel %vm1871_vm8, %v3710_v34, %v5909_v42  ;;  %v3743_v51 = vsel %vm1871_vm8, %v3711_v41, %v5910_v49 }
 0x31b   : > { %v5918_v13 = vpop.permute.xlu0 %5917  ;;  %v3681_v20 = vsel %vm1739_vm3, %v7734_v46, %v5895_v48  ;;  %v3680_v22 = vsel %vm1739_vm3, %v7741_v62, %v5894_v27 }
 0x31c   : > { %v5903_v29 = vpop.permute.xlu1 %5902  ;;  %v5920_v35 = vunpack.i.h.bf16 %v5918_v13  ;;  %v5919_v60 = vunpack.i.l.bf16 %v5918_v13 }
 0x31d   : > { %v5905_v9 = vunpack.i.h.bf16 %v5903_v29  ;;  %v5904_v52 = vunpack.i.l.bf16 %v5903_v29 }
 0x31e   : > { %v3774_v18 = vsel %vm1937_vm10, %v3742_v56, %v5919_v60  ;;  %v3775_v25 = vsel %vm1937_vm10, %v3743_v51, %v5920_v35 }
 0x31f   : > { %v5928_v16 = vpop.permute.xlu0 %5927  ;;  %v3712_v28 = vsel %vm1805_vm6, %v3680_v22, %v5904_v52  ;;  %v3713_v10 = vsel %vm1805_vm6, %v3681_v20, %v5905_v9 }
 0x320   : > { %v5913_v36 = vpop.permute.xlu1 %5912  ;;  %v5930_v63 = vunpack.i.h.bf16 %v5928_v16  ;;  %v5929_v47 = vunpack.i.l.bf16 %v5928_v16 }
 0x321   : > { %v5915_v32 = vunpack.i.h.bf16 %v5913_v36  ;;  %v5914_v2 = vunpack.i.l.bf16 %v5913_v36 }
 0x322   : > { %v3807_v46 = vsel %vm3782_vm15, %v3774_v18, %v5929_v47  ;;  %v3808_v19 = vsel %vm3782_vm15, %v3775_v25, %v5930_v63 }
 0x323   : > { %v5938_v30 = vpop.permute.xlu0 %5937  ;;  %v3744_v29 = vsel %vm1871_vm8, %v3712_v28, %v5914_v2  ;;  %v3745_v4 = vsel %vm1871_vm8, %v3713_v10, %v5915_v32 }
 0x324   : > { %v5923_v12 = vpop.permute.xlu1 %5922  ;;  %v5940_v15 = vunpack.i.h.bf16 %v5938_v30  ;;  %v5939_v21 = vunpack.i.l.bf16 %v5938_v30 }
 0x325   : > { %v5925_v62 = vunpack.i.h.bf16 %v5923_v12  ;;  %v5924_v59 = vunpack.i.l.bf16 %v5923_v12 }
 0x326   : > { %v3840_v0 = vsel %vm3815_vm0, %v3807_v46, %v5939_v21  ;;  %v3841_v5 = vsel %vm3815_vm0, %v3808_v19, %v5940_v15 }
 0x327   : > { %v5948_v43 = vpop.permute.xlu0 %5947  ;;  %v3776_v36 = vsel %vm1937_vm10, %v3744_v29, %v5924_v59  ;;  %v3777_v50 = vsel %vm1937_vm10, %v3745_v4, %v5925_v62 }
 0x328   : > { %v5933_v6 = vpop.permute.xlu1 %5932  ;;  %v5950_v1 = vunpack.i.h.bf16 %v5948_v43  ;;  %v5949_v8 = vunpack.i.l.bf16 %v5948_v43 }
 0x329   : > { %v5935_v57 = vunpack.i.h.bf16 %v5933_v6  ;;  %v5934_v53 = vunpack.i.l.bf16 %v5933_v6 }
 0x32a   : > { %v3873_v24 = vsel %vm3848_vm1, %v3840_v0, %v5949_v8  ;;  %v3874_v55 = vsel %vm3848_vm1, %v3841_v5, %v5950_v1 }
 0x32b   : > { %v5958_v17 = vpop.permute.xlu0 %5957  ;;  %v3809_v31 = vsel %vm3782_vm15, %v3776_v36, %v5934_v53  ;;  %v3810_v44 = vsel %vm3782_vm15, %v3777_v50, %v5935_v57 }
 0x32c   : > { %v5960_v54 = vunpack.i.h.bf16 %v5958_v17  ;;  %v5959_v39 = vunpack.i.l.bf16 %v5958_v17  ;;  %v5943_v7 = vpop.permute.xlu1 %5942 }
 0x32d   : > { %v5945_v37 = vunpack.i.h.bf16 %v5943_v7  ;;  %v5944_v13 = vunpack.i.l.bf16 %v5943_v7 }
 0x32e   : > { %v3906_v11 = vsel %vm3881_vm2, %v3873_v24, %v5959_v39  ;;  %v3907_v40 = vsel %vm3881_vm2, %v3874_v55, %v5960_v54 }
 0x32f   : > { %v3926_v38 = vpack.c.bf16 %v3907_v40, %v3906_v11  ;;  %v5968_v16 = vpop.permute.xlu0 %5967  ;;  %v3842_v30 = vsel %vm3815_vm0, %v3809_v31, %v5944_v13  ;;  %v3843_v48 = vsel %vm3815_vm0, %v3810_v44, %v5945_v37 }
 0x330   : > { %v5970_v14 = vunpack.i.h.bf16 %v5968_v16  ;;  %v5969_v45 = vunpack.i.l.bf16 %v5968_v16  ;;  %v5953_v33 = vpop.permute.xlu1 %5952 }
 0x331   : > { %v5955_v49 = vunpack.i.h.bf16 %v5953_v33  ;;  %v5954_v42 = vunpack.i.l.bf16 %v5953_v33  ;;  %4697 = vmatprep.mubr.msk.bf16.mxu1 %vm3963_vm4, %v3926_v38 }
 0x333   : > { %v3875_v27 = vsel %vm3848_vm1, %v3842_v30, %v5954_v42  ;;  %v3876_v12 = vsel %vm3848_vm1, %v3843_v48, %v5955_v49  ;;  %v5978_v35 = vpop.permute.xlu0 %5977 }
 0x334   : > { %v5963_v60 = vpop.permute.xlu1 %5962  ;;  %v3908_v34 = vsel %vm3881_vm2, %v3875_v27, %v5969_v45  ;;  %v3909_v41 = vsel %vm3881_vm2, %v3876_v12, %v5970_v14  ;;  %v5980_v21 = vunpack.i.h.bf16 %v5978_v35  ;;  %v5979_v6 = vunpack.i.l.bf16 %v5978_v35 }
 0x335   : > { %v3927_v9 = vpack.c.bf16 %v3909_v41, %v3908_v34  ;;  %v5965_v20 = vunpack.i.h.bf16 %v5963_v60  ;;  %v5964_v22 = vunpack.i.l.bf16 %v5963_v60 }
 0x337   : > { %4698 = vmatmul.mubr.msk.bf16.gmra.mrb[24].mxu1 %vm3963_vm4, %v3927_v9  ;;  %v5988_v52 = vpop.permute.xlu0 %5987  ;;  %v3683_v25 = vsel %vm1739_vm3, %v7795_v58, %v5965_v20  ;;  %v3682_v1 = vsel %vm1739_vm3, %v7801_v3, %v5964_v22 }
 0x338   : > { %v5973_v56 = vpop.permute.xlu1 %5972  ;;  %v5990_v8 = vunpack.i.h.bf16 %v5988_v52  ;;  %v5989_v28 = vunpack.i.l.bf16 %v5988_v52  ;;  %v3714_v62 = vsel %vm1805_vm6, %v3682_v1, %v5979_v6  ;;  %v3715_v59 = vsel %vm1805_vm6, %v3683_v25, %v5980_v21 }
 0x339   : > { %v5975_v55 = vunpack.i.h.bf16 %v5973_v56  ;;  %v5974_v57 = vunpack.i.l.bf16 %v5973_v56 }
 0x33a   : > { %v3746_v54 = vsel %vm1871_vm8, %v3714_v62, %v5989_v28  ;;  %v3747_v58 = vsel %vm1871_vm8, %v3715_v59, %v5990_v8 }
 0x33b   : > { %v5998_v51 = vpop.permute.xlu0 %5997  ;;  %v3685_v48 = vsel %vm1739_vm3, %v7847_v23, %v5975_v55  ;;  %v3684_v27 = vsel %vm1739_vm3, %v7855_v26, %v5974_v57  ;;  %vm6208_vm3 = vmmov 0  }
 0x33c   : > { %v5983_v63 = vpop.permute.xlu1 %5982  ;;  %v6000_v10 = vunpack.i.h.bf16 %v5998_v51  ;;  %v5999_v32 = vunpack.i.l.bf16 %v5998_v51  ;;  %4707 = vmatprep.mubr.msk.bf16.mxu0 %vm6208_vm3, %v8315_v61 }
 0x33d   : > { %v5985_v16 = vunpack.i.h.bf16 %v5983_v63  ;;  %v5984_v36 = vunpack.i.l.bf16 %v5983_v63 }
 0x33e   : > { %v3778_v7 = vsel %vm1937_vm10, %v3746_v54, %v5999_v32  ;;  %v3779_v24 = vsel %vm1937_vm10, %v3747_v58, %v6000_v10  ;;  %v8146_v32 = vld [vmem:[%s8271_s4] ss:$0 sm:$0xff] }
 0x33f   : > { %v6008_v47 = vpop.permute.xlu0 %6007  ;;  %v3716_v34 = vsel %vm1805_vm6, %v3684_v27, %v5984_v36  ;;  %v3717_v41 = vsel %vm1805_vm6, %v3685_v48, %v5985_v16 }
 0x340   : > { %v5993_v43 = vpop.permute.xlu1 %5992  ;;  %v6010_v2 = vunpack.i.h.bf16 %v6008_v47  ;;  %v6009_v46 = vunpack.i.l.bf16 %v6008_v47 }
 0x341   : > { %v5995_v45 = vunpack.i.h.bf16 %v5993_v43  ;;  %v5994_v33 = vunpack.i.l.bf16 %v5993_v43 }
 0x342   : > { %v3811_v53 = vsel %vm3782_vm15, %v3778_v7, %v6009_v46  ;;  %v3812_v11 = vsel %vm3782_vm15, %v3779_v24, %v6010_v2 }
 0x343   : > { %v6018_v15 = vpop.permute.xlu0 %6017  ;;  %v3748_v56 = vsel %vm1871_vm8, %v3716_v34, %v5994_v33  ;;  %v3749_v51 = vsel %vm1871_vm8, %v3717_v41, %v5995_v45 }
 0x344   : > { %v6003_v18 = vpop.permute.xlu1 %6002  ;;  %v6020_v17 = vunpack.i.h.bf16 %v6018_v15  ;;  %v6019_v0 = vunpack.i.l.bf16 %v6018_v15 }
 0x345   : > { %v6005_v49 = vunpack.i.h.bf16 %v6003_v18  ;;  %v6004_v42 = vunpack.i.l.bf16 %v6003_v18 }
 0x346   : > { %v3844_v37 = vsel %vm3815_vm0, %v3811_v53, %v6019_v0  ;;  %v3845_v13 = vsel %vm3815_vm0, %v3812_v11, %v6020_v17 }
 0x347   : > { %v6028_v19 = vpop.permute.xlu0 %6027  ;;  %v3780_v47 = vsel %vm1937_vm10, %v3748_v56, %v6004_v42  ;;  %v3781_v26 = vsel %vm1937_vm10, %v3749_v51, %v6005_v49 }
 0x348   : > { %v6013_v5 = vpop.permute.xlu1 %6012  ;;  %v6030_v39 = vunpack.i.h.bf16 %v6028_v19  ;;  %v6029_v3 = vunpack.i.l.bf16 %v6028_v19 }
 0x349   : > { %v6015_v12 = vunpack.i.h.bf16 %v6013_v5  ;;  %v6014_v35 = vunpack.i.l.bf16 %v6013_v5 }
 0x34a   : > { %v3877_v50 = vsel %vm3848_vm1, %v3844_v37, %v6029_v3  ;;  %v3878_v14 = vsel %vm3848_vm1, %v3845_v13, %v6030_v39 }
 0x34b   : > { %v6038_v40 = vpop.permute.xlu0 %6037  ;;  %v3813_v43 = vsel %vm3782_vm15, %v3780_v47, %v6014_v35  ;;  %v3814_v20 = vsel %vm3782_vm15, %v3781_v26, %v6015_v12 }
 0x34c   : > { %v6040_v29 = vunpack.i.h.bf16 %v6038_v40  ;;  %v6039_v4 = vunpack.i.l.bf16 %v6038_v40  ;;  %v6023_v38 = vpop.permute.xlu1 %6022 }
 0x34d   : > { %v6025_v9 = vunpack.i.h.bf16 %v6023_v38  ;;  %v6024_v52 = vunpack.i.l.bf16 %v6023_v38 }
 0x34e   : > { %v3910_v31 = vsel %vm3881_vm2, %v3877_v50, %v6039_v4  ;;  %v3911_v44 = vsel %vm3881_vm2, %v3878_v14, %v6040_v29 }
 0x34f   : > { %v3928_v30 = vpack.c.bf16 %v3911_v44, %v3910_v31  ;;  %v3846_v15 = vsel %vm3815_vm0, %v3813_v43, %v6024_v52  ;;  %v3847_v21 = vsel %vm3815_vm0, %v3814_v20, %v6025_v9 }
 0x350   : > { %v6033_v60 = vpop.permute.xlu1 %6032 }
 0x351   : > { %4701 = vmatprep.mubr.msk.bf16.mxu1 %vm3963_vm4, %v3928_v30  ;;  %v6035_v63 = vunpack.i.h.bf16 %v6033_v60  ;;  %v6034_v23 = vunpack.i.l.bf16 %v6033_v60 }
 0x353   : > { %v3879_v25 = vsel %vm3848_vm1, %v3846_v15, %v6034_v23  ;;  %v3880_v1 = vsel %vm3848_vm1, %v3847_v21, %v6035_v63 }
 0x354   : > { %v6043_v22 = vpop.permute.xlu1 %6042 }
 0x355   : > { %v6045_v6 = vunpack.i.h.bf16 %v6043_v22  ;;  %v6044_v18 = vunpack.i.l.bf16 %v6043_v22 }
 0x357   : > { %v3912_v8 = vsel %vm3881_vm2, %v3879_v25, %v6044_v18  ;;  %v3913_v28 = vsel %vm3881_vm2, %v3880_v1, %v6045_v6 }
 0x358   : > { %v3929_v10 = vpack.c.bf16 %v3913_v28, %v3912_v8 }
 0x35a   : > { %4702 = vmatmul.mubr.msk.bf16.gmra.mrb[28].mxu1 %vm3963_vm4, %v3929_v10 }
 0x35e   : > { %v4675_v2 = vpop.f32.mrb[0].mxu1 }
 0x35f   : > { %v4059_v46 = vadd.f32 %v4675_v2, %v8146_v32  ;;  %v4050_v19 = vpop.f32.mrb[1].mxu1 }
 0x360   : > { %v4051_v62 = vadd.f32 %v8146_v32, %v4050_v19  ;;  %v4676_v59 = vpop.f32.mrb[2].mxu1 }
 0x361   : > { %v4211_v17 = vmul.f32 0.70710677, %v4059_v46  ;;  %v4062_v0 = vadd.f32 %v4676_v59, %v8146_v32  ;;  %v4053_v5 = vpop.f32.mrb[3].mxu1  ;;  %v4179_v37 = vmul.f32 0.5, %v4059_v46 }
 0x362   : > { %v4209_v54 = vmul.f32 0.70710677, %v4051_v62  ;;  %v4054_v58 = vadd.f32 %v8146_v32, %v4053_v5  ;;  %v4177_v53 = vmul.f32 0.5, %v4051_v62 }
 0x363   : > { %6055 = verf.f32 %v4211_v17  ;;  %v4212_v39 = vmul.f32 0.70710677, %v4062_v0  ;;  %v4180_v36 = vmul.f32 0.5, %v4062_v0 }
 0x364   : > { %6057 = verf.f32 %v4209_v54  ;;  %v4210_v3 = vmul.f32 0.70710677, %v4054_v58  ;;  %v4178_v4 = vmul.f32 0.5, %v4054_v58 }
 0x365   : > { %6059 = verf.f32 %v4212_v39 }
 0x366   : > { %6061 = verf.f32 %v4210_v3 }
 0x36d   : > { %v6056_v7 = vpop.eup %6055 }
 0x36e   : > { %v6058_v24 = vpop.eup %6057  ;;  %v4275_v57 = vadd.f32 1.0, %v6056_v7 }
 0x36f   : > { %v6060_v55 = vpop.eup %6059  ;;  %v4273_v11 = vadd.f32 1.0, %v6058_v24 }
 0x370   : > { %v6062_v40 = vpop.eup %6061  ;;  %v4276_v29 = vadd.f32 1.0, %v6060_v55  ;;  %v4307_v16 = vmul.f32 %v4275_v57, %v4179_v37 }
 0x371   : > { %v4305_v13 = vmul.f32 %v4273_v11, %v4177_v53  ;;  %v4274_v38 = vadd.f32 1.0, %v6062_v40 }
 0x372   : > { %v4308_v45 = vmul.f32 %v4276_v29, %v4180_v36  ;;  %v4340_v44 = vsel %vm1805_vm6, %v4307_v16, 0.0  ;;  %v6054_v29 = vld [vmem:[%s8272_s5] sm:$0xff]  }
 0x373   : > { %v4306_v50 = vmul.f32 %v4274_v38, %v4178_v4  ;;  %v4337_v14 = vsel %vm1805_vm6, %v4305_v13, 0.0  ;;  %4706 = vmatpush3.bf16.msra.mxu0 %v6054_v29 }
 0x374   : > { %v4342_v42 = vsel %vm1805_vm6, %v4308_v45, 0.0 }
 0x375   : > { %v4338_v33 = vsel %vm1805_vm6, %v4306_v50, 0.0 }
 0x376   : > { %v4339_v31 = vadd.f32 %v4338_v33, %v4337_v14 }
 0x378   : > { %v4341_v49 = vadd.f32 %v4340_v44, %v4339_v31 }
 0x37a   : > { %v4343_v30 = vadd.f32 %v4342_v42, %v4341_v49 }
 0x37e   : > { %v4679_v48 = vpop.f32.mrb[4].mxu1 }
 0x37f   : > { %v4075_v27 = vadd.f32 %v4679_v48, %v8146_v32  ;;  %v4066_v12 = vpop.f32.mrb[5].mxu1 }
 0x380   : > { %v4067_v35 = vadd.f32 %v8146_v32, %v4066_v12  ;;  %v4680_v60 = vpop.f32.mrb[6].mxu1 }
 0x381   : > { %v4215_v34 = vmul.f32 0.70710677, %v4075_v27  ;;  %v4078_v41 = vadd.f32 %v4680_v60, %v8146_v32  ;;  %v4069_v9 = vpop.f32.mrb[7].mxu1  ;;  %v4183_v21 = vmul.f32 0.5, %v4075_v27 }
 0x382   : > { %v4213_v52 = vmul.f32 0.70710677, %v4067_v35  ;;  %v4070_v56 = vadd.f32 %v8146_v32, %v4069_v9  ;;  %v4181_v20 = vmul.f32 0.5, %v4067_v35 }
 0x383   : > { %6063 = verf.f32 %v4215_v34  ;;  %v4216_v51 = vmul.f32 0.70710677, %v4078_v41  ;;  %v4184_v10 = vmul.f32 0.5, %v4078_v41 }
 0x384   : > { %6065 = verf.f32 %v4213_v52  ;;  %v4214_v63 = vmul.f32 0.70710677, %v4070_v56  ;;  %v4182_v25 = vmul.f32 0.5, %v4070_v56 }
 0x385   : > { %6067 = verf.f32 %v4216_v51 }
 0x386   : > { %6069 = verf.f32 %v4214_v63 }
 0x38d   : > { %v6064_v23 = vpop.eup %6063 }
 0x38e   : > { %v6066_v47 = vpop.eup %6065  ;;  %v4279_v43 = vadd.f32 1.0, %v6064_v23 }
 0x38f   : > { %v6068_v26 = vpop.eup %6067  ;;  %v4277_v22 = vadd.f32 1.0, %v6066_v47 }
 0x390   : > { %v6070_v15 = vpop.eup %6069  ;;  %v4280_v18 = vadd.f32 1.0, %v6068_v26  ;;  %v4311_v8 = vmul.f32 %v4279_v43, %v4183_v21 }
 0x391   : > { %v4309_v6 = vmul.f32 %v4277_v22, %v4181_v20  ;;  %v4278_v1 = vadd.f32 1.0, %v6070_v15 }
 0x392   : > { %v4312_v19 = vmul.f32 %v4280_v18, %v4184_v10  ;;  %v4348_v17 = vsel %vm1805_vm6, %v4311_v8, 0.0 }
 0x393   : > { %v4344_v28 = vsel %vm1805_vm6, %v4309_v6, 0.0  ;;  %v4310_v2 = vmul.f32 %v4278_v1, %v4182_v25 }
 0x394   : > { %v4345_v46 = vadd.f32 %v4344_v28, %v4343_v30  ;;  %v4350_v5 = vsel %vm1805_vm6, %v4312_v19, 0.0 }
 0x395   : > { %v4346_v62 = vsel %vm1805_vm6, %v4310_v2, 0.0 }
 0x396   : > { %v4347_v59 = vadd.f32 %v4346_v62, %v4345_v46 }
 0x398   : > { %v4349_v0 = vadd.f32 %v4348_v17, %v4347_v59 }
 0x39a   : > { %v4351_v54 = vadd.f32 %v4350_v5, %v4349_v0 }
 0x39e   : > { %v4683_v58 = vpop.f32.mrb[8].mxu1 }
 0x39f   : > { %v4091_v39 = vadd.f32 %v4683_v58, %v8146_v32  ;;  %v4082_v3 = vpop.f32.mrb[9].mxu1 }
 0x3a0   : > { %v4083_v7 = vadd.f32 %v8146_v32, %v4082_v3  ;;  %v4684_v24 = vpop.f32.mrb[10].mxu1 }
 0x3a1   : > { %v4219_v55 = vmul.f32 0.70710677, %v4091_v39  ;;  %v4094_v57 = vadd.f32 %v4684_v24, %v8146_v32  ;;  %v4085_v53 = vpop.f32.mrb[11].mxu1  ;;  %v4187_v33 = vmul.f32 0.5, %v4091_v39 }
 0x3a2   : > { %v4217_v11 = vmul.f32 0.70710677, %v4083_v7  ;;  %v4086_v40 = vadd.f32 %v8146_v32, %v4085_v53  ;;  %v4185_v50 = vmul.f32 0.5, %v4083_v7 }
 0x3a3   : > { %6071 = verf.f32 %v4219_v55  ;;  %v4220_v37 = vmul.f32 0.70710677, %v4094_v57  ;;  %v4188_v27 = vmul.f32 0.5, %v4094_v57 }
 0x3a4   : > { %6073 = verf.f32 %v4217_v11  ;;  %v4218_v13 = vmul.f32 0.70710677, %v4086_v40  ;;  %v4186_v49 = vmul.f32 0.5, %v4086_v40 }
 0x3a5   : > { %6075 = verf.f32 %v4220_v37 }
 0x3a6   : > { %6077 = verf.f32 %v4218_v13 }
 0x3ad   : > { %v6072_v4 = vpop.eup %6071 }
 0x3ae   : > { %v6074_v38 = vpop.eup %6073  ;;  %v4283_v36 = vadd.f32 1.0, %v6072_v4 }
 0x3af   : > { %v6076_v16 = vpop.eup %6075  ;;  %v4281_v14 = vadd.f32 1.0, %v6074_v38 }
 0x3b0   : > { %v6078_v45 = vpop.eup %6077  ;;  %v4284_v44 = vadd.f32 1.0, %v6076_v16  ;;  %v4315_v30 = vmul.f32 %v4283_v36, %v4187_v33 }
 0x3b1   : > { %v4313_v31 = vmul.f32 %v4281_v14, %v4185_v50  ;;  %v4282_v42 = vadd.f32 1.0, %v6078_v45 }
 0x3b2   : > { %v4316_v60 = vmul.f32 %v4284_v44, %v4188_v27  ;;  %v4356_v52 = vsel %vm1805_vm6, %v4315_v30, 0.0 }
 0x3b3   : > { %v4352_v48 = vsel %vm1805_vm6, %v4313_v31, 0.0  ;;  %v4314_v12 = vmul.f32 %v4282_v42, %v4186_v49 }
 0x3b4   : > { %v4353_v35 = vadd.f32 %v4352_v48, %v4351_v54  ;;  %v4358_v26 = vsel %vm1805_vm6, %v4316_v60, 0.0 }
 0x3b5   : > { %v4354_v34 = vsel %vm1805_vm6, %v4314_v12, 0.0 }
 0x3b6   : > { %v4355_v41 = vadd.f32 %v4354_v34, %v4353_v35  ;;  %v4687_v9 = vpop.f32.mrb[12].mxu1 }
 0x3b7   : > { %v4107_v56 = vadd.f32 %v4687_v9, %v8146_v32  ;;  %v4098_v51 = vpop.f32.mrb[13].mxu1 }
 0x3b8   : > { %v4357_v63 = vadd.f32 %v4356_v52, %v4355_v41  ;;  %v4099_v23 = vadd.f32 %v8146_v32, %v4098_v51  ;;  %v4688_v47 = vpop.f32.mrb[14].mxu1 }
 0x3b9   : > { %v4223_v43 = vmul.f32 0.70710677, %v4107_v56  ;;  %v4110_v20 = vadd.f32 %v4688_v47, %v8146_v32  ;;  %v4101_v22 = vpop.f32.mrb[15].mxu1  ;;  %v4191_v62 = vmul.f32 0.5, %v4107_v56 }
 0x3ba   : > { %v4221_v15 = vmul.f32 0.70710677, %v4099_v23  ;;  %v4359_v21 = vadd.f32 %v4358_v26, %v4357_v63  ;;  %v4102_v6 = vadd.f32 %v8146_v32, %v4101_v22  ;;  %v4189_v2 = vmul.f32 0.5, %v4099_v23 }
 0x3bb   : > { %6079 = verf.f32 %v4223_v43  ;;  %v4224_v18 = vmul.f32 0.70710677, %v4110_v20  ;;  %v4192_v54 = vmul.f32 0.5, %v4110_v20 }
 0x3bc   : > { %6081 = verf.f32 %v4221_v15  ;;  %v4222_v25 = vmul.f32 0.70710677, %v4102_v6  ;;  %v4190_v0 = vmul.f32 0.5, %v4102_v6 }
 0x3bd   : > { %6083 = verf.f32 %v4224_v18 }
 0x3be   : > { %6085 = verf.f32 %v4222_v25 }
 0x3c5   : > { %v6080_v1 = vpop.eup %6079 }
 0x3c6   : > { %v6082_v8 = vpop.eup %6081  ;;  %v4287_v10 = vadd.f32 1.0, %v6080_v1 }
 0x3c7   : > { %v6084_v28 = vpop.eup %6083  ;;  %v4285_v46 = vadd.f32 1.0, %v6082_v8 }
 0x3c8   : > { %v6086_v19 = vpop.eup %6085  ;;  %v4288_v17 = vadd.f32 1.0, %v6084_v28  ;;  %v4319_v39 = vmul.f32 %v4287_v10, %v4191_v62 }
 0x3c9   : > { %v4317_v59 = vmul.f32 %v4285_v46, %v4189_v2  ;;  %v4286_v5 = vadd.f32 1.0, %v6086_v19 }
 0x3ca   : > { %v4691_v58 = vpop.f32.mrb[16].mxu1  ;;  %v4320_v40 = vmul.f32 %v4288_v17, %v4192_v54  ;;  %v4364_v50 = vsel %vm1805_vm6, %v4319_v39, 0.0 }
 0x3cb   : > { %v4360_v3 = vsel %vm1805_vm6, %v4317_v59, 0.0  ;;  %v4318_v7 = vmul.f32 %v4286_v5, %v4190_v0  ;;  %v4123_v24 = vadd.f32 %v4691_v58, %v8146_v32  ;;  %v4114_v55 = vpop.f32.mrb[17].mxu1 }
 0x3cc   : > { %v4361_v57 = vadd.f32 %v4360_v3, %v4359_v21  ;;  %v4115_v53 = vadd.f32 %v8146_v32, %v4114_v55  ;;  %v4692_v11 = vpop.f32.mrb[18].mxu1  ;;  %v4366_v31 = vsel %vm1805_vm6, %v4320_v40, 0.0 }
 0x3cd   : > { %v4362_v37 = vsel %vm1805_vm6, %v4318_v7, 0.0  ;;  %v4227_v13 = vmul.f32 0.70710677, %v4123_v24  ;;  %v4126_v29 = vadd.f32 %v4692_v11, %v8146_v32  ;;  %v4117_v4 = vpop.f32.mrb[19].mxu1  ;;  %v4195_v60 = vmul.f32 0.5, %v4123_v24 }
 0x3ce   : > { %v4363_v38 = vadd.f32 %v4362_v37, %v4361_v57  ;;  %v4225_v16 = vmul.f32 0.70710677, %v4115_v53  ;;  %v4118_v36 = vadd.f32 %v8146_v32, %v4117_v4  ;;  %v4193_v27 = vmul.f32 0.5, %v4115_v53 }
 0x3cf   : > { %6087 = verf.f32 %v4227_v13  ;;  %v4228_v14 = vmul.f32 0.70710677, %v4126_v29  ;;  %v4196_v63 = vmul.f32 0.5, %v4126_v29 }
 0x3d0   : > { %v4365_v45 = vadd.f32 %v4364_v50, %v4363_v38  ;;  %6089 = verf.f32 %v4225_v16  ;;  %v4226_v33 = vmul.f32 0.70710677, %v4118_v36  ;;  %v4194_v9 = vmul.f32 0.5, %v4118_v36 }
 0x3d1   : > { %6091 = verf.f32 %v4228_v14 }
 0x3d2   : > { %v4367_v44 = vadd.f32 %v4366_v31, %v4365_v45  ;;  %6093 = verf.f32 %v4226_v33 }
 0x3d9   : > { %v6088_v49 = vpop.eup %6087 }
 0x3da   : > { %v6090_v42 = vpop.eup %6089  ;;  %v4291_v48 = vadd.f32 1.0, %v6088_v49 }
 0x3db   : > { %v6092_v30 = vpop.eup %6091  ;;  %v4289_v12 = vadd.f32 1.0, %v6090_v42 }
 0x3dc   : > { %v6094_v35 = vpop.eup %6093  ;;  %v4292_v41 = vadd.f32 1.0, %v6092_v30  ;;  %v4323_v56 = vmul.f32 %v4291_v48, %v4195_v60 }
 0x3dd   : > { %v4321_v34 = vmul.f32 %v4289_v12, %v4193_v27  ;;  %v4290_v52 = vadd.f32 1.0, %v6094_v35 }
 0x3de   : > { %v4324_v26 = vmul.f32 %v4292_v41, %v4196_v63  ;;  %v4372_v20 = vsel %vm1805_vm6, %v4323_v56, 0.0 }
 0x3df   : > { %v4368_v51 = vsel %vm1805_vm6, %v4321_v34, 0.0  ;;  %v4322_v23 = vmul.f32 %v4290_v52, %v4194_v9 }
 0x3e0   : > { %v4369_v47 = vadd.f32 %v4368_v51, %v4367_v44  ;;  %v4374_v15 = vsel %vm1805_vm6, %v4324_v26, 0.0 }
 0x3e1   : > { %v4370_v61 = vsel %vm1805_vm6, %v4322_v23, 0.0 }
 0x3e2   : > { %v4371_v43 = vadd.f32 %v4370_v61, %v4369_v47 }
 0x3e4   : > { %v4373_v22 = vadd.f32 %v4372_v20, %v4371_v43 }
 0x3e6   : > { %v4375_v21 = vadd.f32 %v4374_v15, %v4373_v22 }
 0x3ea   : > { %v4695_v6 = vpop.f32.mrb[20].mxu1 }
 0x3eb   : > { %v4139_v18 = vadd.f32 %v4695_v6, %v8146_v32  ;;  %v4130_v25 = vpop.f32.mrb[21].mxu1 }
 0x3ec   : > { %v4131_v1 = vadd.f32 %v8146_v32, %v4130_v25  ;;  %v4696_v8 = vpop.f32.mrb[22].mxu1 }
 0x3ed   : > { %v4231_v28 = vmul.f32 0.70710677, %v4139_v18  ;;  %v4142_v10 = vadd.f32 %v4696_v8, %v8146_v32  ;;  %v4133_v2 = vpop.f32.mrb[23].mxu1  ;;  %v4199_v7 = vmul.f32 0.5, %v4139_v18 }
 0x3ee   : > { %v4229_v46 = vmul.f32 0.70710677, %v4131_v1  ;;  %v4134_v19 = vadd.f32 %v8146_v32, %v4133_v2  ;;  %v4197_v58 = vmul.f32 0.5, %v4131_v1 }
 0x3ef   : > { %6095 = verf.f32 %v4231_v28  ;;  %v4232_v62 = vmul.f32 0.70710677, %v4142_v10  ;;  %v4200_v37 = vmul.f32 0.5, %v4142_v10 }
 0x3f0   : > { %6097 = verf.f32 %v4229_v46  ;;  %v4230_v59 = vmul.f32 0.70710677, %v4134_v19  ;;  %v4198_v57 = vmul.f32 0.5, %v4134_v19 }
 0x3f1   : > { %6099 = verf.f32 %v4232_v62 }
 0x3f2   : > { %6101 = verf.f32 %v4230_v59 }
 0x3f9   : > { %v6096_v17 = vpop.eup %6095 }
 0x3fa   : > { %v6098_v0 = vpop.eup %6097  ;;  %v4295_v54 = vadd.f32 1.0, %v6096_v17 }
 0x3fb   : > { %v6100_v5 = vpop.eup %6099  ;;  %v4293_v39 = vadd.f32 1.0, %v6098_v0 }
 0x3fc   : > { %v6102_v3 = vpop.eup %6101  ;;  %v4296_v55 = vadd.f32 1.0, %v6100_v5  ;;  %v4327_v11 = vmul.f32 %v4295_v54, %v4199_v7 }
 0x3fd   : > { %v4325_v24 = vmul.f32 %v4293_v39, %v4197_v58  ;;  %v4294_v53 = vadd.f32 1.0, %v6102_v3 }
 0x3fe   : > { %v4328_v4 = vmul.f32 %v4296_v55, %v4200_v37  ;;  %v4380_v36 = vsel %vm1805_vm6, %v4327_v11, 0.0 }
 0x3ff   : > { %v4376_v40 = vsel %vm1805_vm6, %v4325_v24, 0.0  ;;  %v4326_v13 = vmul.f32 %v4294_v53, %v4198_v57 }
 0x400   : > { %v4377_v29 = vadd.f32 %v4376_v40, %v4375_v21  ;;  %v4382_v14 = vsel %vm1805_vm6, %v4328_v4, 0.0 }
 0x401   : > { %v4378_v38 = vsel %vm1805_vm6, %v4326_v13, 0.0 }
 0x402   : > { %v4379_v16 = vadd.f32 %v4378_v38, %v4377_v29 }
 0x404   : > { %v4381_v50 = vadd.f32 %v4380_v36, %v4379_v16 }
 0x406   : > { %v4383_v45 = vadd.f32 %v4382_v14, %v4381_v50 }
 0x40a   : > { %v4699_v33 = vpop.f32.mrb[24].mxu1 }
 0x40b   : > { %v4155_v31 = vadd.f32 %v4699_v33, %v8146_v32  ;;  %v4146_v44 = vpop.f32.mrb[25].mxu1 }
 0x40c   : > { %v4147_v49 = vadd.f32 %v8146_v32, %v4146_v44  ;;  %v4700_v42 = vpop.f32.mrb[26].mxu1 }
 0x40d   : > { %v4235_v30 = vmul.f32 0.70710677, %v4155_v31  ;;  %v4158_v48 = vadd.f32 %v4700_v42, %v8146_v32  ;;  %v4149_v27 = vpop.f32.mrb[27].mxu1  ;;  %v4203_v47 = vmul.f32 0.5, %v4155_v31 }
 0x40e   : > { %v4233_v12 = vmul.f32 0.70710677, %v4147_v49  ;;  %v4150_v35 = vadd.f32 %v8146_v32, %v4149_v27  ;;  %v4201_v51 = vmul.f32 0.5, %v4147_v49 }
 0x40f   : > { %6103 = verf.f32 %v4235_v30  ;;  %v4236_v60 = vmul.f32 0.70710677, %v4158_v48  ;;  %v4204_v21 = vmul.f32 0.5, %v4158_v48 }
 0x410   : > { %6105 = verf.f32 %v4233_v12  ;;  %v4234_v34 = vmul.f32 0.70710677, %v4150_v35  ;;  %v4202_v43 = vmul.f32 0.5, %v4150_v35 }
 0x411   : > { %6107 = verf.f32 %v4236_v60 }
 0x412   : > { %6109 = verf.f32 %v4234_v34 }
 0x419   : > { %v6104_v41 = vpop.eup %6103 }
 0x41a   : > { %v6106_v9 = vpop.eup %6105  ;;  %v4299_v56 = vadd.f32 1.0, %v6104_v41 }
 0x41b   : > { %v6108_v52 = vpop.eup %6107  ;;  %v4297_v63 = vadd.f32 1.0, %v6106_v9 }
 0x41c   : > { %v6110_v23 = vpop.eup %6109  ;;  %v4300_v61 = vadd.f32 1.0, %v6108_v52  ;;  %v4331_v22 = vmul.f32 %v4299_v56, %v4203_v47 }
 0x41d   : > { %v4329_v26 = vmul.f32 %v4297_v63, %v4201_v51  ;;  %v4298_v20 = vadd.f32 1.0, %v6110_v23  ;;  %v4410_v51 = vld [vmem:[%s8273_s6] sm:$0x1] }
 0x41e   : > { %v4332_v25 = vmul.f32 %v4300_v61, %v4204_v21  ;;  %v4388_v28 = vsel %vm1805_vm6, %v4331_v22, 0.0 }
 0x41f   : > { %v4384_v15 = vsel %vm1805_vm6, %v4329_v26, 0.0  ;;  %v4330_v6 = vmul.f32 %v4298_v20, %v4202_v43 }
 0x420   : > { %v4385_v18 = vadd.f32 %v4384_v15, %v4383_v45  ;;  %v4390_v2 = vsel %vm1805_vm6, %v4332_v25, 0.0 }
 0x421   : > { %v4386_v1 = vsel %vm1805_vm6, %v4330_v6, 0.0 }
 0x422   : > { %v4387_v8 = vadd.f32 %v4386_v1, %v4385_v18 }
 0x424   : > { %v4389_v10 = vadd.f32 %v4388_v28, %v4387_v8 }
 0x426   : > { %v4391_v46 = vadd.f32 %v4390_v2, %v4389_v10 }
 0x42d   : > { %v4703_v19 = vpop.f32.mrb[28].mxu1 }
 0x42e   : > { %v4171_v62 = vadd.f32 %v4703_v19, %v8146_v32  ;;  %v4162_v59 = vpop.f32.mrb[29].mxu1 }
 0x42f   : > { %v4163_v17 = vadd.f32 %v8146_v32, %v4162_v59  ;;  %v4704_v0 = vpop.f32.mrb[30].mxu1 }
 0x430   : > { %v4239_v5 = vmul.f32 0.70710677, %v4171_v62  ;;  %v4174_v54 = vadd.f32 %v4704_v0, %v8146_v32  ;;  %v4165_v58 = vpop.f32.mrb[31].mxu1  ;;  %v4207_v29 = vmul.f32 0.5, %v4171_v62 }
 0x431   : > { %v4237_v39 = vmul.f32 0.70710677, %v4163_v17  ;;  %v4166_v3 = vadd.f32 %v8146_v32, %v4165_v58  ;;  %v4205_v40 = vmul.f32 0.5, %v4163_v17 }
 0x432   : > { %6111 = verf.f32 %v4239_v5  ;;  %v4240_v7 = vmul.f32 0.70710677, %v4174_v54  ;;  %v4208_v14 = vmul.f32 0.5, %v4174_v54 }
 0x433   : > { %6113 = verf.f32 %v4237_v39  ;;  %v4238_v24 = vmul.f32 0.70710677, %v4166_v3  ;;  %v4206_v16 = vmul.f32 0.5, %v4166_v3 }
 0x434   : > { %6115 = verf.f32 %v4240_v7 }
 0x435   : > { %6117 = verf.f32 %v4238_v24 }
 0x43c   : > { %v6112_v55 = vpop.eup %6111 }
 0x43d   : > { %v6114_v57 = vpop.eup %6113  ;;  %v4303_v11 = vadd.f32 1.0, %v6112_v55 }
 0x43e   : > { %v6116_v53 = vpop.eup %6115  ;;  %v4301_v37 = vadd.f32 1.0, %v6114_v57 }
 0x43f   : > { %v6118_v13 = vpop.eup %6117  ;;  %v4304_v38 = vadd.f32 1.0, %v6116_v53  ;;  %v4335_v50 = vmul.f32 %v4303_v11, %v4207_v29 }
 0x440   : > { %v4333_v4 = vmul.f32 %v4301_v37, %v4205_v40  ;;  %v4302_v36 = vadd.f32 1.0, %v6118_v13 }
 0x441   : > { %v4336_v31 = vmul.f32 %v4304_v38, %v4208_v14  ;;  %v4396_v42 = vsel %vm1805_vm6, %v4335_v50, 0.0 }
 0x442   : > { %v4392_v32 = vsel %vm1805_vm6, %v4333_v4, 0.0  ;;  %v4334_v45 = vmul.f32 %v4302_v36, %v4206_v16 }
 0x443   : > { %v4393_v33 = vadd.f32 %v4392_v32, %v4391_v46  ;;  %v4398_v48 = vsel %vm1805_vm6, %v4336_v31, 0.0 }
 0x444   : > { %v4394_v44 = vsel %vm1805_vm6, %v4334_v45, 0.0 }
 0x445   : > { %v4395_v49 = vadd.f32 %v4394_v44, %v4393_v33 }
 0x447   : > { %v4397_v30 = vadd.f32 %v4396_v42, %v4395_v49 }
 0x449   : > { %v4399_v27 = vadd.f32 %v4398_v48, %v4397_v30 }
 0x44b   : > { %v4400_v12 = vrot.slane %v4399_v27, 4 }
 0x44d   : > { %v4401_v35 = vadd.f32 %v4400_v12, %v4399_v27 }
 0x44f   : > { %v4402_v60 = vrot.slane %v4401_v35, 2 }
 0x451   : > { %v4403_v34 = vadd.f32 %v4402_v60, %v4401_v35 }
 0x453   : > { %v4404_v41 = vrot.slane %v4403_v34, 1 }
 0x455   : > { %v4405_v9 = vadd.f32 %v4404_v41, %v4403_v34 }
 0x457   : > { %v4406_v52 = vmul.f32 0.00390625, %v4405_v9 }
 0x459   : > { %v4407_v56 = vpack.c.bf16 %v4406_v52, %v4406_v52 }
 0x45b   : > { %4708 = vmatmul.mubr.msk.bf16.vlgmr.msra.gmra.mrb[32].mxu0 %vm1805_vm6, %v4407_v56 }
 0x52e   : > { %v4454_v63 = vpop.f32.mrb[32].mxu0 }
 0x52f   : > { %v4455_v23 = vadd.f32 %v4454_v63, %v4410_v51  ;;  %v4709_v47 = vpop.f32.mrb[33].mxu0 }
 0x530   : > { %v4457_v26 = vpop.f32.mrb[34].mxu0 }
 0x531   : > { %4460 = vst [vmem:[%s270_s17] sm:$0x1] %v4455_v23  ;;  %v4710_v61 = vpop.f32.mrb[35].mxu0 }
 0x532   : > { %6144 = shalt.err (!%p6141_p3)
}
 0x533   : > { %s6145_s18 = scalar_lea.hbm %s8225_s14, 16  ;;  %s6149_s29 = scalar_lea.hbm %s8274_s7, 32 }
 0x534   : > { %p6146_p4 = scmp.ne.s32.totalorder %s8225_s14, %s6145_s18  ;;  %p6150_p9 = scmp.lt.u32.totalorder %s8225_s14, %s8274_s7 }
 0x535   : > { %p6151_p10 = scmp.lt.u32.totalorder %s6149_s29, %s6145_s18  ;;  %p6153_p12 = scmp.lt.u32.totalorder %s6145_s18, %s8225_s14 }
 0x536   : > { %p6147_p7 = pnand %p6146_p4, %p6288_p5 }
 0x537   : > { %p6152_p11 = por %p6151_p10, %p6150_p9 }
 0x538   : > { %p6148_p8 = pneg %p6147_p7 }
 0x539   : > { %p6154_p13 = por %p6153_p12, %p6152_p11 }
 0x53b   : > { %p6155_p0 = pnand %p6154_p13, %p6148_p8 }
 0x53d   : > { %6158 = shalt.err (!%p6155_p0)
}
 0x53e   : > { %4713 = dma.vmem_to_hbm [thread:$0]  (%p6288_p5), %s8227_s20, 16, %s8225_s14, %s4462_s16  }
 0x53f PF: > { %p4719_p1 = scmp.ge.s32.totalorder %s6193_s27, 2  ;;  %s4486_s9 = sand.u32 1, %s6181_s24  }
 0x540   : > { %s4487_s13 = scalar_lea.sflag [#allocation5], %s4486_s9 }
 0x541   : > { %p4716_p2 = pnand %p4719_p1, %p6292_p6 }
 0x543   : > { %6176 = dma.done.wait (!%p4716_p2), %s4487_s13, 16  }
 0x544   : > { %6178 = vsyncadd (!%p4716_p2), %s4487_s13, 4294967280  ;;  %p17_p3 = scmp.ge.s32.totalorder %s6275_s30, 4   ;;  %s8328_s24 = smov %s6185_s25 }
 0x545   : > { %s8329_s25 = smov %s6189_s26  ;;  %s8330_s26 = smov %s6286_s10 }
 0x546   : > { %s8331_s27 = smov %s6275_s30  ;;  %19 = sbr.rel (!%p17_p3) target bundleno = 3 (0x3), region = 89 }
 0x54d   :  { %4491 = vsyncpa [#allocation5], 1 }
 0x54e   :  { %4493 = vsyncpa [#allocation5 + $0x1], 1 }

</bundles_post_ra>
